<compile_context>
chip_gen: v5e
topology: v5e:2x2
jax: 0.10.0
libtpu: 0.0.40
codegen_flags: <defaults>
</compile_context>

<pallas_src>
import jax
import jax.numpy as jnp
from jax import lax
from jax.experimental import pallas as pl
from jax.experimental.pallas import tpu as pltpu

D_MODEL = 128
NHEAD = 4
HD = D_MODEL // NHEAD
NUM_LAYERS = 2
DFF = 256
LN_EPS = 1e-5
NEG_INF = -1e30
MXU_DTYPE = jnp.bfloat16   # matmul operand dtype (f32 accumulation everywhere)


def _layernorm(v, g, b):
    mu = jnp.mean(v, axis=-1, keepdims=True)
    var = jnp.mean((v - mu) ** 2, axis=-1, keepdims=True)
    return (v - mu) * lax.rsqrt(var + LN_EPS) * g + b


def _leaky_relu(v):
    return jnp.where(v > 0, v, 0.1 * v)


def _softplus(v):
    # numerically stable softplus
    return jnp.maximum(v, 0.0) + jnp.log1p(jnp.exp(-jnp.abs(v)))


def _dense(a, w, bias):
    # bf16 operands on the MXU, f32 accumulation + f32 bias add
    return jnp.dot(a.astype(MXU_DTYPE), w,
                   preferred_element_type=jnp.float32) + bias


# ----------------------------------------------------------------------------
# Pallas kernel
# ----------------------------------------------------------------------------
def commodity_transformer_kernel(
    x_ref, pe_ref, mask_ref,
    w_in_ref, b_in_ref,
    wqkv_ref, bqkv_ref, wo_ref, bo_ref, ln_ref,
    w1_ref, b1_ref, w2_ref, b2_ref,
    sln_ref, ws_ref, bs_ref,
    wh1_ref, bh1_ref, wh2_ref, bh2_ref,
    o_ref,
    attn_scr,
):
    Bblk, T, Din = x_ref.shape
    D = D_MODEL
    scale = 1.0 / (HD ** 0.5)

    # input projection + positional encoding (pe already tiled to (Bblk*T, D))
    x = x_ref[...].reshape(Bblk * T, Din)
    h = _dense(x, w_in_ref[...], b_in_ref[...]) + pe_ref[...]

    mask = mask_ref[...]                                   # additive causal bias (T, T)

    # 2 post-norm transformer encoder layers (dropout = identity in eval mode)
    for L in range(NUM_LAYERS):
        qkv = _dense(h, wqkv_ref[L], bqkv_ref[L])          # (Bblk*T, 3D) f32

        # per-example, per-head attention; write each head to its static
        # (row, lane) slice of the VMEM scratch (no concatenates).
        for b in range(Bblk):
            r0 = b * T
            for hh in range(NHEAD):
                c0 = hh * HD
                q = qkv[r0:r0 + T, c0:c0 + HD]
                k = qkv[r0:r0 + T, D + c0:D + c0 + HD]
                v = qkv[r0:r0 + T, 2 * D + c0:2 * D + c0 + HD]
                s = jnp.dot(q, k.T, preferred_element_type=jnp.float32)
                s = s * scale + mask
                s = s - jnp.max(s, axis=-1, keepdims=True)
                p = jnp.exp(s)
                p = p * pl.reciprocal(jnp.sum(p, axis=-1, keepdims=True),
                                      approx=True)
                attn_scr[r0:r0 + T, c0:c0 + HD] = jnp.dot(
                    p, v, preferred_element_type=jnp.float32)

        attn = _dense(attn_scr[...], wo_ref[L], bo_ref[L])  # (Bblk*T, D)
        lnL = ln_ref[L]                                     # (4, D): g1,b1,g2,b2
        h = _layernorm(h + attn, lnL[0:1], lnL[1:2])

        ff = jnp.maximum(_dense(h, w1_ref[L], b1_ref[L]), 0.0)   # relu
        ff = _dense(ff, w2_ref[L], b2_ref[L])
        h = _layernorm(h + ff, lnL[2:3], lnL[3:4])

    # last token of each example
    last = h.reshape(Bblk, T, D)[:, T - 1, :]              # (Bblk, D)

    # shared head: LayerNorm -> Linear -> LeakyReLU(0.1) -> (Dropout = id)
    sln = sln_ref[...]
    feat = _layernorm(last, sln[0:1], sln[1:2])
    feat = _leaky_relu(_dense(feat, ws_ref[...], bs_ref[...]))

    # three output heads: first layers stacked into one (D, 3D) matmul,
    # second layers packed block-diagonally into one (3D, 128) matmul.
    z = _leaky_relu(_dense(feat, wh1_ref[...], bh1_ref[...]))    # (Bblk, 3D)
    raw = _dense(z, wh2_ref[...], bh2_ref[...])                  # (Bblk, 128)

    sp = _softplus(raw)
    lane = lax.broadcasted_iota(jnp.int32, raw.shape, 1)
    out = jnp.where(lane == 0, raw,                              # mu
          jnp.where(lane == 1, sp + 0.001,                       # sigma
          jnp.where(lane == 2, sp + 2.0, 0.0)))                  # nu
    o_ref[0] = out


def _const_spec(arr):
    nd = arr.ndim
    return pl.BlockSpec(arr.shape, lambda g, _n=nd: (0,) * _n)


def _choose_bblk(B, T, target_rows=128):
    """Largest divisor of B with Bblk*T <= target_rows, preferring >=2 grid steps
    so dual-TensorCore chips (v7x) keep both cores busy."""
    cap = max(1, target_rows // T)
    divs = [d for d in range(1, B + 1) if B % d == 0]
    cand = [d for d in divs if d <= cap and B // d >= 2]
    if not cand:
        cand = [d for d in divs if d <= cap] or [1]
    return max(cand)


def commodity_transformer_forward(x, params, target_rows=128):
    B, T, Din = x.shape
    bblk = _choose_bblk(B, T, target_rows)
    nblk = B // bblk

    (pe, mask, w_in, b_in, wqkv, bqkv, wo, bo, ln,
     w1, b1, w2, b2, sln, ws, bs, wh1, bh1, wh2, bh2) = params

    pe_blk = jnp.tile(pe, (bblk, 1))                # pre-broadcast pos-enc for the block
    consts = [pe_blk, mask, w_in, b_in, wqkv, bqkv, wo, bo, ln,
              w1, b1, w2, b2, sln, ws, bs, wh1, bh1, wh2, bh2]

    in_specs = [pl.BlockSpec((bblk, T, Din), lambda g: (g, 0, 0))]
    in_specs += [_const_spec(c) for c in consts]

    out = pl.pallas_call(
        commodity_transformer_kernel,
        out_shape=jax.ShapeDtypeStruct((nblk, bblk, D_MODEL), jnp.float32),
        grid_spec=pltpu.PrefetchScalarGridSpec(
            num_scalar_prefetch=0,
            grid=(nblk,),
            in_specs=in_specs,
            out_specs=pl.BlockSpec((1, bblk, D_MODEL), lambda g: (g, 0, 0)),
            scratch_shapes=[pltpu.VMEM((bblk * T, D_MODEL), jnp.float32)],
        ),
        compiler_params=pltpu.CompilerParams(
            dimension_semantics=("parallel",),
        ),
    )(x, *consts)

    out = out.reshape(B, D_MODEL)
    return out[:, 0], out[:, 1], out[:, 2]


# ----------------------------------------------------------------------------
# Pure-JAX reference (same packed params, same bf16 matmul convention)
# ----------------------------------------------------------------------------
def commodity_transformer_reference(x, params):
    (pe, mask, w_in, b_in, wqkv, bqkv, wo, bo, ln,
     w1, b1, w2, b2, sln, ws, bs, wh1, bh1, wh2, bh2) = params
    B, T, Din = x.shape
    D = D_MODEL

    h = _dense(x.reshape(B * T, Din), w_in, b_in) + jnp.tile(pe, (B, 1))
    for L in range(NUM_LAYERS):
        qkv = _dense(h, wqkv[L], bqkv[L]).reshape(B, T, 3 * D)
        q = qkv[..., :D].reshape(B, T, NHEAD, HD).transpose(0, 2, 1, 3)
        k = qkv[..., D:2 * D].reshape(B, T, NHEAD, HD).transpose(0, 2, 1, 3)
        v = qkv[..., 2 * D:].reshape(B, T, NHEAD, HD).transpose(0, 2, 1, 3)
        s = jnp.einsum('bhqd,bhkd->bhqk', q, k,
                       preferred_element_type=jnp.float32) / (HD ** 0.5) + mask
        p = jax.nn.softmax(s, axis=-1)
        a = jnp.einsum('bhqk,bhkd->bhqd', p, v,
                       preferred_element_type=jnp.float32)
        a = a.transpose(0, 2, 1, 3).reshape(B * T, D)
        attn = _dense(a, wo[L], bo[L])
        lnL = ln[L]
        h = _layernorm(h + attn, lnL[0:1], lnL[1:2])
        ff = jnp.maximum(_dense(h, w1[L], b1[L]), 0.0)
        ff = _dense(ff, w2[L], b2[L])
        h = _layernorm(h + ff, lnL[2:3], lnL[3:4])

    last = h.reshape(B, T, D)[:, -1, :]
    feat = _layernorm(last, sln[0:1], sln[1:2])
    feat = _leaky_relu(_dense(feat, ws, bs))
    z = _leaky_relu(_dense(feat, wh1, bh1))
    raw = _dense(z, wh2, bh2)
    mu = raw[:, 0]
    sigma = _softplus(raw[:, 1]) + 0.001
    nu = _softplus(raw[:, 2]) + 2.0
    return mu, sigma, nu


# ----------------------------------------------------------------------------
# Parameter construction (PyTorch-equivalent layout, pre-transposed for the MXU)
# ----------------------------------------------------------------------------
def make_positional_encoding(T, d_model):
    position = jnp.arange(T, dtype=jnp.float32)[:, None]
    div_term = jnp.exp(jnp.arange(0, d_model, 2, dtype=jnp.float32)
                       * (-jnp.log(10000.0) / d_model))
    pe = jnp.zeros((T, d_model), jnp.float32)
    pe = pe.at[:, 0::2].set(jnp.sin(position * div_term))
    pe = pe.at[:, 1::2].set(jnp.cos(position * div_term))
    return pe


def make_causal_bias(T):
    row = jnp.arange(T)[:, None]
    col = jnp.arange(T)[None, :]
    return jnp.where(col > row, NEG_INF, 0.0).astype(jnp.float32)


def init_params(key, input_dim, T):
    D, L, F = D_MODEL, NUM_LAYERS, DFF
    ks = iter(jax.random.split(key, 64))

    def w(shape):   # weights stored pre-transposed: (in_features, out_features), bf16
        return (0.02 * jax.random.normal(next(ks), shape)).astype(MXU_DTYPE)

    def zeros(shape):
        return jnp.zeros(shape, jnp.float32)

    # output-head second layers, packed block-diagonally into one (3D, 128) weight:
    # lane 0 <- mu head, lane 1 <- log_sigma head, lane 2 <- log_nu head.
    wm2 = 0.02 * jax.random.normal(next(ks), (D,))
    wg2 = 0.02 * jax.random.normal(next(ks), (D,))
    wn2 = 0.02 * jax.random.normal(next(ks), (D,))
    wh2 = jnp.zeros((3 * D, D_MODEL), jnp.float32)
    wh2 = (wh2.at[0:D, 0].set(wm2)
              .at[D:2 * D, 1].set(wg2)
              .at[2 * D:3 * D, 2].set(wn2))
    bh2 = jnp.zeros((1, D_MODEL), jnp.float32).at[0, 2].set(0.5413)  # log_nu bias init

    # per-layer LayerNorm params packed [g1, b1, g2, b2]
    ln = jnp.stack([jnp.ones((L, D)), jnp.zeros((L, D)),
                    jnp.ones((L, D)), jnp.zeros((L, D))], axis=1).astype(jnp.float32)

    params = [
        make_positional_encoding(T, D),           # pe (T, D)
        make_causal_bias(T),                      # additive causal mask (T, T)
        w((input_dim, D)), zeros((1, D)),         # input_proj (pre-transposed)
        w((L, D, 3 * D)), zeros((L, 1, 3 * D)),   # qkv in_proj
        w((L, D, D)), zeros((L, 1, D)),           # attn out_proj
        ln,                                       # norm1/norm2 gains + biases
        w((L, D, F)), zeros((L, 1, F)),           # linear1
        w((L, F, D)), zeros((L, 1, D)),           # linear2
        jnp.stack([jnp.ones(D), jnp.zeros(D)]).astype(jnp.float32),  # shared LN (2, D)
        w((D, D)), zeros((1, D)),                 # shared Linear
        w((D, 3 * D)), zeros((1, 3 * D)),         # mu/sigma/nu head linear1 (stacked)
        wh2.astype(MXU_DTYPE), bh2,               # head linear2 (block-diag packed)
    ]
    return params


if __name__ == "__main__":
    # NOTE: dropout layers are identity (eval-mode semantics).
    B, T, INPUT_DIM = 2, 8, 8
    key = jax.random.PRNGKey(0)
    kx, kp = jax.random.split(key)

    x = jax.random.normal(kx, (B, T, INPUT_DIM), jnp.float32)
    params = init_params(kp, INPUT_DIM, T)

    mu, sigma, nu = jax.jit(commodity_transformer_forward)(x, params)
    jax.block_until_ready((mu, sigma, nu))

    # shape / range sanity (mirrors the PyTorch head semantics)
    assert mu.shape == (B,) and sigma.shape == (B,) and nu.shape == (B,)
    assert bool(jnp.all(jnp.isfinite(mu)))
    assert bool(jnp.all(sigma > 0.001)) and bool(jnp.all(nu > 2.0))

    # numerical check against a pure-JAX reference with identical params
    mu_r, sigma_r, nu_r = jax.jit(commodity_transformer_reference)(x, params)
    jax.block_until_ready((mu_r, sigma_r, nu_r))
    assert bool(jnp.allclose(mu, mu_r, rtol=5e-2, atol=5e-3)), (mu, mu_r)
    assert bool(jnp.allclose(sigma, sigma_r, rtol=5e-2, atol=5e-3)), (sigma, sigma_r)
    assert bool(jnp.allclose(nu, nu_r, rtol=5e-2, atol=5e-3)), (nu, nu_r)

    print("KERNEL_OK")
</pallas_src>

<mosaic_0001>
module attributes {stable_mosaic.version = 11 : i64} {
  func.func @commodity_transformer_kernel(%arg0: i32, %arg1: memref<1x8x8xf32, #tpu.memory_space<vmem>>, %arg2: memref<8x128xf32, #tpu.memory_space<vmem>>, %arg3: memref<8x8xf32, #tpu.memory_space<vmem>>, %arg4: memref<8x128xbf16, #tpu.memory_space<vmem>>, %arg5: memref<1x128xf32, #tpu.memory_space<vmem>>, %arg6: memref<2x128x384xbf16, #tpu.memory_space<vmem>>, %arg7: memref<2x1x384xf32, #tpu.memory_space<vmem>>, %arg8: memref<2x128x128xbf16, #tpu.memory_space<vmem>>, %arg9: memref<2x1x128xf32, #tpu.memory_space<vmem>>, %arg10: memref<2x4x128xf32, #tpu.memory_space<vmem>>, %arg11: memref<2x128x256xbf16, #tpu.memory_space<vmem>>, %arg12: memref<2x1x256xf32, #tpu.memory_space<vmem>>, %arg13: memref<2x256x128xbf16, #tpu.memory_space<vmem>>, %arg14: memref<2x1x128xf32, #tpu.memory_space<vmem>>, %arg15: memref<2x128xf32, #tpu.memory_space<vmem>>, %arg16: memref<128x128xbf16, #tpu.memory_space<vmem>>, %arg17: memref<1x128xf32, #tpu.memory_space<vmem>>, %arg18: memref<128x384xbf16, #tpu.memory_space<vmem>>, %arg19: memref<1x384xf32, #tpu.memory_space<vmem>>, %arg20: memref<384x128xbf16, #tpu.memory_space<vmem>>, %arg21: memref<1x128xf32, #tpu.memory_space<vmem>>, %arg22: memref<1x1x128xf32, #tpu.memory_space<vmem>>, %arg23: memref<8x128xf32, #tpu.memory_space<vmem>>) attributes {dimension_semantics = [#tpu.dimension_semantics<parallel>], iteration_bounds = array<i64: 2>, scalar_prefetch = 0 : i64, scratch_operands = 1 : i64, tpu.core_type = #tpu.core_type<tc>, window_params = [{transform_indices = @transform_0, window_bounds = array<i64: 1, 8, 8>}, {pipeline_mode = #tpu.pipeline_mode<synchronous>, transform_indices = @transform_1, window_bounds = array<i64: 8, 128>}, {pipeline_mode = #tpu.pipeline_mode<synchronous>, transform_indices = @transform_2, window_bounds = array<i64: 8, 8>}, {pipeline_mode = #tpu.pipeline_mode<synchronous>, transform_indices = @transform_3, window_bounds = array<i64: 8, 128>}, {pipeline_mode = #tpu.pipeline_mode<synchronous>, transform_indices = @transform_4, window_bounds = array<i64: 1, 128>}, {pipeline_mode = #tpu.pipeline_mode<synchronous>, transform_indices = @transform_5, window_bounds = array<i64: 2, 128, 384>}, {pipeline_mode = #tpu.pipeline_mode<synchronous>, transform_indices = @transform_6, window_bounds = array<i64: 2, 1, 384>}, {pipeline_mode = #tpu.pipeline_mode<synchronous>, transform_indices = @transform_7, window_bounds = array<i64: 2, 128, 128>}, {pipeline_mode = #tpu.pipeline_mode<synchronous>, transform_indices = @transform_8, window_bounds = array<i64: 2, 1, 128>}, {pipeline_mode = #tpu.pipeline_mode<synchronous>, transform_indices = @transform_9, window_bounds = array<i64: 2, 4, 128>}, {pipeline_mode = #tpu.pipeline_mode<synchronous>, transform_indices = @transform_10, window_bounds = array<i64: 2, 128, 256>}, {pipeline_mode = #tpu.pipeline_mode<synchronous>, transform_indices = @transform_11, window_bounds = array<i64: 2, 1, 256>}, {pipeline_mode = #tpu.pipeline_mode<synchronous>, transform_indices = @transform_12, window_bounds = array<i64: 2, 256, 128>}, {pipeline_mode = #tpu.pipeline_mode<synchronous>, transform_indices = @transform_13, window_bounds = array<i64: 2, 1, 128>}, {pipeline_mode = #tpu.pipeline_mode<synchronous>, transform_indices = @transform_14, window_bounds = array<i64: 2, 128>}, {pipeline_mode = #tpu.pipeline_mode<synchronous>, transform_indices = @transform_15, window_bounds = array<i64: 128, 128>}, {pipeline_mode = #tpu.pipeline_mode<synchronous>, transform_indices = @transform_16, window_bounds = array<i64: 1, 128>}, {pipeline_mode = #tpu.pipeline_mode<synchronous>, transform_indices = @transform_17, window_bounds = array<i64: 128, 384>}, {pipeline_mode = #tpu.pipeline_mode<synchronous>, transform_indices = @transform_18, window_bounds = array<i64: 1, 384>}, {pipeline_mode = #tpu.pipeline_mode<synchronous>, transform_indices = @transform_19, window_bounds = array<i64: 384, 128>}, {pipeline_mode = #tpu.pipeline_mode<synchronous>, transform_indices = @transform_20, window_bounds = array<i64: 1, 128>}, {transform_indices = @transform_21, window_bounds = array<i64: 1, 1, 128>}]} {
    %c0 = arith.constant 0 : index
    %c0_0 = arith.constant 0 : index
    %c0_1 = arith.constant 0 : index
    %0 = vector.load %arg1[%c0, %c0_0, %c0_1] : memref<1x8x8xf32, #tpu.memory_space<vmem>>, vector<1x8x8xf32>
    %1 = vector.shape_cast %0 : vector<1x8x8xf32> to vector<8x8xf32>
    %c0_2 = arith.constant 0 : index
    %c0_3 = arith.constant 0 : index
    %2 = vector.load %arg4[%c0_2, %c0_3] : memref<8x128xbf16, #tpu.memory_space<vmem>>, vector<8x128xbf16>
    %c0_4 = arith.constant 0 : index
    %c0_5 = arith.constant 0 : index
    %3 = vector.load %arg5[%c0_4, %c0_5] : memref<1x128xf32, #tpu.memory_space<vmem>>, vector<1x128xf32>
    %4 = arith.truncf %1 : vector<8x8xf32> to vector<8x8xbf16>
    %cst = arith.constant dense<0.000000e+00> : vector<8x128xf32>
    %5 = tpu.matmul %4, %2, %cst {dimension_numbers = #tpu.dot_dimension_numbers<[1], [0], [0], [1], [0, 0, 1, 1], [], []>} : vector<8x8xbf16>, vector<8x128xbf16>, vector<8x128xf32> -> vector<8x128xf32>
    %6 = vector.broadcast %3 : vector<1x128xf32> to vector<8x128xf32>
    %7 = arith.addf %5, %6 : vector<8x128xf32>
    %c0_6 = arith.constant 0 : index
    %c0_7 = arith.constant 0 : index
    %8 = vector.load %arg2[%c0_6, %c0_7] : memref<8x128xf32, #tpu.memory_space<vmem>>, vector<8x128xf32>
    %9 = arith.addf %7, %8 : vector<8x128xf32>
    %c0_8 = arith.constant 0 : index
    %c0_9 = arith.constant 0 : index
    %10 = vector.load %arg3[%c0_8, %c0_9] : memref<8x8xf32, #tpu.memory_space<vmem>>, vector<8x8xf32>
    %c0_10 = arith.constant 0 : index
    %c0_11 = arith.constant 0 : index
    %c0_12 = arith.constant 0 : index
    %11 = vector.load %arg6[%c0_10, %c0_11, %c0_12] : memref<2x128x384xbf16, #tpu.memory_space<vmem>>, vector<1x128x384xbf16>
    %12 = vector.shape_cast %11 : vector<1x128x384xbf16> to vector<128x384xbf16>
    %c0_13 = arith.constant 0 : index
    %c0_14 = arith.constant 0 : index
    %c0_15 = arith.constant 0 : index
    %13 = vector.load %arg7[%c0_13, %c0_14, %c0_15] : memref<2x1x384xf32, #tpu.memory_space<vmem>>, vector<1x1x384xf32>
    %14 = vector.shape_cast %13 : vector<1x1x384xf32> to vector<1x384xf32>
    %15 = arith.truncf %9 : vector<8x128xf32> to vector<8x128xbf16>
    %cst_16 = arith.constant dense<0.000000e+00> : vector<8x384xf32>
    %16 = tpu.matmul %15, %12, %cst_16 {dimension_numbers = #tpu.dot_dimension_numbers<[1], [0], [0], [1], [0, 0, 1, 1], [], []>} : vector<8x128xbf16>, vector<128x384xbf16>, vector<8x384xf32> -> vector<8x384xf32>
    %17 = vector.broadcast %14 : vector<1x384xf32> to vector<8x384xf32>
    %18 = arith.addf %16, %17 : vector<8x384xf32>
    %19 = vector.extract_strided_slice %18 {offsets = [0, 0], sizes = [8, 32], strides = [1, 1]} : vector<8x384xf32> to vector<8x32xf32>
    %20 = vector.extract_strided_slice %18 {offsets = [0, 128], sizes = [8, 32], strides = [1, 1]} : vector<8x384xf32> to vector<8x32xf32>
    %21 = vector.extract_strided_slice %18 {offsets = [0, 256], sizes = [8, 32], strides = [1, 1]} : vector<8x384xf32> to vector<8x32xf32>
    %22 = tpu.transpose %20, [1, 0] : vector<8x32xf32> -> vector<32x8xf32>
    %cst_17 = arith.constant dense<0.000000e+00> : vector<8x8xf32>
    %23 = tpu.matmul %19, %22, %cst_17 {dimension_numbers = #tpu.dot_dimension_numbers<[1], [0], [0], [1], [0, 0, 1, 1], [], []>} : vector<8x32xf32>, vector<32x8xf32>, vector<8x8xf32> -> vector<8x8xf32>
    %cst_18 = arith.constant 0.176776692 : f32
    %24 = vector.broadcast %cst_18 : f32 to vector<8x8xf32>
    %25 = arith.mulf %23, %24 : vector<8x8xf32>
    %26 = arith.addf %25, %10 : vector<8x8xf32>
    %cst_19 = arith.constant dense<0xFF800000> : vector<8xf32>
    %27 = vector.multi_reduction <maximumf>, %26, %cst_19 [1] : vector<8x8xf32> to vector<8xf32>
    %28 = vector.shape_cast %27 : vector<8xf32> to vector<8x1xf32>
    %29 = vector.broadcast %28 : vector<8x1xf32> to vector<8x8xf32>
    %30 = arith.subf %26, %29 : vector<8x8xf32>
    %31 = math.exp %30 : vector<8x8xf32>
    %cst_20 = arith.constant dense<0.000000e+00> : vector<8xf32>
    %32 = vector.multi_reduction <add>, %31, %cst_20 [1] : vector<8x8xf32> to vector<8xf32>
    %33 = vector.shape_cast %32 : vector<8xf32> to vector<8x1xf32>
    %34 = tpu.reciprocal %33 {approx = true} : vector<8x1xf32> -> vector<8x1xf32>
    %35 = vector.broadcast %34 : vector<8x1xf32> to vector<8x8xf32>
    %36 = arith.mulf %31, %35 : vector<8x8xf32>
    %cst_21 = arith.constant dense<0.000000e+00> : vector<8x32xf32>
    %37 = tpu.matmul %36, %21, %cst_21 {dimension_numbers = #tpu.dot_dimension_numbers<[1], [0], [0], [1], [0, 0, 1, 1], [], []>} : vector<8x8xf32>, vector<8x32xf32>, vector<8x32xf32> -> vector<8x32xf32>
    %c0_22 = arith.constant 0 : index
    %c0_23 = arith.constant 0 : index
    %38 = vector.load %arg23[%c0_22, %c0_23] : memref<8x128xf32, #tpu.memory_space<vmem>>, vector<8x32xf32>
    tpu.vector_store %arg23[%c0_22, %c0_23], %37 {strides = array<i32>} : memref<8x128xf32, #tpu.memory_space<vmem>>, vector<8x32xf32>,
    %39 = vector.extract_strided_slice %18 {offsets = [0, 32], sizes = [8, 32], strides = [1, 1]} : vector<8x384xf32> to vector<8x32xf32>
    %40 = vector.extract_strided_slice %18 {offsets = [0, 160], sizes = [8, 32], strides = [1, 1]} : vector<8x384xf32> to vector<8x32xf32>
    %41 = vector.extract_strided_slice %18 {offsets = [0, 288], sizes = [8, 32], strides = [1, 1]} : vector<8x384xf32> to vector<8x32xf32>
    %42 = tpu.transpose %40, [1, 0] : vector<8x32xf32> -> vector<32x8xf32>
    %cst_24 = arith.constant dense<0.000000e+00> : vector<8x8xf32>
    %43 = tpu.matmul %39, %42, %cst_24 {dimension_numbers = #tpu.dot_dimension_numbers<[1], [0], [0], [1], [0, 0, 1, 1], [], []>} : vector<8x32xf32>, vector<32x8xf32>, vector<8x8xf32> -> vector<8x8xf32>
    %cst_25 = arith.constant 0.176776692 : f32
    %44 = vector.broadcast %cst_25 : f32 to vector<8x8xf32>
    %45 = arith.mulf %43, %44 : vector<8x8xf32>
    %46 = arith.addf %45, %10 : vector<8x8xf32>
    %cst_26 = arith.constant dense<0xFF800000> : vector<8xf32>
    %47 = vector.multi_reduction <maximumf>, %46, %cst_26 [1] : vector<8x8xf32> to vector<8xf32>
    %48 = vector.shape_cast %47 : vector<8xf32> to vector<8x1xf32>
    %49 = vector.broadcast %48 : vector<8x1xf32> to vector<8x8xf32>
    %50 = arith.subf %46, %49 : vector<8x8xf32>
    %51 = math.exp %50 : vector<8x8xf32>
    %cst_27 = arith.constant dense<0.000000e+00> : vector<8xf32>
    %52 = vector.multi_reduction <add>, %51, %cst_27 [1] : vector<8x8xf32> to vector<8xf32>
    %53 = vector.shape_cast %52 : vector<8xf32> to vector<8x1xf32>
    %54 = tpu.reciprocal %53 {approx = true} : vector<8x1xf32> -> vector<8x1xf32>
    %55 = vector.broadcast %54 : vector<8x1xf32> to vector<8x8xf32>
    %56 = arith.mulf %51, %55 : vector<8x8xf32>
    %cst_28 = arith.constant dense<0.000000e+00> : vector<8x32xf32>
    %57 = tpu.matmul %56, %41, %cst_28 {dimension_numbers = #tpu.dot_dimension_numbers<[1], [0], [0], [1], [0, 0, 1, 1], [], []>} : vector<8x8xf32>, vector<8x32xf32>, vector<8x32xf32> -> vector<8x32xf32>
    %c0_29 = arith.constant 0 : index
    %c32 = arith.constant 32 : index
    %58 = vector.load %arg23[%c0_29, %c32] : memref<8x128xf32, #tpu.memory_space<vmem>>, vector<8x32xf32>
    tpu.vector_store %arg23[%c0_29, %c32], %57 {strides = array<i32>} : memref<8x128xf32, #tpu.memory_space<vmem>>, vector<8x32xf32>,
    %59 = vector.extract_strided_slice %18 {offsets = [0, 64], sizes = [8, 32], strides = [1, 1]} : vector<8x384xf32> to vector<8x32xf32>
    %60 = vector.extract_strided_slice %18 {offsets = [0, 192], sizes = [8, 32], strides = [1, 1]} : vector<8x384xf32> to vector<8x32xf32>
    %61 = vector.extract_strided_slice %18 {offsets = [0, 320], sizes = [8, 32], strides = [1, 1]} : vector<8x384xf32> to vector<8x32xf32>
    %62 = tpu.transpose %60, [1, 0] : vector<8x32xf32> -> vector<32x8xf32>
    %cst_30 = arith.constant dense<0.000000e+00> : vector<8x8xf32>
    %63 = tpu.matmul %59, %62, %cst_30 {dimension_numbers = #tpu.dot_dimension_numbers<[1], [0], [0], [1], [0, 0, 1, 1], [], []>} : vector<8x32xf32>, vector<32x8xf32>, vector<8x8xf32> -> vector<8x8xf32>
    %cst_31 = arith.constant 0.176776692 : f32
    %64 = vector.broadcast %cst_31 : f32 to vector<8x8xf32>
    %65 = arith.mulf %63, %64 : vector<8x8xf32>
    %66 = arith.addf %65, %10 : vector<8x8xf32>
    %cst_32 = arith.constant dense<0xFF800000> : vector<8xf32>
    %67 = vector.multi_reduction <maximumf>, %66, %cst_32 [1] : vector<8x8xf32> to vector<8xf32>
    %68 = vector.shape_cast %67 : vector<8xf32> to vector<8x1xf32>
    %69 = vector.broadcast %68 : vector<8x1xf32> to vector<8x8xf32>
    %70 = arith.subf %66, %69 : vector<8x8xf32>
    %71 = math.exp %70 : vector<8x8xf32>
    %cst_33 = arith.constant dense<0.000000e+00> : vector<8xf32>
    %72 = vector.multi_reduction <add>, %71, %cst_33 [1] : vector<8x8xf32> to vector<8xf32>
    %73 = vector.shape_cast %72 : vector<8xf32> to vector<8x1xf32>
    %74 = tpu.reciprocal %73 {approx = true} : vector<8x1xf32> -> vector<8x1xf32>
    %75 = vector.broadcast %74 : vector<8x1xf32> to vector<8x8xf32>
    %76 = arith.mulf %71, %75 : vector<8x8xf32>
    %cst_34 = arith.constant dense<0.000000e+00> : vector<8x32xf32>
    %77 = tpu.matmul %76, %61, %cst_34 {dimension_numbers = #tpu.dot_dimension_numbers<[1], [0], [0], [1], [0, 0, 1, 1], [], []>} : vector<8x8xf32>, vector<8x32xf32>, vector<8x32xf32> -> vector<8x32xf32>
    %c0_35 = arith.constant 0 : index
    %c64 = arith.constant 64 : index
    %78 = vector.load %arg23[%c0_35, %c64] : memref<8x128xf32, #tpu.memory_space<vmem>>, vector<8x32xf32>
    tpu.vector_store %arg23[%c0_35, %c64], %77 {strides = array<i32>} : memref<8x128xf32, #tpu.memory_space<vmem>>, vector<8x32xf32>,
    %79 = vector.extract_strided_slice %18 {offsets = [0, 96], sizes = [8, 32], strides = [1, 1]} : vector<8x384xf32> to vector<8x32xf32>
    %80 = vector.extract_strided_slice %18 {offsets = [0, 224], sizes = [8, 32], strides = [1, 1]} : vector<8x384xf32> to vector<8x32xf32>
    %81 = vector.extract_strided_slice %18 {offsets = [0, 352], sizes = [8, 32], strides = [1, 1]} : vector<8x384xf32> to vector<8x32xf32>
    %82 = tpu.transpose %80, [1, 0] : vector<8x32xf32> -> vector<32x8xf32>
    %cst_36 = arith.constant dense<0.000000e+00> : vector<8x8xf32>
    %83 = tpu.matmul %79, %82, %cst_36 {dimension_numbers = #tpu.dot_dimension_numbers<[1], [0], [0], [1], [0, 0, 1, 1], [], []>} : vector<8x32xf32>, vector<32x8xf32>, vector<8x8xf32> -> vector<8x8xf32>
    %cst_37 = arith.constant 0.176776692 : f32
    %84 = vector.broadcast %cst_37 : f32 to vector<8x8xf32>
    %85 = arith.mulf %83, %84 : vector<8x8xf32>
    %86 = arith.addf %85, %10 : vector<8x8xf32>
    %cst_38 = arith.constant dense<0xFF800000> : vector<8xf32>
    %87 = vector.multi_reduction <maximumf>, %86, %cst_38 [1] : vector<8x8xf32> to vector<8xf32>
    %88 = vector.shape_cast %87 : vector<8xf32> to vector<8x1xf32>
    %89 = vector.broadcast %88 : vector<8x1xf32> to vector<8x8xf32>
    %90 = arith.subf %86, %89 : vector<8x8xf32>
    %91 = math.exp %90 : vector<8x8xf32>
    %cst_39 = arith.constant dense<0.000000e+00> : vector<8xf32>
    %92 = vector.multi_reduction <add>, %91, %cst_39 [1] : vector<8x8xf32> to vector<8xf32>
    %93 = vector.shape_cast %92 : vector<8xf32> to vector<8x1xf32>
    %94 = tpu.reciprocal %93 {approx = true} : vector<8x1xf32> -> vector<8x1xf32>
    %95 = vector.broadcast %94 : vector<8x1xf32> to vector<8x8xf32>
    %96 = arith.mulf %91, %95 : vector<8x8xf32>
    %cst_40 = arith.constant dense<0.000000e+00> : vector<8x32xf32>
    %97 = tpu.matmul %96, %81, %cst_40 {dimension_numbers = #tpu.dot_dimension_numbers<[1], [0], [0], [1], [0, 0, 1, 1], [], []>} : vector<8x8xf32>, vector<8x32xf32>, vector<8x32xf32> -> vector<8x32xf32>
    %c0_41 = arith.constant 0 : index
    %c96 = arith.constant 96 : index
    %98 = vector.load %arg23[%c0_41, %c96] : memref<8x128xf32, #tpu.memory_space<vmem>>, vector<8x32xf32>
    tpu.vector_store %arg23[%c0_41, %c96], %97 {strides = array<i32>} : memref<8x128xf32, #tpu.memory_space<vmem>>, vector<8x32xf32>,
    %c0_42 = arith.constant 0 : index
    %c0_43 = arith.constant 0 : index
    %99 = vector.load %arg23[%c0_42, %c0_43] : memref<8x128xf32, #tpu.memory_space<vmem>>, vector<8x128xf32>
    %c0_44 = arith.constant 0 : index
    %c0_45 = arith.constant 0 : index
    %c0_46 = arith.constant 0 : index
    %100 = vector.load %arg8[%c0_44, %c0_45, %c0_46] : memref<2x128x128xbf16, #tpu.memory_space<vmem>>, vector<1x128x128xbf16>
    %101 = vector.shape_cast %100 : vector<1x128x128xbf16> to vector<128x128xbf16>
    %c0_47 = arith.constant 0 : index
    %c0_48 = arith.constant 0 : index
    %c0_49 = arith.constant 0 : index
    %102 = vector.load %arg9[%c0_47, %c0_48, %c0_49] : memref<2x1x128xf32, #tpu.memory_space<vmem>>, vector<1x1x128xf32>
    %103 = vector.shape_cast %102 : vector<1x1x128xf32> to vector<1x128xf32>
    %104 = arith.truncf %99 : vector<8x128xf32> to vector<8x128xbf16>
    %cst_50 = arith.constant dense<0.000000e+00> : vector<8x128xf32>
    %105 = tpu.matmul %104, %101, %cst_50 {dimension_numbers = #tpu.dot_dimension_numbers<[1], [0], [0], [1], [0, 0, 1, 1], [], []>} : vector<8x128xbf16>, vector<128x128xbf16>, vector<8x128xf32> -> vector<8x128xf32>
    %106 = vector.broadcast %103 : vector<1x128xf32> to vector<8x128xf32>
    %107 = arith.addf %105, %106 : vector<8x128xf32>
    %c0_51 = arith.constant 0 : index
    %c0_52 = arith.constant 0 : index
    %c0_53 = arith.constant 0 : index
    %108 = vector.load %arg10[%c0_51, %c0_52, %c0_53] : memref<2x4x128xf32, #tpu.memory_space<vmem>>, vector<1x4x128xf32>
    %109 = vector.shape_cast %108 : vector<1x4x128xf32> to vector<4x128xf32>
    %110 = arith.addf %9, %107 : vector<8x128xf32>
    %111 = vector.extract_strided_slice %109 {offsets = [0, 0], sizes = [1, 128], strides = [1, 1]} : vector<4x128xf32> to vector<1x128xf32>
    %112 = vector.extract_strided_slice %109 {offsets = [1, 0], sizes = [1, 128], strides = [1, 1]} : vector<4x128xf32> to vector<1x128xf32>
    %cst_54 = arith.constant dense<0.000000e+00> : vector<8xf32>
    %113 = vector.multi_reduction <add>, %110, %cst_54 [1] : vector<8x128xf32> to vector<8xf32>
    %114 = vector.shape_cast %113 : vector<8xf32> to vector<8x1xf32>
    %cst_55 = arith.constant 1.280000e+02 : f32
    %115 = vector.broadcast %cst_55 : f32 to vector<8x1xf32>
    %116 = arith.divf %114, %115 : vector<8x1xf32>
    %117 = vector.broadcast %116 : vector<8x1xf32> to vector<8x128xf32>
    %118 = arith.subf %110, %117 : vector<8x128xf32>
    %119 = arith.mulf %118, %118 : vector<8x128xf32>
    %cst_56 = arith.constant dense<0.000000e+00> : vector<8xf32>
    %120 = vector.multi_reduction <add>, %119, %cst_56 [1] : vector<8x128xf32> to vector<8xf32>
    %121 = vector.shape_cast %120 : vector<8xf32> to vector<8x1xf32>
    %cst_57 = arith.constant 1.280000e+02 : f32
    %122 = vector.broadcast %cst_57 : f32 to vector<8x1xf32>
    %123 = arith.divf %121, %122 : vector<8x1xf32>
    %124 = vector.broadcast %116 : vector<8x1xf32> to vector<8x128xf32>
    %125 = arith.subf %110, %124 : vector<8x128xf32>
    %cst_58 = arith.constant 9.99999974E-6 : f32
    %126 = vector.broadcast %cst_58 : f32 to vector<8x1xf32>
    %127 = arith.addf %123, %126 : vector<8x1xf32>
    %128 = math.rsqrt %127 : vector<8x1xf32>
    %129 = vector.broadcast %128 : vector<8x1xf32> to vector<8x128xf32>
    %130 = arith.mulf %125, %129 : vector<8x128xf32>
    %131 = vector.broadcast %111 : vector<1x128xf32> to vector<8x128xf32>
    %132 = arith.mulf %130, %131 : vector<8x128xf32>
    %133 = vector.broadcast %112 : vector<1x128xf32> to vector<8x128xf32>
    %134 = arith.addf %132, %133 : vector<8x128xf32>
    %c0_59 = arith.constant 0 : index
    %c0_60 = arith.constant 0 : index
    %c0_61 = arith.constant 0 : index
    %135 = vector.load %arg11[%c0_59, %c0_60, %c0_61] : memref<2x128x256xbf16, #tpu.memory_space<vmem>>, vector<1x128x256xbf16>
    %136 = vector.shape_cast %135 : vector<1x128x256xbf16> to vector<128x256xbf16>
    %c0_62 = arith.constant 0 : index
    %c0_63 = arith.constant 0 : index
    %c0_64 = arith.constant 0 : index
    %137 = vector.load %arg12[%c0_62, %c0_63, %c0_64] : memref<2x1x256xf32, #tpu.memory_space<vmem>>, vector<1x1x256xf32>
    %138 = vector.shape_cast %137 : vector<1x1x256xf32> to vector<1x256xf32>
    %139 = arith.truncf %134 : vector<8x128xf32> to vector<8x128xbf16>
    %cst_65 = arith.constant dense<0.000000e+00> : vector<8x256xf32>
    %140 = tpu.matmul %139, %136, %cst_65 {dimension_numbers = #tpu.dot_dimension_numbers<[1], [0], [0], [1], [0, 0, 1, 1], [], []>} : vector<8x128xbf16>, vector<128x256xbf16>, vector<8x256xf32> -> vector<8x256xf32>
    %141 = vector.broadcast %138 : vector<1x256xf32> to vector<8x256xf32>
    %142 = arith.addf %140, %141 : vector<8x256xf32>
    %cst_66 = arith.constant 0.000000e+00 : f32
    %143 = vector.broadcast %cst_66 : f32 to vector<8x256xf32>
    %144 = arith.maximumf %142, %143 : vector<8x256xf32>
    %c0_67 = arith.constant 0 : index
    %c0_68 = arith.constant 0 : index
    %c0_69 = arith.constant 0 : index
    %145 = vector.load %arg13[%c0_67, %c0_68, %c0_69] : memref<2x256x128xbf16, #tpu.memory_space<vmem>>, vector<1x256x128xbf16>
    %146 = vector.shape_cast %145 : vector<1x256x128xbf16> to vector<256x128xbf16>
    %c0_70 = arith.constant 0 : index
    %c0_71 = arith.constant 0 : index
    %c0_72 = arith.constant 0 : index
    %147 = vector.load %arg14[%c0_70, %c0_71, %c0_72] : memref<2x1x128xf32, #tpu.memory_space<vmem>>, vector<1x1x128xf32>
    %148 = vector.shape_cast %147 : vector<1x1x128xf32> to vector<1x128xf32>
    %149 = arith.truncf %144 : vector<8x256xf32> to vector<8x256xbf16>
    %cst_73 = arith.constant dense<0.000000e+00> : vector<8x128xf32>
    %150 = tpu.matmul %149, %146, %cst_73 {dimension_numbers = #tpu.dot_dimension_numbers<[1], [0], [0], [1], [0, 0, 1, 1], [], []>} : vector<8x256xbf16>, vector<256x128xbf16>, vector<8x128xf32> -> vector<8x128xf32>
    %151 = vector.broadcast %148 : vector<1x128xf32> to vector<8x128xf32>
    %152 = arith.addf %150, %151 : vector<8x128xf32>
    %153 = arith.addf %134, %152 : vector<8x128xf32>
    %154 = vector.extract_strided_slice %109 {offsets = [2, 0], sizes = [1, 128], strides = [1, 1]} : vector<4x128xf32> to vector<1x128xf32>
    %155 = vector.extract_strided_slice %109 {offsets = [3, 0], sizes = [1, 128], strides = [1, 1]} : vector<4x128xf32> to vector<1x128xf32>
    %cst_74 = arith.constant dense<0.000000e+00> : vector<8xf32>
    %156 = vector.multi_reduction <add>, %153, %cst_74 [1] : vector<8x128xf32> to vector<8xf32>
    %157 = vector.shape_cast %156 : vector<8xf32> to vector<8x1xf32>
    %cst_75 = arith.constant 1.280000e+02 : f32
    %158 = vector.broadcast %cst_75 : f32 to vector<8x1xf32>
    %159 = arith.divf %157, %158 : vector<8x1xf32>
    %160 = vector.broadcast %159 : vector<8x1xf32> to vector<8x128xf32>
    %161 = arith.subf %153, %160 : vector<8x128xf32>
    %162 = arith.mulf %161, %161 : vector<8x128xf32>
    %cst_76 = arith.constant dense<0.000000e+00> : vector<8xf32>
    %163 = vector.multi_reduction <add>, %162, %cst_76 [1] : vector<8x128xf32> to vector<8xf32>
    %164 = vector.shape_cast %163 : vector<8xf32> to vector<8x1xf32>
    %cst_77 = arith.constant 1.280000e+02 : f32
    %165 = vector.broadcast %cst_77 : f32 to vector<8x1xf32>
    %166 = arith.divf %164, %165 : vector<8x1xf32>
    %167 = vector.broadcast %159 : vector<8x1xf32> to vector<8x128xf32>
    %168 = arith.subf %153, %167 : vector<8x128xf32>
    %cst_78 = arith.constant 9.99999974E-6 : f32
    %169 = vector.broadcast %cst_78 : f32 to vector<8x1xf32>
    %170 = arith.addf %166, %169 : vector<8x1xf32>
    %171 = math.rsqrt %170 : vector<8x1xf32>
    %172 = vector.broadcast %171 : vector<8x1xf32> to vector<8x128xf32>
    %173 = arith.mulf %168, %172 : vector<8x128xf32>
    %174 = vector.broadcast %154 : vector<1x128xf32> to vector<8x128xf32>
    %175 = arith.mulf %173, %174 : vector<8x128xf32>
    %176 = vector.broadcast %155 : vector<1x128xf32> to vector<8x128xf32>
    %177 = arith.addf %175, %176 : vector<8x128xf32>
    %c1 = arith.constant 1 : index
    %c0_79 = arith.constant 0 : index
    %c0_80 = arith.constant 0 : index
    %178 = vector.load %arg6[%c1, %c0_79, %c0_80] : memref<2x128x384xbf16, #tpu.memory_space<vmem>>, vector<1x128x384xbf16>
    %179 = vector.shape_cast %178 : vector<1x128x384xbf16> to vector<128x384xbf16>
    %c1_81 = arith.constant 1 : index
    %c0_82 = arith.constant 0 : index
    %c0_83 = arith.constant 0 : index
    %180 = vector.load %arg7[%c1_81, %c0_82, %c0_83] : memref<2x1x384xf32, #tpu.memory_space<vmem>>, vector<1x1x384xf32>
    %181 = vector.shape_cast %180 : vector<1x1x384xf32> to vector<1x384xf32>
    %182 = arith.truncf %177 : vector<8x128xf32> to vector<8x128xbf16>
    %cst_84 = arith.constant dense<0.000000e+00> : vector<8x384xf32>
    %183 = tpu.matmul %182, %179, %cst_84 {dimension_numbers = #tpu.dot_dimension_numbers<[1], [0], [0], [1], [0, 0, 1, 1], [], []>} : vector<8x128xbf16>, vector<128x384xbf16>, vector<8x384xf32> -> vector<8x384xf32>
    %184 = vector.broadcast %181 : vector<1x384xf32> to vector<8x384xf32>
    %185 = arith.addf %183, %184 : vector<8x384xf32>
    %186 = vector.extract_strided_slice %185 {offsets = [0, 0], sizes = [8, 32], strides = [1, 1]} : vector<8x384xf32> to vector<8x32xf32>
    %187 = vector.extract_strided_slice %185 {offsets = [0, 128], sizes = [8, 32], strides = [1, 1]} : vector<8x384xf32> to vector<8x32xf32>
    %188 = vector.extract_strided_slice %185 {offsets = [0, 256], sizes = [8, 32], strides = [1, 1]} : vector<8x384xf32> to vector<8x32xf32>
    %189 = tpu.transpose %187, [1, 0] : vector<8x32xf32> -> vector<32x8xf32>
    %cst_85 = arith.constant dense<0.000000e+00> : vector<8x8xf32>
    %190 = tpu.matmul %186, %189, %cst_85 {dimension_numbers = #tpu.dot_dimension_numbers<[1], [0], [0], [1], [0, 0, 1, 1], [], []>} : vector<8x32xf32>, vector<32x8xf32>, vector<8x8xf32> -> vector<8x8xf32>
    %cst_86 = arith.constant 0.176776692 : f32
    %191 = vector.broadcast %cst_86 : f32 to vector<8x8xf32>
    %192 = arith.mulf %190, %191 : vector<8x8xf32>
    %193 = arith.addf %192, %10 : vector<8x8xf32>
    %cst_87 = arith.constant dense<0xFF800000> : vector<8xf32>
    %194 = vector.multi_reduction <maximumf>, %193, %cst_87 [1] : vector<8x8xf32> to vector<8xf32>
    %195 = vector.shape_cast %194 : vector<8xf32> to vector<8x1xf32>
    %196 = vector.broadcast %195 : vector<8x1xf32> to vector<8x8xf32>
    %197 = arith.subf %193, %196 : vector<8x8xf32>
    %198 = math.exp %197 : vector<8x8xf32>
    %cst_88 = arith.constant dense<0.000000e+00> : vector<8xf32>
    %199 = vector.multi_reduction <add>, %198, %cst_88 [1] : vector<8x8xf32> to vector<8xf32>
    %200 = vector.shape_cast %199 : vector<8xf32> to vector<8x1xf32>
    %201 = tpu.reciprocal %200 {approx = true} : vector<8x1xf32> -> vector<8x1xf32>
    %202 = vector.broadcast %201 : vector<8x1xf32> to vector<8x8xf32>
    %203 = arith.mulf %198, %202 : vector<8x8xf32>
    %cst_89 = arith.constant dense<0.000000e+00> : vector<8x32xf32>
    %204 = tpu.matmul %203, %188, %cst_89 {dimension_numbers = #tpu.dot_dimension_numbers<[1], [0], [0], [1], [0, 0, 1, 1], [], []>} : vector<8x8xf32>, vector<8x32xf32>, vector<8x32xf32> -> vector<8x32xf32>
    %c0_90 = arith.constant 0 : index
    %c0_91 = arith.constant 0 : index
    %205 = vector.load %arg23[%c0_90, %c0_91] : memref<8x128xf32, #tpu.memory_space<vmem>>, vector<8x32xf32>
    tpu.vector_store %arg23[%c0_90, %c0_91], %204 {strides = array<i32>} : memref<8x128xf32, #tpu.memory_space<vmem>>, vector<8x32xf32>,
    %206 = vector.extract_strided_slice %185 {offsets = [0, 32], sizes = [8, 32], strides = [1, 1]} : vector<8x384xf32> to vector<8x32xf32>
    %207 = vector.extract_strided_slice %185 {offsets = [0, 160], sizes = [8, 32], strides = [1, 1]} : vector<8x384xf32> to vector<8x32xf32>
    %208 = vector.extract_strided_slice %185 {offsets = [0, 288], sizes = [8, 32], strides = [1, 1]} : vector<8x384xf32> to vector<8x32xf32>
    %209 = tpu.transpose %207, [1, 0] : vector<8x32xf32> -> vector<32x8xf32>
    %cst_92 = arith.constant dense<0.000000e+00> : vector<8x8xf32>
    %210 = tpu.matmul %206, %209, %cst_92 {dimension_numbers = #tpu.dot_dimension_numbers<[1], [0], [0], [1], [0, 0, 1, 1], [], []>} : vector<8x32xf32>, vector<32x8xf32>, vector<8x8xf32> -> vector<8x8xf32>
    %cst_93 = arith.constant 0.176776692 : f32
    %211 = vector.broadcast %cst_93 : f32 to vector<8x8xf32>
    %212 = arith.mulf %210, %211 : vector<8x8xf32>
    %213 = arith.addf %212, %10 : vector<8x8xf32>
    %cst_94 = arith.constant dense<0xFF800000> : vector<8xf32>
    %214 = vector.multi_reduction <maximumf>, %213, %cst_94 [1] : vector<8x8xf32> to vector<8xf32>
    %215 = vector.shape_cast %214 : vector<8xf32> to vector<8x1xf32>
    %216 = vector.broadcast %215 : vector<8x1xf32> to vector<8x8xf32>
    %217 = arith.subf %213, %216 : vector<8x8xf32>
    %218 = math.exp %217 : vector<8x8xf32>
    %cst_95 = arith.constant dense<0.000000e+00> : vector<8xf32>
    %219 = vector.multi_reduction <add>, %218, %cst_95 [1] : vector<8x8xf32> to vector<8xf32>
    %220 = vector.shape_cast %219 : vector<8xf32> to vector<8x1xf32>
    %221 = tpu.reciprocal %220 {approx = true} : vector<8x1xf32> -> vector<8x1xf32>
    %222 = vector.broadcast %221 : vector<8x1xf32> to vector<8x8xf32>
    %223 = arith.mulf %218, %222 : vector<8x8xf32>
    %cst_96 = arith.constant dense<0.000000e+00> : vector<8x32xf32>
    %224 = tpu.matmul %223, %208, %cst_96 {dimension_numbers = #tpu.dot_dimension_numbers<[1], [0], [0], [1], [0, 0, 1, 1], [], []>} : vector<8x8xf32>, vector<8x32xf32>, vector<8x32xf32> -> vector<8x32xf32>
    %c0_97 = arith.constant 0 : index
    %c32_98 = arith.constant 32 : index
    %225 = vector.load %arg23[%c0_97, %c32_98] : memref<8x128xf32, #tpu.memory_space<vmem>>, vector<8x32xf32>
    tpu.vector_store %arg23[%c0_97, %c32_98], %224 {strides = array<i32>} : memref<8x128xf32, #tpu.memory_space<vmem>>, vector<8x32xf32>,
    %226 = vector.extract_strided_slice %185 {offsets = [0, 64], sizes = [8, 32], strides = [1, 1]} : vector<8x384xf32> to vector<8x32xf32>
    %227 = vector.extract_strided_slice %185 {offsets = [0, 192], sizes = [8, 32], strides = [1, 1]} : vector<8x384xf32> to vector<8x32xf32>
    %228 = vector.extract_strided_slice %185 {offsets = [0, 320], sizes = [8, 32], strides = [1, 1]} : vector<8x384xf32> to vector<8x32xf32>
    %229 = tpu.transpose %227, [1, 0] : vector<8x32xf32> -> vector<32x8xf32>
    %cst_99 = arith.constant dense<0.000000e+00> : vector<8x8xf32>
    %230 = tpu.matmul %226, %229, %cst_99 {dimension_numbers = #tpu.dot_dimension_numbers<[1], [0], [0], [1], [0, 0, 1, 1], [], []>} : vector<8x32xf32>, vector<32x8xf32>, vector<8x8xf32> -> vector<8x8xf32>
    %cst_100 = arith.constant 0.176776692 : f32
    %231 = vector.broadcast %cst_100 : f32 to vector<8x8xf32>
    %232 = arith.mulf %230, %231 : vector<8x8xf32>
    %233 = arith.addf %232, %10 : vector<8x8xf32>
    %cst_101 = arith.constant dense<0xFF800000> : vector<8xf32>
    %234 = vector.multi_reduction <maximumf>, %233, %cst_101 [1] : vector<8x8xf32> to vector<8xf32>
    %235 = vector.shape_cast %234 : vector<8xf32> to vector<8x1xf32>
    %236 = vector.broadcast %235 : vector<8x1xf32> to vector<8x8xf32>
    %237 = arith.subf %233, %236 : vector<8x8xf32>
    %238 = math.exp %237 : vector<8x8xf32>
    %cst_102 = arith.constant dense<0.000000e+00> : vector<8xf32>
    %239 = vector.multi_reduction <add>, %238, %cst_102 [1] : vector<8x8xf32> to vector<8xf32>
    %240 = vector.shape_cast %239 : vector<8xf32> to vector<8x1xf32>
    %241 = tpu.reciprocal %240 {approx = true} : vector<8x1xf32> -> vector<8x1xf32>
    %242 = vector.broadcast %241 : vector<8x1xf32> to vector<8x8xf32>
    %243 = arith.mulf %238, %242 : vector<8x8xf32>
    %cst_103 = arith.constant dense<0.000000e+00> : vector<8x32xf32>
    %244 = tpu.matmul %243, %228, %cst_103 {dimension_numbers = #tpu.dot_dimension_numbers<[1], [0], [0], [1], [0, 0, 1, 1], [], []>} : vector<8x8xf32>, vector<8x32xf32>, vector<8x32xf32> -> vector<8x32xf32>
    %c0_104 = arith.constant 0 : index
    %c64_105 = arith.constant 64 : index
    %245 = vector.load %arg23[%c0_104, %c64_105] : memref<8x128xf32, #tpu.memory_space<vmem>>, vector<8x32xf32>
    tpu.vector_store %arg23[%c0_104, %c64_105], %244 {strides = array<i32>} : memref<8x128xf32, #tpu.memory_space<vmem>>, vector<8x32xf32>,
    %246 = vector.extract_strided_slice %185 {offsets = [0, 96], sizes = [8, 32], strides = [1, 1]} : vector<8x384xf32> to vector<8x32xf32>
    %247 = vector.extract_strided_slice %185 {offsets = [0, 224], sizes = [8, 32], strides = [1, 1]} : vector<8x384xf32> to vector<8x32xf32>
    %248 = vector.extract_strided_slice %185 {offsets = [0, 352], sizes = [8, 32], strides = [1, 1]} : vector<8x384xf32> to vector<8x32xf32>
    %249 = tpu.transpose %247, [1, 0] : vector<8x32xf32> -> vector<32x8xf32>
    %cst_106 = arith.constant dense<0.000000e+00> : vector<8x8xf32>
    %250 = tpu.matmul %246, %249, %cst_106 {dimension_numbers = #tpu.dot_dimension_numbers<[1], [0], [0], [1], [0, 0, 1, 1], [], []>} : vector<8x32xf32>, vector<32x8xf32>, vector<8x8xf32> -> vector<8x8xf32>
    %cst_107 = arith.constant 0.176776692 : f32
    %251 = vector.broadcast %cst_107 : f32 to vector<8x8xf32>
    %252 = arith.mulf %250, %251 : vector<8x8xf32>
    %253 = arith.addf %252, %10 : vector<8x8xf32>
    %cst_108 = arith.constant dense<0xFF800000> : vector<8xf32>
    %254 = vector.multi_reduction <maximumf>, %253, %cst_108 [1] : vector<8x8xf32> to vector<8xf32>
    %255 = vector.shape_cast %254 : vector<8xf32> to vector<8x1xf32>
    %256 = vector.broadcast %255 : vector<8x1xf32> to vector<8x8xf32>
    %257 = arith.subf %253, %256 : vector<8x8xf32>
    %258 = math.exp %257 : vector<8x8xf32>
    %cst_109 = arith.constant dense<0.000000e+00> : vector<8xf32>
    %259 = vector.multi_reduction <add>, %258, %cst_109 [1] : vector<8x8xf32> to vector<8xf32>
    %260 = vector.shape_cast %259 : vector<8xf32> to vector<8x1xf32>
    %261 = tpu.reciprocal %260 {approx = true} : vector<8x1xf32> -> vector<8x1xf32>
    %262 = vector.broadcast %261 : vector<8x1xf32> to vector<8x8xf32>
    %263 = arith.mulf %258, %262 : vector<8x8xf32>
    %cst_110 = arith.constant dense<0.000000e+00> : vector<8x32xf32>
    %264 = tpu.matmul %263, %248, %cst_110 {dimension_numbers = #tpu.dot_dimension_numbers<[1], [0], [0], [1], [0, 0, 1, 1], [], []>} : vector<8x8xf32>, vector<8x32xf32>, vector<8x32xf32> -> vector<8x32xf32>
    %c0_111 = arith.constant 0 : index
    %c96_112 = arith.constant 96 : index
    %265 = vector.load %arg23[%c0_111, %c96_112] : memref<8x128xf32, #tpu.memory_space<vmem>>, vector<8x32xf32>
    tpu.vector_store %arg23[%c0_111, %c96_112], %264 {strides = array<i32>} : memref<8x128xf32, #tpu.memory_space<vmem>>, vector<8x32xf32>,
    %c0_113 = arith.constant 0 : index
    %c0_114 = arith.constant 0 : index
    %266 = vector.load %arg23[%c0_113, %c0_114] : memref<8x128xf32, #tpu.memory_space<vmem>>, vector<8x128xf32>
    %c1_115 = arith.constant 1 : index
    %c0_116 = arith.constant 0 : index
    %c0_117 = arith.constant 0 : index
    %267 = vector.load %arg8[%c1_115, %c0_116, %c0_117] : memref<2x128x128xbf16, #tpu.memory_space<vmem>>, vector<1x128x128xbf16>
    %268 = vector.shape_cast %267 : vector<1x128x128xbf16> to vector<128x128xbf16>
    %c1_118 = arith.constant 1 : index
    %c0_119 = arith.constant 0 : index
    %c0_120 = arith.constant 0 : index
    %269 = vector.load %arg9[%c1_118, %c0_119, %c0_120] : memref<2x1x128xf32, #tpu.memory_space<vmem>>, vector<1x1x128xf32>
    %270 = vector.shape_cast %269 : vector<1x1x128xf32> to vector<1x128xf32>
    %271 = arith.truncf %266 : vector<8x128xf32> to vector<8x128xbf16>
    %cst_121 = arith.constant dense<0.000000e+00> : vector<8x128xf32>
    %272 = tpu.matmul %271, %268, %cst_121 {dimension_numbers = #tpu.dot_dimension_numbers<[1], [0], [0], [1], [0, 0, 1, 1], [], []>} : vector<8x128xbf16>, vector<128x128xbf16>, vector<8x128xf32> -> vector<8x128xf32>
    %273 = vector.broadcast %270 : vector<1x128xf32> to vector<8x128xf32>
    %274 = arith.addf %272, %273 : vector<8x128xf32>
    %c1_122 = arith.constant 1 : index
    %c0_123 = arith.constant 0 : index
    %c0_124 = arith.constant 0 : index
    %275 = vector.load %arg10[%c1_122, %c0_123, %c0_124] : memref<2x4x128xf32, #tpu.memory_space<vmem>>, vector<1x4x128xf32>
    %276 = vector.shape_cast %275 : vector<1x4x128xf32> to vector<4x128xf32>
    %277 = arith.addf %177, %274 : vector<8x128xf32>
    %278 = vector.extract_strided_slice %276 {offsets = [0, 0], sizes = [1, 128], strides = [1, 1]} : vector<4x128xf32> to vector<1x128xf32>
    %279 = vector.extract_strided_slice %276 {offsets = [1, 0], sizes = [1, 128], strides = [1, 1]} : vector<4x128xf32> to vector<1x128xf32>
    %cst_125 = arith.constant dense<0.000000e+00> : vector<8xf32>
    %280 = vector.multi_reduction <add>, %277, %cst_125 [1] : vector<8x128xf32> to vector<8xf32>
    %281 = vector.shape_cast %280 : vector<8xf32> to vector<8x1xf32>
    %cst_126 = arith.constant 1.280000e+02 : f32
    %282 = vector.broadcast %cst_126 : f32 to vector<8x1xf32>
    %283 = arith.divf %281, %282 : vector<8x1xf32>
    %284 = vector.broadcast %283 : vector<8x1xf32> to vector<8x128xf32>
    %285 = arith.subf %277, %284 : vector<8x128xf32>
    %286 = arith.mulf %285, %285 : vector<8x128xf32>
    %cst_127 = arith.constant dense<0.000000e+00> : vector<8xf32>
    %287 = vector.multi_reduction <add>, %286, %cst_127 [1] : vector<8x128xf32> to vector<8xf32>
    %288 = vector.shape_cast %287 : vector<8xf32> to vector<8x1xf32>
    %cst_128 = arith.constant 1.280000e+02 : f32
    %289 = vector.broadcast %cst_128 : f32 to vector<8x1xf32>
    %290 = arith.divf %288, %289 : vector<8x1xf32>
    %291 = vector.broadcast %283 : vector<8x1xf32> to vector<8x128xf32>
    %292 = arith.subf %277, %291 : vector<8x128xf32>
    %cst_129 = arith.constant 9.99999974E-6 : f32
    %293 = vector.broadcast %cst_129 : f32 to vector<8x1xf32>
    %294 = arith.addf %290, %293 : vector<8x1xf32>
    %295 = math.rsqrt %294 : vector<8x1xf32>
    %296 = vector.broadcast %295 : vector<8x1xf32> to vector<8x128xf32>
    %297 = arith.mulf %292, %296 : vector<8x128xf32>
    %298 = vector.broadcast %278 : vector<1x128xf32> to vector<8x128xf32>
    %299 = arith.mulf %297, %298 : vector<8x128xf32>
    %300 = vector.broadcast %279 : vector<1x128xf32> to vector<8x128xf32>
    %301 = arith.addf %299, %300 : vector<8x128xf32>
    %c1_130 = arith.constant 1 : index
    %c0_131 = arith.constant 0 : index
    %c0_132 = arith.constant 0 : index
    %302 = vector.load %arg11[%c1_130, %c0_131, %c0_132] : memref<2x128x256xbf16, #tpu.memory_space<vmem>>, vector<1x128x256xbf16>
    %303 = vector.shape_cast %302 : vector<1x128x256xbf16> to vector<128x256xbf16>
    %c1_133 = arith.constant 1 : index
    %c0_134 = arith.constant 0 : index
    %c0_135 = arith.constant 0 : index
    %304 = vector.load %arg12[%c1_133, %c0_134, %c0_135] : memref<2x1x256xf32, #tpu.memory_space<vmem>>, vector<1x1x256xf32>
    %305 = vector.shape_cast %304 : vector<1x1x256xf32> to vector<1x256xf32>
    %306 = arith.truncf %301 : vector<8x128xf32> to vector<8x128xbf16>
    %cst_136 = arith.constant dense<0.000000e+00> : vector<8x256xf32>
    %307 = tpu.matmul %306, %303, %cst_136 {dimension_numbers = #tpu.dot_dimension_numbers<[1], [0], [0], [1], [0, 0, 1, 1], [], []>} : vector<8x128xbf16>, vector<128x256xbf16>, vector<8x256xf32> -> vector<8x256xf32>
    %308 = vector.broadcast %305 : vector<1x256xf32> to vector<8x256xf32>
    %309 = arith.addf %307, %308 : vector<8x256xf32>
    %cst_137 = arith.constant 0.000000e+00 : f32
    %310 = vector.broadcast %cst_137 : f32 to vector<8x256xf32>
    %311 = arith.maximumf %309, %310 : vector<8x256xf32>
    %c1_138 = arith.constant 1 : index
    %c0_139 = arith.constant 0 : index
    %c0_140 = arith.constant 0 : index
    %312 = vector.load %arg13[%c1_138, %c0_139, %c0_140] : memref<2x256x128xbf16, #tpu.memory_space<vmem>>, vector<1x256x128xbf16>
    %313 = vector.shape_cast %312 : vector<1x256x128xbf16> to vector<256x128xbf16>
    %c1_141 = arith.constant 1 : index
    %c0_142 = arith.constant 0 : index
    %c0_143 = arith.constant 0 : index
    %314 = vector.load %arg14[%c1_141, %c0_142, %c0_143] : memref<2x1x128xf32, #tpu.memory_space<vmem>>, vector<1x1x128xf32>
    %315 = vector.shape_cast %314 : vector<1x1x128xf32> to vector<1x128xf32>
    %316 = arith.truncf %311 : vector<8x256xf32> to vector<8x256xbf16>
    %cst_144 = arith.constant dense<0.000000e+00> : vector<8x128xf32>
    %317 = tpu.matmul %316, %313, %cst_144 {dimension_numbers = #tpu.dot_dimension_numbers<[1], [0], [0], [1], [0, 0, 1, 1], [], []>} : vector<8x256xbf16>, vector<256x128xbf16>, vector<8x128xf32> -> vector<8x128xf32>
    %318 = vector.broadcast %315 : vector<1x128xf32> to vector<8x128xf32>
    %319 = arith.addf %317, %318 : vector<8x128xf32>
    %320 = arith.addf %301, %319 : vector<8x128xf32>
    %321 = vector.extract_strided_slice %276 {offsets = [2, 0], sizes = [1, 128], strides = [1, 1]} : vector<4x128xf32> to vector<1x128xf32>
    %322 = vector.extract_strided_slice %276 {offsets = [3, 0], sizes = [1, 128], strides = [1, 1]} : vector<4x128xf32> to vector<1x128xf32>
    %cst_145 = arith.constant dense<0.000000e+00> : vector<8xf32>
    %323 = vector.multi_reduction <add>, %320, %cst_145 [1] : vector<8x128xf32> to vector<8xf32>
    %324 = vector.shape_cast %323 : vector<8xf32> to vector<8x1xf32>
    %cst_146 = arith.constant 1.280000e+02 : f32
    %325 = vector.broadcast %cst_146 : f32 to vector<8x1xf32>
    %326 = arith.divf %324, %325 : vector<8x1xf32>
    %327 = vector.broadcast %326 : vector<8x1xf32> to vector<8x128xf32>
    %328 = arith.subf %320, %327 : vector<8x128xf32>
    %329 = arith.mulf %328, %328 : vector<8x128xf32>
    %cst_147 = arith.constant dense<0.000000e+00> : vector<8xf32>
    %330 = vector.multi_reduction <add>, %329, %cst_147 [1] : vector<8x128xf32> to vector<8xf32>
    %331 = vector.shape_cast %330 : vector<8xf32> to vector<8x1xf32>
    %cst_148 = arith.constant 1.280000e+02 : f32
    %332 = vector.broadcast %cst_148 : f32 to vector<8x1xf32>
    %333 = arith.divf %331, %332 : vector<8x1xf32>
    %334 = vector.broadcast %326 : vector<8x1xf32> to vector<8x128xf32>
    %335 = arith.subf %320, %334 : vector<8x128xf32>
    %cst_149 = arith.constant 9.99999974E-6 : f32
    %336 = vector.broadcast %cst_149 : f32 to vector<8x1xf32>
    %337 = arith.addf %333, %336 : vector<8x1xf32>
    %338 = math.rsqrt %337 : vector<8x1xf32>
    %339 = vector.broadcast %338 : vector<8x1xf32> to vector<8x128xf32>
    %340 = arith.mulf %335, %339 : vector<8x128xf32>
    %341 = vector.broadcast %321 : vector<1x128xf32> to vector<8x128xf32>
    %342 = arith.mulf %340, %341 : vector<8x128xf32>
    %343 = vector.broadcast %322 : vector<1x128xf32> to vector<8x128xf32>
    %344 = arith.addf %342, %343 : vector<8x128xf32>
    %345 = vector.shape_cast %344 : vector<8x128xf32> to vector<1x8x128xf32>
    %346 = vector.extract_strided_slice %345 {offsets = [0, 7, 0], sizes = [1, 1, 128], strides = [1, 1, 1]} : vector<1x8x128xf32> to vector<1x1x128xf32>
    %347 = vector.shape_cast %346 : vector<1x1x128xf32> to vector<1x128xf32>
    %c0_150 = arith.constant 0 : index
    %c0_151 = arith.constant 0 : index
    %348 = vector.load %arg15[%c0_150, %c0_151] : memref<2x128xf32, #tpu.memory_space<vmem>>, vector<2x128xf32>
    %349 = vector.extract_strided_slice %348 {offsets = [0, 0], sizes = [1, 128], strides = [1, 1]} : vector<2x128xf32> to vector<1x128xf32>
    %350 = vector.extract_strided_slice %348 {offsets = [1, 0], sizes = [1, 128], strides = [1, 1]} : vector<2x128xf32> to vector<1x128xf32>
    %cst_152 = arith.constant dense<0.000000e+00> : vector<1xf32>
    %351 = vector.multi_reduction <add>, %347, %cst_152 [1] : vector<1x128xf32> to vector<1xf32>
    %352 = vector.shape_cast %351 : vector<1xf32> to vector<1x1xf32>
    %cst_153 = arith.constant 1.280000e+02 : f32
    %353 = vector.broadcast %cst_153 : f32 to vector<1x1xf32>
    %354 = arith.divf %352, %353 : vector<1x1xf32>
    %355 = vector.broadcast %354 : vector<1x1xf32> to vector<1x128xf32>
    %356 = arith.subf %347, %355 : vector<1x128xf32>
    %357 = arith.mulf %356, %356 : vector<1x128xf32>
    %cst_154 = arith.constant dense<0.000000e+00> : vector<1xf32>
    %358 = vector.multi_reduction <add>, %357, %cst_154 [1] : vector<1x128xf32> to vector<1xf32>
    %359 = vector.shape_cast %358 : vector<1xf32> to vector<1x1xf32>
    %cst_155 = arith.constant 1.280000e+02 : f32
    %360 = vector.broadcast %cst_155 : f32 to vector<1x1xf32>
    %361 = arith.divf %359, %360 : vector<1x1xf32>
    %362 = vector.broadcast %354 : vector<1x1xf32> to vector<1x128xf32>
    %363 = arith.subf %347, %362 : vector<1x128xf32>
    %cst_156 = arith.constant 9.99999974E-6 : f32
    %364 = vector.broadcast %cst_156 : f32 to vector<1x1xf32>
    %365 = arith.addf %361, %364 : vector<1x1xf32>
    %366 = math.rsqrt %365 : vector<1x1xf32>
    %367 = vector.broadcast %366 : vector<1x1xf32> to vector<1x128xf32>
    %368 = arith.mulf %363, %367 : vector<1x128xf32>
    %369 = arith.mulf %368, %349 : vector<1x128xf32>
    %370 = arith.addf %369, %350 : vector<1x128xf32>
    %c0_157 = arith.constant 0 : index
    %c0_158 = arith.constant 0 : index
    %371 = vector.load %arg16[%c0_157, %c0_158] : memref<128x128xbf16, #tpu.memory_space<vmem>>, vector<128x128xbf16>
    %c0_159 = arith.constant 0 : index
    %c0_160 = arith.constant 0 : index
    %372 = vector.load %arg17[%c0_159, %c0_160] : memref<1x128xf32, #tpu.memory_space<vmem>>, vector<1x128xf32>
    %373 = arith.truncf %370 : vector<1x128xf32> to vector<1x128xbf16>
    %cst_161 = arith.constant dense<0.000000e+00> : vector<1x128xf32>
    %374 = tpu.matmul %373, %371, %cst_161 {dimension_numbers = #tpu.dot_dimension_numbers<[1], [0], [0], [1], [0, 0, 1, 1], [], []>} : vector<1x128xbf16>, vector<128x128xbf16>, vector<1x128xf32> -> vector<1x128xf32>
    %375 = arith.addf %374, %372 : vector<1x128xf32>
    %cst_162 = arith.constant 0.000000e+00 : f32
    %376 = vector.broadcast %cst_162 : f32 to vector<1x128xf32>
    %377 = arith.cmpf ogt, %375, %376 : vector<1x128xf32>
    %cst_163 = arith.constant 1.000000e-01 : f32
    %378 = vector.broadcast %cst_163 : f32 to vector<1x128xf32>
    %379 = arith.mulf %378, %375 : vector<1x128xf32>
    %380 = arith.select %377, %375, %379 : vector<1x128xi1>, vector<1x128xf32>
    %c0_164 = arith.constant 0 : index
    %c0_165 = arith.constant 0 : index
    %381 = vector.load %arg18[%c0_164, %c0_165] : memref<128x384xbf16, #tpu.memory_space<vmem>>, vector<128x384xbf16>
    %c0_166 = arith.constant 0 : index
    %c0_167 = arith.constant 0 : index
    %382 = vector.load %arg19[%c0_166, %c0_167] : memref<1x384xf32, #tpu.memory_space<vmem>>, vector<1x384xf32>
    %383 = arith.truncf %380 : vector<1x128xf32> to vector<1x128xbf16>
    %cst_168 = arith.constant dense<0.000000e+00> : vector<1x384xf32>
    %384 = tpu.matmul %383, %381, %cst_168 {dimension_numbers = #tpu.dot_dimension_numbers<[1], [0], [0], [1], [0, 0, 1, 1], [], []>} : vector<1x128xbf16>, vector<128x384xbf16>, vector<1x384xf32> -> vector<1x384xf32>
    %385 = arith.addf %384, %382 : vector<1x384xf32>
    %cst_169 = arith.constant 0.000000e+00 : f32
    %386 = vector.broadcast %cst_169 : f32 to vector<1x384xf32>
    %387 = arith.cmpf ogt, %385, %386 : vector<1x384xf32>
    %cst_170 = arith.constant 1.000000e-01 : f32
    %388 = vector.broadcast %cst_170 : f32 to vector<1x384xf32>
    %389 = arith.mulf %388, %385 : vector<1x384xf32>
    %390 = arith.select %387, %385, %389 : vector<1x384xi1>, vector<1x384xf32>
    %c0_171 = arith.constant 0 : index
    %c0_172 = arith.constant 0 : index
    %391 = vector.load %arg20[%c0_171, %c0_172] : memref<384x128xbf16, #tpu.memory_space<vmem>>, vector<384x128xbf16>
    %c0_173 = arith.constant 0 : index
    %c0_174 = arith.constant 0 : index
    %392 = vector.load %arg21[%c0_173, %c0_174] : memref<1x128xf32, #tpu.memory_space<vmem>>, vector<1x128xf32>
    %393 = arith.truncf %390 : vector<1x384xf32> to vector<1x384xbf16>
    %cst_175 = arith.constant dense<0.000000e+00> : vector<1x128xf32>
    %394 = tpu.matmul %393, %391, %cst_175 {dimension_numbers = #tpu.dot_dimension_numbers<[1], [0], [0], [1], [0, 0, 1, 1], [], []>} : vector<1x384xbf16>, vector<384x128xbf16>, vector<1x128xf32> -> vector<1x128xf32>
    %395 = arith.addf %394, %392 : vector<1x128xf32>
    %cst_176 = arith.constant 0.000000e+00 : f32
    %396 = vector.broadcast %cst_176 : f32 to vector<1x128xf32>
    %397 = arith.maximumf %395, %396 : vector<1x128xf32>
    %398 = math.absf %395 : vector<1x128xf32>
    %cst_177 = arith.constant 0.000000e+00 : f32
    %399 = vector.broadcast %cst_177 : f32 to vector<1x128xf32>
    %400 = arith.subf %399, %398 : vector<1x128xf32>
    %401 = math.exp %400 : vector<1x128xf32>
    %402 = math.log1p %401 : vector<1x128xf32>
    %403 = arith.addf %397, %402 : vector<1x128xf32>
    %404 = tpu.iota {dimensions = array<i32: 1>} : vector<1x128xi32>
    %c0_i32 = arith.constant 0 : i32
    %405 = vector.broadcast %c0_i32 : i32 to vector<1x128xi32>
    %406 = arith.cmpi eq, %404, %405 : vector<1x128xi32>
    %c1_i32 = arith.constant 1 : i32
    %407 = vector.broadcast %c1_i32 : i32 to vector<1x128xi32>
    %408 = arith.cmpi eq, %404, %407 : vector<1x128xi32>
    %cst_178 = arith.constant 1.000000e-03 : f32
    %409 = vector.broadcast %cst_178 : f32 to vector<1x128xf32>
    %410 = arith.addf %403, %409 : vector<1x128xf32>
    %c2_i32 = arith.constant 2 : i32
    %411 = vector.broadcast %c2_i32 : i32 to vector<1x128xi32>
    %412 = arith.cmpi eq, %404, %411 : vector<1x128xi32>
    %cst_179 = arith.constant 2.000000e+00 : f32
    %413 = vector.broadcast %cst_179 : f32 to vector<1x128xf32>
    %414 = arith.addf %403, %413 : vector<1x128xf32>
    %cst_180 = arith.constant 0.000000e+00 : f32
    %415 = vector.broadcast %cst_180 : f32 to vector<1x128xf32>
    %416 = arith.select %412, %414, %415 : vector<1x128xi1>, vector<1x128xf32>
    %417 = arith.select %408, %410, %416 : vector<1x128xi1>, vector<1x128xf32>
    %418 = arith.select %406, %395, %417 : vector<1x128xi1>, vector<1x128xf32>
    %c0_181 = arith.constant 0 : index
    %c0_182 = arith.constant 0 : index
    %c0_183 = arith.constant 0 : index
    %419 = vector.load %arg22[%c0_181, %c0_182, %c0_183] : memref<1x1x128xf32, #tpu.memory_space<vmem>>, vector<1x1x128xf32>
    %420 = vector.shape_cast %419 : vector<1x1x128xf32> to vector<1x128xf32>
    %421 = vector.shape_cast %418 : vector<1x128xf32> to vector<1x1x128xf32>
    tpu.vector_store %arg22[%c0_181, %c0_182, %c0_183], %421 {strides = array<i32>} : memref<1x1x128xf32, #tpu.memory_space<vmem>>, vector<1x1x128xf32>,
    return
  }
  func.func @transform_0(%arg0: i32) -> (i32, i32, i32) {
    %c0_i32 = arith.constant 0 : i32
    %c0_i32_0 = arith.constant 0 : i32
    %c0_i32_1 = arith.constant 0 : i32
    return %arg0, %c0_i32, %c0_i32_0 : i32, i32, i32
  }
  func.func @transform_1(%arg0: i32) -> (i32, i32) {
    %c0_i32 = arith.constant 0 : i32
    %c0_i32_0 = arith.constant 0 : i32
    %c0_i32_1 = arith.constant 0 : i32
    return %c0_i32, %c0_i32_0 : i32, i32
  }
  func.func @transform_2(%arg0: i32) -> (i32, i32) {
    %c0_i32 = arith.constant 0 : i32
    %c0_i32_0 = arith.constant 0 : i32
    %c0_i32_1 = arith.constant 0 : i32
    return %c0_i32, %c0_i32_0 : i32, i32
  }
  func.func @transform_3(%arg0: i32) -> (i32, i32) {
    %c0_i32 = arith.constant 0 : i32
    %c0_i32_0 = arith.constant 0 : i32
    %c0_i32_1 = arith.constant 0 : i32
    return %c0_i32, %c0_i32_0 : i32, i32
  }
  func.func @transform_4(%arg0: i32) -> (i32, i32) {
    %c0_i32 = arith.constant 0 : i32
    %c0_i32_0 = arith.constant 0 : i32
    %c0_i32_1 = arith.constant 0 : i32
    return %c0_i32, %c0_i32_0 : i32, i32
  }
  func.func @transform_5(%arg0: i32) -> (i32, i32, i32) {
    %c0_i32 = arith.constant 0 : i32
    %c0_i32_0 = arith.constant 0 : i32
    %c0_i32_1 = arith.constant 0 : i32
    %c0_i32_2 = arith.constant 0 : i32
    return %c0_i32, %c0_i32_0, %c0_i32_1 : i32, i32, i32
  }
  func.func @transform_6(%arg0: i32) -> (i32, i32, i32) {
    %c0_i32 = arith.constant 0 : i32
    %c0_i32_0 = arith.constant 0 : i32
    %c0_i32_1 = arith.constant 0 : i32
    %c0_i32_2 = arith.constant 0 : i32
    return %c0_i32, %c0_i32_0, %c0_i32_1 : i32, i32, i32
  }
  func.func @transform_7(%arg0: i32) -> (i32, i32, i32) {
    %c0_i32 = arith.constant 0 : i32
    %c0_i32_0 = arith.constant 0 : i32
    %c0_i32_1 = arith.constant 0 : i32
    %c0_i32_2 = arith.constant 0 : i32
    return %c0_i32, %c0_i32_0, %c0_i32_1 : i32, i32, i32
  }
  func.func @transform_8(%arg0: i32) -> (i32, i32, i32) {
    %c0_i32 = arith.constant 0 : i32
    %c0_i32_0 = arith.constant 0 : i32
    %c0_i32_1 = arith.constant 0 : i32
    %c0_i32_2 = arith.constant 0 : i32
    return %c0_i32, %c0_i32_0, %c0_i32_1 : i32, i32, i32
  }
  func.func @transform_9(%arg0: i32) -> (i32, i32, i32) {
    %c0_i32 = arith.constant 0 : i32
    %c0_i32_0 = arith.constant 0 : i32
    %c0_i32_1 = arith.constant 0 : i32
    %c0_i32_2 = arith.constant 0 : i32
    return %c0_i32, %c0_i32_0, %c0_i32_1 : i32, i32, i32
  }
  func.func @transform_10(%arg0: i32) -> (i32, i32, i32) {
    %c0_i32 = arith.constant 0 : i32
    %c0_i32_0 = arith.constant 0 : i32
    %c0_i32_1 = arith.constant 0 : i32
    %c0_i32_2 = arith.constant 0 : i32
    return %c0_i32, %c0_i32_0, %c0_i32_1 : i32, i32, i32
  }
  func.func @transform_11(%arg0: i32) -> (i32, i32, i32) {
    %c0_i32 = arith.constant 0 : i32
    %c0_i32_0 = arith.constant 0 : i32
    %c0_i32_1 = arith.constant 0 : i32
    %c0_i32_2 = arith.constant 0 : i32
    return %c0_i32, %c0_i32_0, %c0_i32_1 : i32, i32, i32
  }
  func.func @transform_12(%arg0: i32) -> (i32, i32, i32) {
    %c0_i32 = arith.constant 0 : i32
    %c0_i32_0 = arith.constant 0 : i32
    %c0_i32_1 = arith.constant 0 : i32
    %c0_i32_2 = arith.constant 0 : i32
    return %c0_i32, %c0_i32_0, %c0_i32_1 : i32, i32, i32
  }
  func.func @transform_13(%arg0: i32) -> (i32, i32, i32) {
    %c0_i32 = arith.constant 0 : i32
    %c0_i32_0 = arith.constant 0 : i32
    %c0_i32_1 = arith.constant 0 : i32
    %c0_i32_2 = arith.constant 0 : i32
    return %c0_i32, %c0_i32_0, %c0_i32_1 : i32, i32, i32
  }
  func.func @transform_14(%arg0: i32) -> (i32, i32) {
    %c0_i32 = arith.constant 0 : i32
    %c0_i32_0 = arith.constant 0 : i32
    %c0_i32_1 = arith.constant 0 : i32
    return %c0_i32, %c0_i32_0 : i32, i32
  }
  func.func @transform_15(%arg0: i32) -> (i32, i32) {
    %c0_i32 = arith.constant 0 : i32
    %c0_i32_0 = arith.constant 0 : i32
    %c0_i32_1 = arith.constant 0 : i32
    return %c0_i32, %c0_i32_0 : i32, i32
  }
  func.func @transform_16(%arg0: i32) -> (i32, i32) {
    %c0_i32 = arith.constant 0 : i32
    %c0_i32_0 = arith.constant 0 : i32
    %c0_i32_1 = arith.constant 0 : i32
    return %c0_i32, %c0_i32_0 : i32, i32
  }
  func.func @transform_17(%arg0: i32) -> (i32, i32) {
    %c0_i32 = arith.constant 0 : i32
    %c0_i32_0 = arith.constant 0 : i32
    %c0_i32_1 = arith.constant 0 : i32
    return %c0_i32, %c0_i32_0 : i32, i32
  }
  func.func @transform_18(%arg0: i32) -> (i32, i32) {
    %c0_i32 = arith.constant 0 : i32
    %c0_i32_0 = arith.constant 0 : i32
    %c0_i32_1 = arith.constant 0 : i32
    return %c0_i32, %c0_i32_0 : i32, i32
  }
  func.func @transform_19(%arg0: i32) -> (i32, i32) {
    %c0_i32 = arith.constant 0 : i32
    %c0_i32_0 = arith.constant 0 : i32
    %c0_i32_1 = arith.constant 0 : i32
    return %c0_i32, %c0_i32_0 : i32, i32
  }
  func.func @transform_20(%arg0: i32) -> (i32, i32) {
    %c0_i32 = arith.constant 0 : i32
    %c0_i32_0 = arith.constant 0 : i32
    %c0_i32_1 = arith.constant 0 : i32
    return %c0_i32, %c0_i32_0 : i32, i32
  }
  func.func @transform_21(%arg0: i32) -> (i32, i32, i32) {
    %c0_i32 = arith.constant 0 : i32
    %c0_i32_0 = arith.constant 0 : i32
    %c0_i32_1 = arith.constant 0 : i32
    return %arg0, %c0_i32, %c0_i32_0 : i32, i32, i32
  }
}

</mosaic_0001>

<bundles_post_ra>
// kernel: commodity_transformer_forward.1
= control target key start
LH: loop header
LB: loop body
LE: loop exit
PB: predicated region body
PF: predicated region fallthrough
CT: control target
= control target key end

     0   :  { %s5921_s0 = inlined_call_operand.hbm [shape: f32[2,8,8], index: 0, kind: input, shape index: {}]   ;;  %s5922_s1 = inlined_call_operand.hbm [shape: f32[8,128], index: 1, kind: input, shape index: {}]   ;;  %s5923_s2 = inlined_call_operand.hbm [shape: f32[8,8], index: 2, kind: input, shape index: {}]   ;;  %s5924_s3 = inlined_call_operand.hbm [shape: bf16[8,128], index: 3, kind: input, shape index: {}]   ;;  %s5925_s4 = inlined_call_operand.hbm [shape: f32[1,128], index: 4, kind: input, shape index: {}]   ;;  %s5926_s5 = inlined_call_operand.hbm [shape: bf16[2,128,384], index: 5, kind: input, shape index: {}]   ;;  %s5927_s6 = inlined_call_operand.hbm [shape: f32[2,1,384], index: 6, kind: input, shape index: {}]   ;;  %s5928_s7 = inlined_call_operand.hbm [shape: bf16[2,128,128], index: 7, kind: input, shape index: {}]   ;;  %s5929_s8 = inlined_call_operand.hbm [shape: f32[2,1,128], index: 8, kind: input, shape index: {}]   ;;  %s5930_s9 = inlined_call_operand.vmem [shape: f32[2,4,128], index: 9, kind: input, shape index: {}]   ;;  %s5931_s10 = inlined_call_operand.hbm [shape: bf16[2,128,256], index: 10, kind: input, shape index: {}]   ;;  %s5932_s11 = inlined_call_operand.hbm [shape: f32[2,1,256], index: 11, kind: input, shape index: {}]   ;;  %s5933_s12 = inlined_call_operand.hbm [shape: bf16[2,256,128], index: 12, kind: input, shape index: {}]   ;;  %s5934_s13 = inlined_call_operand.hbm [shape: f32[2,1,128], index: 13, kind: input, shape index: {}]   ;;  %s5935_s14 = inlined_call_operand.vmem [shape: f32[2,128], index: 14, kind: input, shape index: {}]   ;;  %s5936_s15 = inlined_call_operand.hbm [shape: bf16[128,128], index: 15, kind: input, shape index: {}]   ;;  %s5937_s16 = inlined_call_operand.vmem [shape: f32[1,128], index: 16, kind: input, shape index: {}]   ;;  %s5938_s17 = inlined_call_operand.hbm [shape: bf16[128,384], index: 17, kind: input, shape index: {}]   ;;  %s5939_s18 = inlined_call_operand.vmem [shape: f32[1,384], index: 18, kind: input, shape index: {}]   ;;  %s5940_s19 = inlined_call_operand.hbm [shape: bf16[384,128], index: 19, kind: input, shape index: {}]   ;;  %s5941_s20 = inlined_call_operand.vmem [shape: f32[1,128], index: 20, kind: input, shape index: {}]   ;;  %s5942_s21 = inlined_call_operand.vmem [shape: f32[2,1,128], index: 21, kind: output, shape index: {}]  }
   0x1   :  { %5948 = sst [smem:[#allocation38_spill]] %s5921_s0 }
   0x2   :  { %5949 = sst [smem:[#allocation39_spill]] %s5922_s1 }
   0x3   :  { %5950 = sst [smem:[#allocation40_spill]] %s5923_s2 }
   0x4   :  { %5951 = sst [smem:[#allocation41_spill]] %s5924_s3 }
   0x5   :  { %5952 = sst [smem:[#allocation42_spill]] %s5925_s4 }
   0x6   :  { %5953 = sst [smem:[#allocation43_spill]] %s5926_s5 }
   0x7   :  { %5954 = sst [smem:[#allocation44_spill]] %s5928_s7 }
   0x8   :  { %5955 = sst [smem:[#allocation45_spill]] %s5930_s9 }
   0x9   :  { %5956 = sst [smem:[#allocation46_spill]] %s5935_s14 }
   0xa   :  { %5957 = sst [smem:[#allocation47_spill]] %s5937_s16 }
   0xb   :  { %5958 = sst [smem:[#allocation48_spill]] %s5939_s18 }
   0xc   :  { %5959 = sst [smem:[#allocation49_spill]] %s5941_s20 }
   0xd   :  { %5960 = sst [smem:[#allocation50_spill]] %s5942_s21 }
   0xe   :  { %26 = vsyncpa [#allocation4], 0 }
   0xf   :  { %28 = vsyncpa [#allocation4 + $0x1], 0 }
  0x10   :  { %29 = vsyncpa [#allocation6], 0 }
  0x11   :  { %30 = vsyncpa [#allocation9], 0 }
  0x12   :  { %31 = vsyncpa [#allocation12], 0 }
  0x13   :  { %32 = vsyncpa [#allocation15], 0 }
  0x14   :  { %33 = vsyncpa [#allocation18], 0 }
  0x15   :  { %34 = vsyncpa [#allocation21], 0 }
  0x16   :  { %35 = vsyncpa [#allocation24], 0 }
  0x17   :  { %36 = vsyncpa [#allocation27], 0  ;;  %s5521_s2 = smov 0   ;;  %s5523_s25 = smov 0  }
  0x18   :  { %s5525_s26 = smov 0   ;;  %s5527_s27 = smov 0  }
  0x19 LB: > { %s5961_s29 = sld [smem:[#allocation39_spill]]  ;;  %s5545_s4 = sadd.s32 4294967295, %s5378_s27   ;;  %s5378_s27 = sphi %s5527_s27, %s5985_s27   ;;  %s5374_s26 = sphi %s5525_s26, %s5984_s26   ;;  %s5370_s25 = sphi %s5523_s25, %s5983_s25   ;;  %s5366_s2 = sphi %s5521_s2, %s5982_s2  }
  0x1a   : > { %p3589_p0 = scmp.ge.s32.totalorder %s5378_s27, 1  ;;  %p63_p1 = scmp.eq.s32.totalorder %s5545_s4, 0 }
  0x1b   : > { %p519_p2 = scmp.lt.s32.totalorder %s5378_s27, 3  ;;  %s5380_s5 = smov [#allocation5]  }
  0x1c   : > { %s533_s22 = sshll.u32 %s5380_s5, 4  ;;  %s5964_s24 = sld [smem:[#allocation41_spill]]  ;;  %s534_s22 = int_to_ptr.vmem [resolvable:$true] %s533_s22 }
  0x1d   : > { %p5550_p3 = pnand %p3589_p0, %p519_p2  ;;  %s5966_s18 = sld [smem:[#allocation43_spill]] }
  0x1e   : > { %s5382_s23 = smov [#allocation11]   ;;  %s5967_s7 = sld [smem:[#allocation44_spill]] }
  0x1f   : > { %s531_s0 = sshll.u32 %s5961_s29, 4  ;;  %p4635_p4 = pneg %p5550_p3  ;;  %s532_s0 = int_to_ptr.hbm [resolvable:$true] %s531_s0 }
  0x20   : > { %s5962_s30 = scalar_select %p5550_p3, 1, 0 }
  0x21   : > { %p5561_p5 = pnand %p4635_p4, %p63_p1  ;;  %s5381_s29 = smov [#allocation8]  }
  0x22   : > { %5963 = sst [smem:[#allocation37_spill]] %s5962_s30  ;;  %s555_s3 = sshll.u32 %s5964_s24, 4  ;;  %s556_s3 = int_to_ptr.hbm [resolvable:$true] %s555_s3 }
  0x23   : > { %s557_s21 = sshll.u32 %s5381_s29, 4  ;;  %s578_s16 = sshll.u32 %s5966_s18, 4  ;;  %s558_s21 = int_to_ptr.vmem [resolvable:$true] %s557_s21  ;;  %s579_s16 = int_to_ptr.hbm [resolvable:$true] %s578_s16 }
  0x24   : > { %4638 = dma.hbm_to_vmem [thread:$0]  (!%p5561_p5), %s532_s0, 128, %s534_s22, [#allocation6]  }
  0x25   : > { %4644 = dma.hbm_to_vmem [thread:$0]  (!%p5561_p5), %s556_s3, 64, %s558_s21, [#allocation9]  }
  0x26   : > { %s580_s1 = sshll.u32 %s5382_s23, 4  ;;  %s606_s9 = sshll.u32 %s5967_s7, 4  ;;  %s581_s1 = int_to_ptr.vmem [resolvable:$true] %s580_s1  ;;  %s607_s9 = int_to_ptr.hbm [resolvable:$true] %s606_s9 }
  0x27   : > { %s5946_s30 = smov 192   ;;  %s5947_s29 = smov 12  }
  0x28   : > { %4650 = dma.hbm_to_vmem [thread:$0]  (!%p5561_p5), %s579_s16, 6144, %s581_s1, [#allocation12], %s5946_s30, %s5946_s30, %s5947_s29  }
  0x29   : > { %s5385_s18 = smov [#allocation14]   ;;  %s5386_s21 = smov 64  }
  0x2a   : > { %s608_s20 = sshll.u32 %s5385_s18, 4  ;;  %s5387_s0 = smov 4   ;;  %s609_s20 = int_to_ptr.vmem [resolvable:$true] %s608_s20 }
  0x2b   : > { %4656 = dma.hbm_to_vmem [thread:$0]  (!%p5561_p5), %s607_s9, 2048, %s609_s20, [#allocation15], %s5386_s21, %s5386_s21, %s5387_s0  }
  0x2c   : > { %s637_s3 = sshll.u32 %s5931_s10, 4  ;;  %s5388_s5 = smov [#allocation17]   ;;  %s638_s3 = int_to_ptr.hbm [resolvable:$true] %s637_s3 }
  0x2d   : > { %s639_s16 = sshll.u32 %s5388_s5, 4  ;;  %s665_s24 = sshll.u32 %s5933_s12, 4  ;;  %s640_s16 = int_to_ptr.vmem [resolvable:$true] %s639_s16  ;;  %s666_s24 = int_to_ptr.hbm [resolvable:$true] %s665_s24 }
  0x2e   : > { %s5389_s18 = smov 128   ;;  %s5390_s30 = smov 8  }
  0x2f   : > { %4662 = dma.hbm_to_vmem [thread:$0]  (!%p5561_p5), %s638_s3, 4096, %s640_s16, [#allocation18], %s5389_s18, %s5389_s18, %s5390_s30  }
  0x30   : > { %s5391_s9 = smov [#allocation20]   ;;  %s696_s22 = sshll.u32 %s5936_s15, 4  ;;  %s697_s22 = int_to_ptr.hbm [resolvable:$true] %s696_s22 }
  0x31   : > { %s667_s20 = sshll.u32 %s5391_s9, 4  ;;  %s5968_s1 = sld [smem:[#allocation40_spill]]  ;;  %s668_s20 = int_to_ptr.vmem [resolvable:$true] %s667_s20 }
  0x32   : > { %4668 = dma.hbm_to_vmem [thread:$0]  (!%p5561_p5), %s666_s24, 4096, %s668_s20, [#allocation21], %s5386_s21, %s5386_s21, %s5387_s0  }
  0x33   : > { %s5392_s30 = smov [#allocation23]   ;;  %s5393_s29 = smov [#allocation7]  }
  0x34   : > { %s698_s3 = sshll.u32 %s5392_s30, 4  ;;  %s545_s16 = sshll.u32 %s5393_s29, 4  ;;  %s699_s3 = int_to_ptr.vmem [resolvable:$true] %s698_s3  ;;  %s546_s16 = int_to_ptr.vmem [resolvable:$true] %s545_s16 }
  0x35   : > { %4674 = dma.hbm_to_vmem [thread:$0]  (!%p5561_p5), %s697_s22, 1024, %s699_s3, [#allocation24], %s5386_s21, %s5386_s21, %s5387_s0  }
  0x36   : > { %s5969_s14 = sld [smem:[#allocation42_spill]]  ;;  %s592_s23 = sshll.u32 %s5927_s6, 4  ;;  %s593_s23 = int_to_ptr.hbm [resolvable:$true] %s592_s23 }
  0x37   : > { %s543_s7 = sshll.u32 %s5968_s1, 4  ;;  %s5394_s1 = smov [#allocation10]   ;;  %s544_s7 = int_to_ptr.hbm [resolvable:$true] %s543_s7 }
  0x38   : > { %4641 = dma.hbm_to_vmem [thread:$0]  (!%p5561_p5), %s544_s7, 128, %s546_s16, [#allocation6]  }
  0x39   : > { %s569_s30 = sshll.u32 %s5394_s1, 4  ;;  %s5395_s22 = smov [#allocation13]   ;;  %s570_s30 = int_to_ptr.vmem [resolvable:$true] %s569_s30 }
  0x3a   : > { %s594_s3 = sshll.u32 %s5395_s22, 4  ;;  %s5396_s29 = smov 48   ;;  %s595_s3 = int_to_ptr.vmem [resolvable:$true] %s594_s3 }
  0x3b   : > { %s5397_s18 = smov 3   ;;  %s620_s16 = sshll.u32 %s5929_s8, 4  ;;  %s621_s16 = int_to_ptr.hbm [resolvable:$true] %s620_s16 }
  0x3c   : > { %s567_s24 = sshll.u32 %s5969_s14, 4  ;;  %s5398_s14 = smov [#allocation16]   ;;  %s568_s24 = int_to_ptr.hbm [resolvable:$true] %s567_s24 }
  0x3d   : > { %4647 = dma.hbm_to_vmem [thread:$0]  (!%p5561_p5), %s568_s24, 16, %s570_s30, [#allocation9]  }
  0x3e   : > { %4653 = dma.hbm_to_vmem [thread:$0]  (!%p5561_p5), %s593_s23, 96, %s595_s3, [#allocation12], %s5396_s29, %s5396_s29, %s5397_s18  }
  0x3f   : > { %s622_s20 = sshll.u32 %s5398_s14, 4  ;;  %s651_s24 = sshll.u32 %s5932_s11, 4  ;;  %s623_s20 = int_to_ptr.vmem [resolvable:$true] %s622_s20  ;;  %s652_s24 = int_to_ptr.hbm [resolvable:$true] %s651_s24 }
  0x40   : > { %s5399_s30 = smov 16   ;;  %s5400_s22 = smov 1  }
  0x41   : > { %4659 = dma.hbm_to_vmem [thread:$0]  (!%p5561_p5), %s621_s16, 32, %s623_s20, [#allocation15], %s5399_s30, %s5399_s30, %s5400_s22  }
  0x42   : > { %s5401_s23 = smov [#allocation19]   ;;  %s5402_s29 = smov 32  }
  0x43   : > { %s653_s3 = sshll.u32 %s5401_s23, 4  ;;  %s5403_s18 = smov 2   ;;  %s654_s3 = int_to_ptr.vmem [resolvable:$true] %s653_s3 }
  0x44   : > { %4665 = dma.hbm_to_vmem [thread:$0]  (!%p5561_p5), %s652_s24, 64, %s654_s3, [#allocation18], %s5402_s29, %s5402_s29, %s5403_s18  }
  0x45   : > { %s679_s14 = sshll.u32 %s5934_s13, 4  ;;  %s5404_s5 = smov [#allocation22]   ;;  %s680_s14 = int_to_ptr.hbm [resolvable:$true] %s679_s14 }
  0x46   : > { %s681_s1 = sshll.u32 %s5404_s5, 4  ;;  %s713_s23 = sshll.u32 %s5938_s17, 4  ;;  %s682_s1 = int_to_ptr.vmem [resolvable:$true] %s681_s1  ;;  %s714_s23 = int_to_ptr.hbm [resolvable:$true] %s713_s23 }
  0x47   : > { %4671 = dma.hbm_to_vmem [thread:$0]  (!%p5561_p5), %s680_s14, 32, %s682_s1, [#allocation21], %s5399_s30, %s5399_s30, %s5400_s22  }
  0x48   : > { %s5405_s24 = smov [#allocation25]   ;;  %s730_s9 = sshll.u32 %s5940_s19, 4  ;;  %s731_s9 = int_to_ptr.hbm [resolvable:$true] %s730_s9 }
  0x49   : > { %s715_s3 = sshll.u32 %s5405_s24, 4  ;;  %s5970_s7 = smov 12   ;;  %s716_s3 = int_to_ptr.vmem [resolvable:$true] %s715_s3 }
  0x4a   : > { %s5971_s5 = smov 192   ;;  %s5406_s30 = smov [#allocation26]  }
  0x4b   : > { %4677 = dma.hbm_to_vmem [thread:$0]  (!%p5561_p5), %s714_s23, 3072, %s716_s3, [#allocation24], %s5971_s5, %s5971_s5, %s5970_s7  }
  0x4c   : > { %s732_s22 = sshll.u32 %s5406_s30, 4  ;;  %s5653_s14 = sadd.s32 1, %s5378_s27   ;;  %s733_s22 = int_to_ptr.vmem [resolvable:$true] %s732_s22 }
  0x4d   : > { %4680 = dma.hbm_to_vmem [thread:$0]  (!%p5561_p5), %s731_s9, 3072, %s733_s22, [#allocation27], %s5386_s21, %s5386_s21, %s5387_s0  }
  0x4e   : > { %s46_s1 = ssub.s32 %s5378_s27, %s5653_s14  ;;  %s49_s16 = sadd.s32 1, %s5374_s26 }
  0x4f   : > { %p47_p6 = scmp.eq.s32.totalorder %s46_s1, 0  ;;  %p56_p7 = scmp.ne.s32.totalorder %s5374_s26, %s5370_s25 }
  0x50   : > { %p57_p8 = scmp.eq.s32.totalorder %s5378_s27, 0  ;;  %p62_p9 = scmp.ne.s32.totalorder %s5370_s25, %s5366_s2 }
  0x51   : > { %s5664_s20 = scalar_select %p47_p6, %s5374_s26, %s49_s16  }
  0x52   : > { %p58_p10 = por %p57_p8, %p56_p7  ;;  %p5668_p11 = por %p63_p1, %p62_p9 }
  0x53   : > { %p4700_p12 = scmp.lt.s32.totalorder %s5378_s27, 2  ;;  %s749_s28 = sand.u32 1, %s5374_s26  }
  0x54   : > { %s3606_s21 = sshll.u32 %s749_s28, 3  ;;  %s3607_s0 = sshll.u32 %s5378_s27, 3 }
  0x55   : > { %s5973_s29 = sld [smem:[#allocation38_spill]]  ;;  %s753_s9 = scalar_lea.vmem [#allocation3], %s3606_s21 }
  0x56   : > { %s761_s7 = sshll.u32 %s753_s9, 4  ;;  %p5678_p13 = pnand %p4700_p12, %p58_p10  ;;  %s762_s7 = int_to_ptr.vmem [resolvable:$true] %s761_s7 }
  0x57   : > { %s750_s30 = scalar_lea.sflag [#allocation4], %s749_s28 }
  0x58   : > { %p5286_p2 = pneg %p5678_p13 }
  0x5b   : > { %s757_s18 = scalar_lea.hbm %s5973_s29, %s3607_s0  ;;  %s5289_s21 = scalar_lea.hbm %s5973_s29, 16 }
  0x5c   : > { %s759_s5 = sshll.u32 %s757_s18, 4  ;;  %s760_s5 = int_to_ptr.hbm [resolvable:$true] %s759_s5 }
  0x5d   : > { %s5282_s22 = sshra.s32 %s760_s5, 4  ;;  %s5283_s22 = int_to_ptr.hbm [resolvable:$true] %s5282_s22 }
  0x5e   : > { %s5284_s1 = scalar_lea.hbm %s5283_s22, 8  ;;  %p5290_p6 = scmp.lt.s32.totalorder %s5283_s22, %s5973_s29 }
  0x5f   : > { %p5285_p0 = scmp.ne.s32.totalorder %s5283_s22, %s5284_s1  ;;  %p5291_p7 = scmp.lt.s32.totalorder %s5289_s21, %s5284_s1 }
  0x61   : > { %p5287_p4 = pnand %p5286_p2, %p5285_p0  ;;  %p5292_p8 = por %p5291_p7, %p5290_p6 }
  0x63   : > { %p5288_p5 = pneg %p5287_p4 }
  0x65   : > { %p5293_p9 = pnand %p5292_p8, %p5288_p5 }
  0x67   : > { %5296 = shalt.err (!%p5293_p9)
}
  0x68   : > { %4684 = dma.hbm_to_vmem [thread:$0]  (!%p5678_p13), %s760_s5, 128, %s762_s7, %s750_s30  }
  0x69   : > { %770 = sbr.rel (%p5550_p3) target bundleno = 4962 (0x1362), region = 104  ;;  %s772_s3 = sand.u32 (!%p5550_p3), 1, %s5370_s25  }
  0x6a   : > { %s3609_s18 = sshll.u32 (!%p5550_p3), %s772_s3, 3  ;;  %s773_s9 = scalar_lea.sflag (!%p5550_p3), [#allocation4], %s772_s3 }
  0x6b   : > { %s776_s27 = scalar_lea.vmem (!%p5550_p3), [#allocation3], %s3609_s18 }
  0x6e   : > { %5329 = dma.done.wait (%p5668_p11), %s773_s9, 128  }
  0x6f   : > { %5331 = vsyncadd (%p5668_p11), %s773_s9, 4294967168 }
  0x70   : > { %5333 = dma.done.wait (%p63_p1), [#allocation6], 256  }
  0x71   : > { %5335 = vsyncadd (%p63_p1), [#allocation6], 4294967040 }
  0x72   : > { %5337 = dma.done.wait (%p63_p1), [#allocation9], 80  }
  0x73   : > { %5339 = vsyncadd (%p63_p1), [#allocation9], 4294967216 }
  0x74   : > { %5341 = dma.done.wait (%p63_p1), [#allocation12], 6240  }
  0x75   : > { %5343 = vsyncadd (%p63_p1), [#allocation12], 4294961056 }
  0x76   : > { %5345 = dma.done.wait (%p63_p1), [#allocation15], 2080  }
  0x77   : > { %5347 = vsyncadd (%p63_p1), [#allocation15], 4294965216 }
  0x78   : > { %5349 = dma.done.wait (%p63_p1), [#allocation18], 4160  }
  0x79   : > { %5351 = vsyncadd (%p63_p1), [#allocation18], 4294963136 }
  0x7a   : > { %5353 = dma.done.wait (%p63_p1), [#allocation21], 4128  }
  0x7b   : > { %5355 = vsyncadd (%p63_p1), [#allocation21], 4294963168 }
  0x7c   : > { %5357 = dma.done.wait (%p63_p1), [#allocation24], 4096  }
  0x7d   : > { %5359 = vsyncadd (%p63_p1), [#allocation24], 4294963200 }
  0x7e   : > { %5361 = dma.done.wait (%p63_p1), [#allocation27], 3072  }
  0x7f   : > { %5363 = vsyncadd (%p63_p1), [#allocation27], 4294964224  ;;  %vm924_vm0 = vcmask 1043456   ;;  %v914_v0 = vld [vmem:[#allocation8] sm:$0xf]  ;;  %vm920_vm1 = vcmask 64512  }
  0x80   : > { %v913_v1 = vld [vmem:[%s776_s27] sm:$0xff]  ;;  %v926_v3 = vsel %vm924_vm0, %v914_v0, 0  ;;  %v4411_v5 = vld [vmem:[#allocation11 + $0xb0] sm:$0xf0]  ;;  %v4410_v6 = vld [vmem:[#allocation11 + $0xac] sm:$0xf] }
  0x81   : > { %v3712_v2 = vld [vmem:[#allocation11 + $0xa8] sm:$0xf]  ;;  %v916_v4 = vpack.c.bf16 %v913_v1, %v913_v1  ;;  %935 = vmatpush.bf16.msra.mxu0 %v926_v3  ;;  %v3714_v8 = vld [vmem:[#allocation11 + $0xb4] sm:$0xf0]  ;;  %v3720_v9 = vld [vmem:[#allocation11 + $0xb0] sm:$0xf] }
  0x82   : > { %v3713_v7 = vor.u32 %v4411_v5, %v3712_v2  ;;  %v4412_v10 = vld [vmem:[#allocation11 + $0xb8] sm:$0xf0]  ;;  %v3717_v11 = vor.u32 %v4410_v6, %v3714_v8  ;;  %v3700_v13 = vld [vmem:[#allocation11 + $0x90] sm:$0xf]  ;;  %v4407_v15 = vld [vmem:[#allocation11 + $0x94] sm:$0xf] }
  0x83   : > { %v3721_v12 = vor.u32 %v4412_v10, %v3720_v9  ;;  %v4408_v14 = vld [vmem:[#allocation11 + $0x98] sm:$0xf0]  ;;  %v3702_v17 = vld [vmem:[#allocation11 + $0x9c] sm:$0xf0]  ;;  %v3708_v18 = vld [vmem:[#allocation11 + $0x98] sm:$0xf] }
  0x84   : > { %1113 = vmatpush.bf16.msra.mxu1 %v3713_v7  ;;  %v3701_v16 = vor.u32 %v4408_v14, %v3700_v13  ;;  %v4409_v19 = vld [vmem:[#allocation11 + $0xa0] sm:$0xf0]  ;;  %3625 = vmatmul.msk.bf16.vlgmr.msra.gmra.mxu0 %vm920_vm1, %v916_v4  ;;  %v3705_v20 = vor.u32 %v4407_v15, %v3702_v17  ;;  %v3688_v21 = vld [vmem:[#allocation11 + $0x78] sm:$0xf]  ;;  %v4404_v24 = vld [vmem:[#allocation11 + $0x7c] sm:$0xf] }
  0x85   : > { %1126 = vmatpush.bf16.msra.mxu2 %v3717_v11  ;;  %v4405_v22 = vld [vmem:[#allocation11 + $0x80] sm:$0xf0]  ;;  %1139 = vmatpush.bf16.msra.mxu3 %v3721_v12  ;;  %v3709_v23 = vor.u32 %v4409_v19, %v3708_v18  ;;  %v3690_v25 = vld [vmem:[#allocation11 + $0x84] sm:$0xf0]  ;;  %v3696_v26 = vld [vmem:[#allocation11 + $0x80] sm:$0xf] }
  0x86   : > { %v4406_v27 = vld [vmem:[#allocation11 + $0x88] sm:$0xf0]  ;;  %v3689_v28 = vor.u32 %v4405_v22, %v3688_v21  ;;  %v3693_v29 = vor.u32 %v4404_v24, %v3690_v25  ;;  %v3676_v30 = vld [vmem:[#allocation11 + $0x60] sm:$0xf]  ;;  %v4401_v33 = vld [vmem:[#allocation11 + $0x64] sm:$0xf] }
  0x87   : > { %v4402_v31 = vld [vmem:[#allocation11 + $0x68] sm:$0xf0]  ;;  %v3697_v32 = vor.u32 %v4406_v27, %v3696_v26  ;;  %v3678_v34 = vld [vmem:[#allocation11 + $0x6c] sm:$0xf0]  ;;  %v3684_v35 = vld [vmem:[#allocation11 + $0x68] sm:$0xf] }
  0x88   : > { %1114 = vmatpush.bf16.msra.mxu1 %v3701_v16  ;;  %v4403_v36 = vld [vmem:[#allocation11 + $0x70] sm:$0xf0]  ;;  %v3677_v37 = vor.u32 %v4402_v31, %v3676_v30  ;;  %v3664_v38 = vld [vmem:[#allocation11 + $0x48] sm:$0xf]  ;;  %v4398_v40 = vld [vmem:[#allocation11 + $0x4c] sm:$0xf]  ;;  %v3681_v41 = vor.u32 %v4401_v33, %v3678_v34 }
  0x89   : > { %1127 = vmatpush.bf16.msra.mxu2 %v3705_v20  ;;  %1140 = vmatpush.bf16.msra.mxu3 %v3709_v23  ;;  %v4399_v39 = vld [vmem:[#allocation11 + $0x50] sm:$0xf0]  ;;  %v3666_v42 = vld [vmem:[#allocation11 + $0x54] sm:$0xf0]  ;;  %v3685_v43 = vor.u32 %v4403_v36, %v3684_v35  ;;  %v3672_v44 = vld [vmem:[#allocation11 + $0x50] sm:$0xf] }
  0x8a   : > { %v4400_v45 = vld [vmem:[#allocation11 + $0x58] sm:$0xf0]  ;;  %v3665_v46 = vor.u32 %v4399_v39, %v3664_v38  ;;  %v3669_v47 = vor.u32 %v4398_v40, %v3666_v42  ;;  %v3652_v48 = vld [vmem:[#allocation11 + $0x30] sm:$0xf]  ;;  %v4395_v51 = vld [vmem:[#allocation11 + $0x34] sm:$0xf] }
  0x8b   : > { %v4396_v49 = vld [vmem:[#allocation11 + $0x38] sm:$0xf0]  ;;  %v3673_v50 = vor.u32 %v4400_v45, %v3672_v44  ;;  %v3654_v52 = vld [vmem:[#allocation11 + $0x3c] sm:$0xf0]  ;;  %v3660_v53 = vld [vmem:[#allocation11 + $0x38] sm:$0xf] }
  0x8c   : > { %1115 = vmatpush.bf16.msra.mxu1 %v3689_v28  ;;  %v4397_v54 = vld [vmem:[#allocation11 + $0x40] sm:$0xf0]  ;;  %v3653_v55 = vor.u32 %v4396_v49, %v3652_v48  ;;  %v3657_v56 = vor.u32 %v4395_v51, %v3654_v52  ;;  %v3640_v58 = vld [vmem:[#allocation11 + $0x18] sm:$0xf]  ;;  %v4392_v60 = vld [vmem:[#allocation11 + $0x1c] sm:$0xf] }
  0x8d   : > { %1128 = vmatpush.bf16.msra.mxu2 %v3693_v29  ;;  %1141 = vmatpush.bf16.msra.mxu3 %v3697_v32  ;;  %v3661_v57 = vor.u32 %v4397_v54, %v3660_v53  ;;  %v4393_v59 = vld [vmem:[#allocation11 + $0x20] sm:$0xf0]  ;;  %v3642_v62 = vld [vmem:[#allocation11 + $0x24] sm:$0xf0]  ;;  %v3648_v63 = vld [vmem:[#allocation11 + $0x20] sm:$0xf] }
  0x8e   : > { %v3641_v61 = vor.u32 %v4393_v59, %v3640_v58  ;;  %v4394_v0 = vld [vmem:[#allocation11 + $0x28] sm:$0xf0]  ;;  %v3645_v1 = vor.u32 %v4392_v60, %v3642_v62  ;;  %v3628_v3 = vld [vmem:[#allocation11] sm:$0xf]  ;;  %v4389_v6 = vld [vmem:[#allocation11 + $0x4] sm:$0xf] }
  0x8f   : > { %v3649_v2 = vor.u32 %v4394_v0, %v3648_v63  ;;  %v4390_v4 = vld [vmem:[#allocation11 + $0x8] sm:$0xf0]  ;;  %v3630_v7 = vld [vmem:[#allocation11 + $0xc] sm:$0xf0]  ;;  %v3636_v8 = vld [vmem:[#allocation11 + $0x8] sm:$0xf] }
  0x90   : > { %1116 = vmatpush.bf16.msra.mxu1 %v3677_v37  ;;  %v3629_v5 = vor.u32 %v4390_v4, %v3628_v3  ;;  %v3633_v9 = vor.u32 %v4389_v6, %v3630_v7  ;;  %v4391_v10 = vld [vmem:[#allocation11 + $0x10] sm:$0xf0]  ;;  %v4779_v12 = vld [vmem:[#allocation10] ss:$0 sm:$0xff]  ;;  %v941_v14 = vld [vmem:[#allocation5] sm:$0xff]  ;;  %vm1152_vm2 = vcmask 261120  }
  0x91   : > { %1129 = vmatpush.bf16.msra.mxu2 %v3681_v41  ;;  %1142 = vmatpush.bf16.msra.mxu3 %v3685_v43  ;;  %v3637_v11 = vor.u32 %v4391_v10, %v3636_v8  ;;  %v976_v20 = vld [vmem:[#allocation13] sm:$0x7]  ;;  %s5407_s23 = smov 32   ;;  %s5408_s7 = smov 96   ;;  %v5749_v36 = vld [vmem:[#allocation7] sm:$0xff]  ;;  %vm1288_vm3 = vcmask 523520  }
  0x92   : > { %v980_v21 = vperm.slane %v976_v20, 1  ;;  %v981_v22 = vperm.slane %v976_v20, 2  ;;  %v979_v24 = vperm.slane %v976_v20, 0  ;;  %s5409_s5 = smov 64   ;;  %vm1361_vm4 = vcmask 785920   ;;  %s5976_s22 = sld [smem:[#allocation45_spill]] }
  0x93   : > { %vm1434_vm5 = vcmask 1048320   ;;  %s5977_s24 = sld [smem:[#allocation46_spill]]  ;;  %p909_p1 = scmp.lt.s32.totalorder %s5545_s4, 1 }
  0x94   : > { %1117 = vmatpush.bf16.msra.mxu1 %v3665_v46  ;;  %s5978_s18 = sld [smem:[#allocation47_spill]] }
  0x95   : > { %1130 = vmatpush.bf16.msra.mxu2 %v3669_v47  ;;  %1143 = vmatpush.bf16.msra.mxu3 %v3673_v50  ;;  %s5980_s2 = sld [smem:[#allocation49_spill]]  ;;  %s5987_s4 = smov (!%p909_p1, %s5545_s4), 1 }
  0x96   : > { %s5981_s16 = sld [smem:[#allocation50_spill]] }
  0x98   : > { %1118 = vmatpush.bf16.msra.mxu1 %v3653_v55 }
  0x99   : > { %1131 = vmatpush.bf16.msra.mxu2 %v3657_v56  ;;  %1144 = vmatpush.bf16.msra.mxu3 %v3661_v57 }
  0x9c   : > { %1119 = vmatpush.bf16.msra.mxu1 %v3641_v61  ;;  %s911_s21 = scalar_lea.vmem %s5981_s16, %s5987_s4 }
  0x9d   : > { %1132 = vmatpush.bf16.msra.mxu2 %v3645_v1  ;;  %1145 = vmatpush.bf16.msra.mxu3 %v3649_v2 }
  0xa0   : > { %1120 = vmatpush.bf16.msra.mxu1 %v3629_v5 }
  0xa1   : > { %1133 = vmatpush.bf16.msra.mxu2 %v3633_v9  ;;  %1146 = vmatpush.bf16.msra.mxu3 %v3637_v11 }
 0x101   : > { %v937_v13 = vpop.f32.mrf.mxu0 }
 0x102   : > { %v938_v15 = vadd.f32 %v4779_v12, %v937_v13 }
 0x104   : > { %v5732_v16 = vadd.f32 %v941_v14, %v938_v15 }
 0x106   : > { %v977_v17 = vpack.c.bf16 %v5732_v16, %v5732_v16 }
 0x108   : > { %1121 = vmatmul.bf16.vlgmr.msra.gmra.mxu1 %v977_v17  ;;  %1134 = vmatmul.bf16.vlgmr.msra.gmra.mxu2 %v977_v17 }
 0x109   : > { %1147 = vmatmul.bf16.vlgmr.msra.gmra.mxu3 %v977_v17  ;;  %v939_v18 = vpop.f32.mrf.mxu0 }
 0x185   : > { %v1122_v19 = vpop.f32.mrf.mxu1 }
 0x186   : > { %v1123_v29 = vadd.f32 %v1122_v19, %v979_v24 }
 0x18b   : > { %v1135_v23 = vpop.f32.mrf.mxu2 }
 0x18c   : > { %v1136_v25 = vadd.f32 %v1135_v23, %v980_v21  ;;  %v1148_v26 = vpop.f32.mrf.mxu3 }
 0x18d   : > { %v5736_v27 = vadd.f32 %v1148_v26, %v981_v22  ;;  %v1124_v28 = vpop.f32.mrf.mxu1 }
 0x18e   : > { %1365 = vrot.lane.b32.xlu2 %v1136_v25, %s5407_s23  ;;  %1218 = vrot.lane.b32.xlu1 %v1136_v25, %s5408_s7 }
 0x18f   : > { %3722 = vmatpush.xpose.msk.msrb.mxu0 %vm1152_vm2, %v1136_v25 }
 0x192   : > { %3723 = vmatmul.msk.f32.vlgmr.msrb.gmra.mxu0 %vm1152_vm2, %v1123_v29 }
 0x193   : > { %1210 = vmatpush.msra.mxu0 %v5736_v27  ;;  %v1137_v30 = vpop.f32.mrf.mxu2 }
 0x194   : > { %v1150_v31 = vpop.f32.mrf.mxu3 }
 0x195   : > { %v4420_v31 = vld [vmem:[#allocation14 + $0x38] sm:$0xff] }
 0x196   : > { %1292 = vrot.lane.b32.xlu1 %v1136_v25, %s5409_s5  ;;  %1216 = vrot.lane.b32.xlu2 %v1123_v29, %s5408_s7 }
 0x19e   : > { %1363 = vrot.lane.b32.xlu1 %v1123_v29, %s5407_s23 }
 0x1e8   : > { %v1366_v32 = vpop.permute.xlu2 %1365 }
 0x1e9   : > { %3731 = vmatpush.xpose.msk.msrb.mxu3 %vm1152_vm2, %v1366_v32  ;;  %v4419_v32 = vld [vmem:[#allocation14 + $0x30] sm:$0xff] }
 0x1f0   : > { %v1217_v53 = vpop.permute.xlu2 %1216 }
 0x200   : > { %v1219_v33 = vpop.permute.xlu1 %1218 }
 0x201   : > { %3725 = vmatpush.xpose.msk.msrb.mxu0 %vm1152_vm2, %v1219_v33  ;;  %v4418_v33 = vld [vmem:[#allocation14 + $0x28] sm:$0xff] }
 0x208   : > { %v1293_v34 = vpop.permute.xlu1 %1292 }
 0x209   : > { %3728 = vmatpush.xpose.msk.msrb.mxu1 %vm1152_vm2, %v1293_v34  ;;  %v4417_v34 = vld [vmem:[#allocation14 + $0x20] sm:$0xff] }
 0x20d   : > { %1506 = vmatpush.bf16.msra.mxu1 %v4420_v31  ;;  %v3786_v31 = vld [vmem:[#allocation17 + $0x28] sm:$0xf0] }
 0x20f   : > { %v1176_v35 = vpop.f32.mrf.mxu0 }
 0x210   : > { %v1179_v37 = vmul.f32 0.17677669, %v1176_v35  ;;  %v1364_v38 = vpop.permute.xlu1 %1363  ;;  %v4416_v35 = vld [vmem:[#allocation14 + $0x18] sm:$0xff] }
 0x211   : > { %3732 = vmatmul.msk.f32.vlgmr.msrb.gmra.mxu3 %vm1152_vm2, %v1364_v38  ;;  %1507 = vmatpush.bf16.msra.mxu1 %v4419_v32 }
 0x212   : > { %v1180_v39 = vadd.f32 %v1179_v37, %v5749_v36  ;;  %v4415_v37 = vld [vmem:[#allocation14 + $0x10] sm:$0xff] }
 0x214   : > { %v1181_v40 = vsel %vm920_vm1, %v1180_v39, -inf }
 0x215   : > { %1182 = vmax.xlane.f32.xlu0 %v1181_v40  ;;  %1508 = vmatpush.bf16.msra.mxu1 %v4418_v33  ;;  %v4413_v40 = vld [vmem:[#allocation14] sm:$0xff]  ;;  %v3776_v33 = vld [vmem:[#allocation17 + $0x10] sm:$0xf] }
 0x219   : > { %1509 = vmatpush.bf16.msra.mxu1 %v4417_v34  ;;  %v4424_v34 = vld [vmem:[#allocation17 + $0x14] sm:$0xf0] }
 0x21d   : > { %1510 = vmatpush.bf16.msra.mxu1 %v4416_v35  ;;  %v4423_v35 = vld [vmem:[#allocation17 + $0x14] sm:$0xf] }
 0x221   : > { %1511 = vmatpush.bf16.msra.mxu1 %v4415_v37  ;;  %v3777_v37 = vor.u32 %v4424_v34, %v3776_v33 }
 0x288   : > { %v1183_v41 = vpop.xlane.xlu0 %1182 }
 0x289   : > { %v1184_v42 = vsub.f32 %v1180_v39, %v1183_v41  ;;  %v4414_v39 = vld [vmem:[#allocation14 + $0x8] sm:$0xff] }
 0x28a   : > { %1512 = vmatpush.bf16.msra.mxu1 %v4414_v39  ;;  %v3768_v39 = vld [vmem:[#allocation17] sm:$0xf] }
 0x28b   : > { %v1185_v43 = vmul.f32 1.442695, %v1184_v42 }
 0x28d   : > { %4784 = vpow2.f32 %v1185_v43 }
 0x28e   : > { %1513 = vmatpush.bf16.msra.mxu1 %v4413_v40  ;;  %v4422_v40 = vld [vmem:[#allocation17 + $0x4] sm:$0xf0] }
 0x293   : > { %v4785_v44 = vpop.eup %4784 }
 0x294   : > { %v1187_v45 = vsel %vm920_vm1, %v4785_v44, 0.0  ;;  %v1388_v46 = vpop.f32.mrf.mxu3 }
 0x295   : > { %1188 = vadd.xlane.f32.xlu0 %v1187_v45  ;;  %v1391_v47 = vmul.f32 0.17677669, %v1388_v46  ;;  %v4780_v45 = vld [vmem:[#allocation16] ss:$0 sm:$0xff] }
 0x297   : > { %v1392_v48 = vadd.f32 %v1391_v47, %v5749_v36 }
 0x299   : > { %v1393_v49 = vsel %vm920_vm1, %v1392_v48, -inf }
 0x2a9   : > { %1290 = vrot.lane.b32.xlu0 %v1123_v29, %s5409_s5 }
 0x2d3   : > { %1394 = vmax.xlane.f32.xlu0 %v1393_v49 }
 0x2e7   : > { %1404 = vrot.lane.b32.xlu0 %v5736_v27, %s5407_s23 }
 0x308   : > { %v1189_v50 = vpop.xlane.xlu0 %1188 }
 0x309   : > { %4786 = vrcp.f32 %v1189_v50  ;;  %v5410_v50 = vmov 128.0  }
 0x30f   : > { %v4787_v51 = vpop.eup %4786 }
 0x310   : > { %v1191_v52 = vmul.f32 %v4787_v51, %v4785_v44  ;;  %v3824_v51 = vld [vmem:[#allocation17 + $0x70] sm:$0xf] }
 0x312   : > { %3724 = vmatmul.msk.f32.vlgmr.msra.gmra.mxu0 %vm920_vm1, %v1191_v52  ;;  %v4436_v52 = vld [vmem:[#allocation17 + $0x74] sm:$0xf0] }
 0x31a   : > { %3726 = vmatmul.msk.f32.vlgmr.msrb.gmra.mxu0 %vm1152_vm2, %v1217_v53  ;;  %v4435_v53 = vld [vmem:[#allocation17 + $0x74] sm:$0xf] }
 0x31b   : > { %v1291_v54 = vpop.permute.xlu0 %1290 }
 0x31c   : > { %3729 = vmatmul.msk.f32.vlgmr.msrb.gmra.mxu1 %vm1152_vm2, %v1291_v54  ;;  %v3825_v54 = vor.u32 %v4436_v52, %v3824_v51  ;;  %v4451_v51 = vld [vmem:[#allocation20 + $0x70] sm:$0xff] }
 0x346   : > { %v1395_v56 = vpop.xlane.xlu0 %1394 }
 0x347   : > { %v1396_v57 = vsub.f32 %v1392_v48, %v1395_v56 }
 0x349   : > { %v1397_v60 = vmul.f32 1.442695, %v1396_v57 }
 0x34b   : > { %4788 = vpow2.f32 %v1397_v60 }
 0x351   : > { %v4789_v3 = vpop.eup %4788 }
 0x352   : > { %v1399_v4 = vsel %vm920_vm1, %v4789_v3, 0.0 }
 0x359   : > { %v1405_v25 = vpop.permute.xlu0 %1404 }
 0x38f   : > { %v1212_v55 = vpop.f32.mrf.mxu0 }
 0x390   : > { %1215 = vst.msk [vmem:[#allocation2] sm:$0xff] %vm1152_vm2, %v1212_v55  ;;  %v3826_v55 = vld [vmem:[#allocation17 + $0x78] sm:$0xf0] }
 0x391   : > { %v3829_v56 = vor.u32 %v4435_v53, %v3826_v55  ;;  %v4442_v53 = vld [vmem:[#allocation20 + $0x28] sm:$0xff]  ;;  %v4441_v55 = vld [vmem:[#allocation20 + $0x20] sm:$0xff] }
 0x393   : > { %1668 = vmatpush.bf16.msra.mxu3 %v3829_v56  ;;  %v4449_v56 = vld [vmem:[#allocation20 + $0x60] sm:$0xff] }
 0x397   : > { %v1241_v58 = vpop.f32.mrf.mxu0 }
 0x398   : > { %v1244_v59 = vmul.f32 0.17677669, %v1241_v58 }
 0x399   : > { %v1315_v61 = vpop.f32.mrf.mxu1 }
 0x39a   : > { %v1318_v62 = vmul.f32 0.17677669, %v1315_v61  ;;  %v1245_v63 = vadd.f32 %v1244_v59, %v5749_v36 }
 0x39c   : > { %v1246_v0 = vsel %vm920_vm1, %v1245_v63, -inf  ;;  %v1319_v1 = vadd.f32 %v1318_v62, %v5749_v36 }
 0x39d   : > { %1247 = vmax.xlane.f32.xlu2 %v1246_v0 }
 0x39e   : > { %v1320_v2 = vsel %vm920_vm1, %v1319_v1, -inf }
 0x39f   : > { %1321 = vmax.xlane.f32.xlu1 %v1320_v2  ;;  %v3816_v2 = vld [vmem:[#allocation17 + $0x60] sm:$0xf] }
 0x3a7   : > { %1400 = vadd.xlane.f32.xlu1 %v1399_v4  ;;  %v4433_v4 = vld [vmem:[#allocation17 + $0x64] sm:$0xf] }
 0x3c0   : > { %1331 = vrot.lane.b32.xlu1 %v5736_v27, %s5409_s5 }
 0x410   : > { %v1248_v5 = vpop.xlane.xlu2 %1247 }
 0x411   : > { %v1249_v8 = vsub.f32 %v1245_v63, %v1248_v5 }
 0x412   : > { %v1322_v6 = vpop.xlane.xlu1 %1321 }
 0x413   : > { %v1323_v7 = vsub.f32 %v1319_v1, %v1322_v6  ;;  %v1250_v10 = vmul.f32 1.442695, %v1249_v8  ;;  %v3818_v6 = vld [vmem:[#allocation17 + $0x68] sm:$0xf0]  ;;  %v3808_v8 = vld [vmem:[#allocation17 + $0x50] sm:$0xf] }
 0x415   : > { %v1324_v9 = vmul.f32 1.442695, %v1323_v7  ;;  %v3821_v7 = vor.u32 %v4433_v4, %v3818_v6 }
 0x417   : > { %4790 = vpow2.f32 %v1324_v9  ;;  %1669 = vmatpush.bf16.msra.mxu3 %v3821_v7  ;;  %v4432_v9 = vld [vmem:[#allocation17 + $0x54] sm:$0xf0] }
 0x418   : > { %4792 = vpow2.f32 %v1250_v10  ;;  %v4431_v10 = vld [vmem:[#allocation17 + $0x54] sm:$0xf] }
 0x41a   : > { %v1401_v15 = vpop.xlane.xlu1 %1400 }
 0x41d   : > { %v4791_v11 = vpop.eup %4790 }
 0x41e   : > { %v1326_v12 = vsel %vm920_vm1, %v4791_v11, 0.0  ;;  %v4793_v13 = vpop.eup %4792 }
 0x41f   : > { %1327 = vadd.xlane.f32.xlu2 %v1326_v12  ;;  %v1252_v14 = vsel %vm920_vm1, %v4793_v13, 0.0  ;;  %v3810_v12 = vld [vmem:[#allocation17 + $0x58] sm:$0xf0] }
 0x427   : > { %1253 = vadd.xlane.f32.xlu2 %v1252_v14  ;;  %v3800_v14 = vld [vmem:[#allocation17 + $0x40] sm:$0xf] }
 0x432   : > { %v1332_v17 = vpop.permute.xlu1 %1331 }
 0x433   : > { %1352 = vmatpush.msrb.mxu2 %v1332_v17  ;;  %v4429_v17 = vld [vmem:[#allocation17 + $0x44] sm:$0xf] }
 0x435   : > { %1655 = vmatpush.bf16.msra.mxu2 %v3825_v54  ;;  %v4450_v54 = vld [vmem:[#allocation20 + $0x68] sm:$0xff] }
 0x43f   : > { %1258 = vrot.lane.b32.xlu2 %v5736_v27, %s5408_s7 }
 0x492   : > { %v1328_v18 = vpop.xlane.xlu2 %1327 }
 0x493   : > { %4794 = vrcp.f32 %v1328_v18 }
 0x499   : > { %v4795_v19 = vpop.eup %4794 }
 0x49a   : > { %v1254_v20 = vpop.xlane.xlu2 %1253  ;;  %v1330_v21 = vmul.f32 %v4795_v19, %v4791_v11  ;;  %v3809_v11 = vor.u32 %v4432_v9, %v3808_v8  ;;  %v3802_v19 = vld [vmem:[#allocation17 + $0x48] sm:$0xf0] }
 0x49b   : > { %4796 = vrcp.f32 %v1254_v20  ;;  %v3805_v20 = vor.u32 %v4429_v17, %v3802_v19  ;;  %v1568_v17 = vld [vmem:[#allocation19] sm:$0x3] }
 0x49c   : > { %3730 = vmatmul.msk.f32.vlgmr.msrb.gmra.mxu2 %vm920_vm1, %v1330_v21  ;;  %4798 = vrcp.f32 %v1401_v15  ;;  %v4430_v15 = vld [vmem:[#allocation17 + $0x44] sm:$0xf0]  ;;  %v3792_v21 = vld [vmem:[#allocation17 + $0x30] sm:$0xf]  ;;  %v1572_v19 = vperm.slane %v1568_v17, 1 }
 0x49d   : > { %4800 = vrcp.f32 %v5410_v50  ;;  %v3801_v18 = vor.u32 %v4430_v15, %v3800_v14  ;;  %v4443_v50 = vld [vmem:[#allocation20 + $0x30] sm:$0xff]  ;;  %v4437_v14 = vld [vmem:[#allocation20] sm:$0xff] }
 0x49e   : > { %v4445_v15 = vld [vmem:[#allocation20 + $0x40] sm:$0xff] }
 0x4a1   : > { %v4797_v22 = vpop.eup %4796 }
 0x4a2   : > { %v1256_v23 = vmul.f32 %v4797_v22, %v4793_v13  ;;  %v1259_v24 = vpop.permute.xlu2 %1258  ;;  %v4799_v26 = vpop.eup %4798  ;;  %v3813_v13 = vor.u32 %v4431_v10, %v3810_v12  ;;  %v4428_v22 = vld [vmem:[#allocation17 + $0x34] sm:$0xf0]  ;;  %v4438_v12 = vld [vmem:[#allocation20 + $0x8] sm:$0xff] }
 0x4a3   : > { %1279 = vmatpush.msra.mxu0 %v1259_v24  ;;  %v1403_v28 = vmul.f32 %v4799_v26, %v4789_v3  ;;  %v4801_v57 = vpop.eup %4800  ;;  %v4434_v3 = vld [vmem:[#allocation17 + $0x64] sm:$0xf0]  ;;  %v3793_v24 = vor.u32 %v4428_v22, %v3792_v21 }
 0x4a4   : > { %3727 = vmatmul.msk.f32.vlgmr.msra.gmra.mxu0 %vm920_vm1, %v1256_v23  ;;  %v1524_v58 = vmul.f32 128.0, %v4801_v57  ;;  %vm1528_vm6 = vweird.f32 %v4801_v57  ;;  %v3817_v5 = vor.u32 %v4434_v3, %v3816_v2  ;;  %1670 = vmatpush.bf16.msra.mxu3 %v3813_v13  ;;  %v4427_v23 = vld [vmem:[#allocation17 + $0x34] sm:$0xf]  ;;  %v5796_v3 = vld [vmem:[%s5976_s22] sm:$0xf] }
 0x4a5   : > { %1425 = vmatpush.msrb.mxu0 %v1405_v25  ;;  %v3794_v25 = vld [vmem:[#allocation17 + $0x38] sm:$0xf0]  ;;  %v1550_v8 = vperm.slane %v5796_v3, 1  ;;  %v4446_v13 = vld [vmem:[#allocation20 + $0x48] sm:$0xff] }
 0x4a6   : > { %v1525_v59 = vsub.f32 1.0, %v1524_v58  ;;  %1656 = vmatpush.bf16.msra.mxu2 %v3817_v5  ;;  %v3797_v26 = vor.u32 %v4427_v23, %v3794_v25  ;;  %v1548_v5 = vperm.slane %v5796_v3, 0 }
 0x4a8   : > { %v1526_v60 = vmul.f32 %v4801_v57, %v1525_v59  ;;  %1671 = vmatpush.bf16.msra.mxu3 %v3805_v20  ;;  %v4440_v59 = vld [vmem:[#allocation20 + $0x18] sm:$0xff] }
 0x4aa   : > { %v1527_v61 = vadd.f32 %v4801_v57, %v1526_v60  ;;  %1657 = vmatpush.bf16.msra.mxu2 %v3809_v11  ;;  %v4448_v60 = vld [vmem:[#allocation20 + $0x58] sm:$0xff] }
 0x4ac   : > { %3733 = vmatmul.msk.f32.vlgmr.msrb.gmra.mxu0 %vm920_vm1, %v1403_v28  ;;  %v5785_v62 = vsel %vm1528_vm6, %v4801_v57, %v1527_v61  ;;  %1672 = vmatpush.bf16.msra.mxu3 %v3797_v26  ;;  %v3784_v28 = vld [vmem:[#allocation17 + $0x20] sm:$0xf] }
 0x4ae   : > { %1658 = vmatpush.bf16.msra.mxu2 %v3801_v18  ;;  %v1571_v18 = vperm.slane %v1568_v17, 0  ;;  %v3932_v17 = vld [vmem:[#allocation11 + $0x108] sm:$0xf] }
 0x4b2   : > { %1659 = vmatpush.bf16.msra.mxu2 %v3793_v24 }
 0x51f   : > { %v1354_v27 = vpop.f32.mrf.mxu2 }
 0x520   : > { %1358 = vrot.lane.b32.xlu0 %v1354_v27, %s5409_s5  ;;  %v4426_v27 = vld [vmem:[#allocation17 + $0x24] sm:$0xf0] }
 0x521   : > { %v1281_v29 = vpop.f32.mrf.mxu0 }
 0x522   : > { %1285 = vrot.lane.b32.xlu2 %v1281_v29, %s5407_s23  ;;  %v4425_v29 = vld [vmem:[#allocation17 + $0x24] sm:$0xf] }
 0x523   : > { %v3789_v32 = vor.u32 %v4425_v29, %v3786_v31  ;;  %v4781_v29 = vld [vmem:[#allocation22] ss:$0 sm:$0xff] }
 0x525   : > { %1673 = vmatpush.bf16.msra.mxu3 %v3789_v32 }
 0x529   : > { %v1427_v30 = vpop.f32.mrf.mxu0 }
 0x52a   : > { %1431 = vrot.lane.b32.xlu1 %v1427_v30, %s5408_s7  ;;  %v3785_v30 = vor.u32 %v4426_v27, %v3784_v28 }
 0x52c   : > { %1660 = vmatpush.bf16.msra.mxu2 %v3785_v30 }
 0x530   : > { %1661 = vmatpush.bf16.msra.mxu2 %v3777_v37 }
 0x57c   : > { %v1286_v38 = vpop.permute.xlu2 %1285 }
 0x57d   : > { %1289 = vst.msk [vmem:[#allocation2] sm:$0xff] %vm1288_vm3, %v1286_v38  ;;  %v3778_v38 = vld [vmem:[#allocation17 + $0x18] sm:$0xf0] }
 0x592   : > { %v1359_v41 = vpop.permute.xlu0 %1358 }
 0x593   : > { %1362 = vst.msk [vmem:[#allocation2] sm:$0xff] %vm1361_vm4, %v1359_v41  ;;  %v3781_v41 = vor.u32 %v4423_v35, %v3778_v38  ;;  %v3980_v38 = vld [vmem:[#allocation11 + $0x168] sm:$0xf] }
 0x595   : > { %1674 = vmatpush.bf16.msra.mxu3 %v3781_v41 }
 0x59c   : > { %v1432_v42 = vpop.permute.xlu1 %1431 }
 0x59d   : > { %1435 = vst.msk [vmem:[#allocation2] sm:$0xff] %vm1434_vm5, %v1432_v42  ;;  %v4421_v42 = vld [vmem:[#allocation17 + $0x4] sm:$0xf] }
 0x5a4   : > { %v1436_v43 = vld [vmem:[#allocation2] sm:$0xff] }
 0x5a5   : > { %v1454_v44 = vpack.c.bf16 %v1436_v43, %v1436_v43  ;;  %v3770_v43 = vld [vmem:[#allocation17 + $0x8] sm:$0xf0] }
 0x5a7   : > { %1514 = vmatmul.bf16.vlgmr.msra.gmra.mxu1 %v1454_v44  ;;  %v3769_v44 = vor.u32 %v4422_v40, %v3768_v39  ;;  %v4475_v39 = vld [vmem:[#allocation11 + $0x170] sm:$0xf0]  ;;  %v4474_v40 = vld [vmem:[#allocation11 + $0x16c] sm:$0xf] }
 0x5a8   : > { %v3981_v41 = vor.u32 %v4475_v39, %v3980_v38  ;;  %v3910_v39 = vld [vmem:[#allocation11 + $0xe4] sm:$0xf0] }
 0x5a9   : > { %1662 = vmatpush.bf16.msra.mxu2 %v3769_v44  ;;  %v4476_v44 = vld [vmem:[#allocation11 + $0x178] sm:$0xf0] }
 0x5ad   : > { %2039 = vmatpush.bf16.msrb.mxu2 %v3981_v41  ;;  %v4458_v41 = vld [vmem:[#allocation11 + $0xe8] sm:$0xf0] }
 0x624   : > { %v1515_v46 = vpop.f32.mrf.mxu1 }
 0x625   : > { %v1516_v47 = vadd.f32 %v4780_v45, %v1515_v46  ;;  %v3773_v45 = vor.u32 %v4421_v42, %v3770_v43  ;;  %v4444_v46 = vld [vmem:[#allocation20 + $0x38] sm:$0xff]  ;;  %v3982_v42 = vld [vmem:[#allocation11 + $0x174] sm:$0xf0]  ;;  %v3988_v43 = vld [vmem:[#allocation11 + $0x170] sm:$0xf] }
 0x626   : > { %1817 = vmatpush.bf16.msra.mxu0 %v4444_v46  ;;  %v3989_v46 = vor.u32 %v4476_v44, %v3988_v43  ;;  %v3896_v44 = vld [vmem:[#allocation11 + $0xc0] sm:$0xf] }
 0x627   : > { %v1520_v48 = vadd.f32 %v1516_v47, %v5732_v16  ;;  %1675 = vmatpush.bf16.msra.mxu3 %v3773_v45  ;;  %v4452_v47 = vld [vmem:[#allocation20 + $0x78] sm:$0xff]  ;;  %v3985_v45 = vor.u32 %v4474_v40, %v3982_v42  ;;  %v3916_v40 = vld [vmem:[#allocation11 + $0xe0] sm:$0xf] }
 0x628   : > { %1830 = vmatpush.bf16.msrb.mxu1 %v4452_v47  ;;  %v3917_v43 = vor.u32 %v4458_v41, %v3916_v40 }
 0x629   : > { %1521 = vadd.xlane.f32.xlu2 %v1520_v48 }
 0x62a   : > { %1818 = vmatpush.bf16.msra.mxu0 %v4443_v50 }
 0x62b   : > { %2052 = vmatpush.bf16.msrb.mxu3 %v3985_v45  ;;  %v4454_v45 = vld [vmem:[#allocation11 + $0xc8] sm:$0xf0] }
 0x62c   : > { %v1517_v49 = vpop.f32.mrf.mxu1  ;;  %1831 = vmatpush.bf16.msrb.mxu1 %v4451_v51  ;;  %v3968_v51 = vld [vmem:[#allocation11 + $0x150] sm:$0xf] }
 0x62e   : > { %1819 = vmatpush.bf16.msra.mxu0 %v4442_v53  ;;  %v4471_v53 = vld [vmem:[#allocation11 + $0x154] sm:$0xf] }
 0x630   : > { %1832 = vmatpush.bf16.msrb.mxu1 %v4450_v54 }
 0x632   : > { %1820 = vmatpush.bf16.msra.mxu0 %v4441_v55  ;;  %v3970_v55 = vld [vmem:[#allocation11 + $0x15c] sm:$0xf0] }
 0x634   : > { %1833 = vmatpush.bf16.msrb.mxu1 %v4449_v56  ;;  %v3976_v56 = vld [vmem:[#allocation11 + $0x158] sm:$0xf] }
 0x636   : > { %1821 = vmatpush.bf16.msra.mxu0 %v4440_v59 }
 0x638   : > { %1834 = vmatpush.bf16.msrb.mxu1 %v4448_v60  ;;  %v3956_v60 = vld [vmem:[#allocation11 + $0x138] sm:$0xf] }
 0x69c   : > { %v1522_v16 = vpop.xlane.xlu2 %1521 }
 0x69d   : > { %v1530_v63 = vmul.f32 %v5785_v62, %v1522_v16 }
 0x69f   : > { %v5788_v0 = vsub.f32 %v1520_v48, %v1530_v63  ;;  %v4439_v63 = vld [vmem:[#allocation20 + $0x10] sm:$0xff] }
 0x6a0   : > { %1822 = vmatpush.bf16.msra.mxu0 %v4439_v63 }
 0x6a1   : > { %v1532_v1 = vmul.f32 %v5788_v0, %v5788_v0 }
 0x6a3   : > { %1533 = vadd.xlane.f32.xlu0 %v1532_v1  ;;  %v4447_v1 = vld [vmem:[#allocation20 + $0x50] sm:$0xff] }
 0x6a4   : > { %1835 = vmatpush.bf16.msrb.mxu1 %v4447_v1  ;;  %1823 = vmatpush.bf16.msra.mxu0 %v4438_v12  ;;  %v3958_v1 = vld [vmem:[#allocation11 + $0x144] sm:$0xf0] }
 0x6a5   : > { %v3952_v12 = vld [vmem:[#allocation11 + $0x128] sm:$0xf] }
 0x6a8   : > { %1836 = vmatpush.bf16.msrb.mxu1 %v4446_v13  ;;  %1824 = vmatpush.bf16.msra.mxu0 %v4437_v14  ;;  %v4467_v13 = vld [vmem:[#allocation11 + $0x130] sm:$0xf0] }
 0x6ac   : > { %1837 = vmatpush.bf16.msrb.mxu1 %v4445_v15  ;;  %2065 = vmatpush.bf16.msrb.mxu0 %v3989_v46  ;;  %v3953_v15 = vor.u32 %v4467_v13, %v3952_v12  ;;  %v4453_v46 = vld [vmem:[#allocation11 + $0xc4] sm:$0xf] }
 0x716   : > { %v1534_v48 = vpop.xlane.xlu0 %1533 }
 0x717   : > { %v1535_v49 = vmul.f32 %v1534_v48, %v5785_v62 }
 0x719   : > { %v1536_v52 = vadd.f32 1e-05, %v1535_v49 }
 0x71b   : > { %4802 = vrsqrt.f32 %v1536_v52  ;;  %vm1543_vm8 = vweird.f32 %v1536_v52 }
 0x721   : > { %v4803_v57 = vpop.eup %4802 }
 0x722   : > { %v1538_v58 = vmul.f32 %v4803_v57, %v1536_v52  ;;  %vm1544_vm7 = vweird.f32 %v4803_v57  ;;  %v4472_v52 = vld [vmem:[#allocation11 + $0x158] sm:$0xf0] }
 0x723   : > { %vm1545_vm9 = vmor %vm1543_vm8, %vm1544_vm7  ;;  %v3969_v54 = vor.u32 %v4472_v52, %v3968_v51  ;;  %v4455_v51 = vld [vmem:[#allocation11 + $0xd0] sm:$0xf0] }
 0x724   : > { %v1539_v61 = vmul.f32 %v4803_v57, %v1538_v58  ;;  %v3973_v58 = vor.u32 %v4471_v53, %v3970_v55 }
 0x725   : > { %2040 = vmatpush.bf16.msrb.mxu2 %v3969_v54 }
 0x726   : > { %v1540_v16 = vmul.f32 0.5, %v1539_v61  ;;  %2053 = vmatpush.bf16.msrb.mxu3 %v3973_v58  ;;  %v4469_v61 = vld [vmem:[#allocation11 + $0x140] sm:$0xf0] }
 0x727   : > { %v3957_v63 = vor.u32 %v4469_v61, %v3956_v60 }
 0x728   : > { %v1541_v2 = vsub.f32 1.5, %v1540_v16  ;;  %v4468_v16 = vld [vmem:[#allocation11 + $0x13c] sm:$0xf] }
 0x729   : > { %2041 = vmatpush.bf16.msrb.mxu2 %v3957_v63  ;;  %v1864_v63 = vperm.slane %v5796_v3, 2 }
 0x72a   : > { %v1542_v4 = vmul.f32 %v4803_v57, %v1541_v2  ;;  %v3964_v2 = vld [vmem:[#allocation11 + $0x140] sm:$0xf] }
 0x72c   : > { %v1546_v6 = vsel %vm1545_vm9, %v4803_v57, %v1542_v4  ;;  %v4473_v57 = vld [vmem:[#allocation11 + $0x160] sm:$0xf0]  ;;  %v4470_v4 = vld [vmem:[#allocation11 + $0x148] sm:$0xf0] }
 0x72d   : > { %v1547_v7 = vmul.f32 %v1546_v6, %v5788_v0  ;;  %v3977_v59 = vor.u32 %v4473_v57, %v3976_v56  ;;  %v3965_v6 = vor.u32 %v4470_v4, %v3964_v2  ;;  %v1866_v4 = vperm.slane %v5796_v3, 3 }
 0x72f   : > { %v1549_v9 = vmul.f32 %v1548_v5, %v1547_v7  ;;  %2066 = vmatpush.bf16.msrb.mxu0 %v3977_v59  ;;  %v3961_v5 = vor.u32 %v4468_v16, %v3958_v1  ;;  %v3944_v7 = vld [vmem:[#allocation11 + $0x120] sm:$0xf] }
 0x731   : > { %v1551_v10 = vadd.f32 %v1550_v8, %v1549_v9  ;;  %2054 = vmatpush.bf16.msrb.mxu3 %v3961_v5  ;;  %v4466_v8 = vld [vmem:[#allocation11 + $0x128] sm:$0xf0]  ;;  %v4465_v9 = vld [vmem:[#allocation11 + $0x124] sm:$0xf] }
 0x733   : > { %v1569_v11 = vpack.c.bf16 %v1551_v10, %v1551_v10  ;;  %2067 = vmatpush.bf16.msrb.mxu0 %v3965_v6 }
 0x735   : > { %1663 = vmatmul.bf16.vlgmr.msra.gmra.mxu2 %v1569_v11  ;;  %1676 = vmatmul.bf16.vlgmr.msra.gmra.mxu3 %v1569_v11  ;;  %v3946_v11 = vld [vmem:[#allocation11 + $0x12c] sm:$0xf0] }
 0x736   : > { %v3949_v14 = vor.u32 %v4465_v9, %v3946_v11 }
 0x737   : > { %2068 = vmatpush.bf16.msrb.mxu0 %v3953_v15 }
 0x738   : > { %2055 = vmatpush.bf16.msrb.mxu3 %v3949_v14 }
 0x7b8   : > { %v1664_v20 = vpop.f32.mrf.mxu2  ;;  %v1677_v0 = vpop.f32.mrf.mxu3 }
 0x7b9   : > { %v1665_v21 = vadd.f32 %v1664_v20, %v1571_v18  ;;  %v1678_v22 = vadd.f32 %v1677_v0, %v1572_v19  ;;  %v4463_v18 = vld [vmem:[#allocation11 + $0x110] sm:$0xf0]  ;;  %v4462_v19 = vld [vmem:[#allocation11 + $0x10c] sm:$0xf]  ;;  %v3934_v0 = vld [vmem:[#allocation11 + $0x114] sm:$0xf0] }
 0x7ba   : > { %v3933_v20 = vor.u32 %v4463_v18, %v3932_v17 }
 0x7bb   : > { %v1681_v23 = vmax.f32 %v1665_v21, 0.0  ;;  %v1682_v24 = vmax.f32 %v1678_v22, 0.0  ;;  %v3940_v21 = vld [vmem:[#allocation11 + $0x110] sm:$0xf]  ;;  %v4464_v22 = vld [vmem:[#allocation11 + $0x118] sm:$0xf0] }
 0x7bd   : > { %v1716_v25 = vpack.c.bf16 %v1681_v23, %v1681_v23  ;;  %v1717_v26 = vpack.c.bf16 %v1682_v24, %v1682_v24  ;;  %v3937_v23 = vor.u32 %v4462_v19, %v3934_v0  ;;  %v3941_v24 = vor.u32 %v4464_v22, %v3940_v21 }
 0x7bf   : > { %1825 = vmatmul.bf16.vlgmr.msra.gmra.mxu0 %v1716_v25  ;;  %1838 = vmatmul.bf16.vlgmr.msrb.gmra.mxu1 %v1717_v26  ;;  %v3920_v25 = vld [vmem:[#allocation11 + $0xf0] sm:$0xf]  ;;  %v4460_v26 = vld [vmem:[#allocation11 + $0xf8] sm:$0xf0] }
 0x7c0   : > { %v1666_v28 = vpop.f32.mrf.mxu2  ;;  %v1679_v27 = vpop.f32.mrf.mxu3  ;;  %2056 = vmatpush.bf16.msrb.mxu3 %v3937_v23  ;;  %2069 = vmatpush.bf16.msrb.mxu0 %v3941_v24 }
 0x7c1   : > { %v4459_v28 = vld [vmem:[#allocation11 + $0xf4] sm:$0xf]  ;;  %v3921_v27 = vor.u32 %v4460_v26, %v3920_v25 }
 0x83c   : > { %v1826_v30 = vpop.f32.mrf.mxu0  ;;  %v1839_v31 = vpop.f32.mrf.mxu1 }
 0x83d   : > { %v1827_v32 = vadd.f32 %v4781_v29, %v1826_v30  ;;  %v3922_v29 = vld [vmem:[#allocation11 + $0xfc] sm:$0xf0]  ;;  %v3928_v30 = vld [vmem:[#allocation11 + $0xf8] sm:$0xf] }
 0x83f   : > { %v1840_v33 = vadd.f32 %v1839_v31, %v1827_v32  ;;  %v4461_v31 = vld [vmem:[#allocation11 + $0x100] sm:$0xf0]  ;;  %v3925_v32 = vor.u32 %v4459_v28, %v3922_v29 }
 0x841   : > { %v1843_v34 = vadd.f32 %v1840_v33, %v1551_v10  ;;  %v3945_v10 = vor.u32 %v4466_v8, %v3944_v7  ;;  %v3929_v33 = vor.u32 %v4461_v31, %v3928_v30  ;;  %2057 = vmatpush.bf16.msrb.mxu3 %v3925_v32  ;;  %v1902_v8 = vld [vmem:[#allocation13 + $0x3] sm:$0x7] }
 0x842   : > { %v1907_v9 = vperm.slane %v1902_v8, 2  ;;  %v1905_v12 = vperm.slane %v1902_v8, 0  ;;  %v1906_v13 = vperm.slane %v1902_v8, 1 }
 0x843   : > { %1844 = vadd.xlane.f32.xlu1 %v1843_v34  ;;  %2042 = vmatpush.bf16.msrb.mxu2 %v3945_v10 }
 0x844   : > { %v1828_v35 = vpop.f32.mrf.mxu0  ;;  %v1841_v37 = vpop.f32.mrf.mxu1  ;;  %2070 = vmatpush.bf16.msrb.mxu0 %v3929_v33 }
 0x845   : > { %v4457_v35 = vld [vmem:[#allocation11 + $0xe0] sm:$0xf0]  ;;  %v4456_v37 = vld [vmem:[#allocation11 + $0xdc] sm:$0xf] }
 0x846   : > { %v3913_v42 = vor.u32 %v4456_v37, %v3910_v39 }
 0x847   : > { %2043 = vmatpush.bf16.msrb.mxu2 %v3933_v20 }
 0x848   : > { %2058 = vmatpush.bf16.msrb.mxu3 %v3913_v42  ;;  %2071 = vmatpush.bf16.msrb.mxu0 %v3917_v43 }
 0x84b   : > { %2044 = vmatpush.bf16.msrb.mxu2 %v3921_v27 }
 0x8b6   : > { %v1845_v47 = vpop.xlane.xlu1 %1844 }
 0x8b7   : > { %v1846_v48 = vmul.f32 %v1845_v47, %v5785_v62  ;;  %v3897_v47 = vor.u32 %v4454_v45, %v3896_v44 }
 0x8b9   : > { %v5802_v49 = vsub.f32 %v1843_v34, %v1846_v48  ;;  %v3908_v34 = vld [vmem:[#allocation11 + $0xd8] sm:$0xf]  ;;  %v3898_v48 = vld [vmem:[#allocation11 + $0xcc] sm:$0xf0] }
 0x8ba   : > { %v3909_v38 = vor.u32 %v4457_v35, %v3908_v34  ;;  %v3901_v52 = vor.u32 %v4453_v46, %v3898_v48 }
 0x8bb   : > { %v1848_v50 = vmul.f32 %v5802_v49, %v5802_v49 }
 0x8bc   : > { %2045 = vmatpush.bf16.msrb.mxu2 %v3909_v38  ;;  %2059 = vmatpush.bf16.msrb.mxu3 %v3901_v52 }
 0x8bd   : > { %1849 = vadd.xlane.f32.xlu2 %v1848_v50  ;;  %v3904_v50 = vld [vmem:[#allocation11 + $0xc8] sm:$0xf] }
 0x8be   : > { %v3905_v53 = vor.u32 %v4455_v51, %v3904_v50 }
 0x8c0   : > { %2046 = vmatpush.bf16.msrb.mxu2 %v3897_v47  ;;  %2072 = vmatpush.bf16.msrb.mxu0 %v3905_v53 }
 0x930   : > { %v1850_v54 = vpop.xlane.xlu2 %1849 }
 0x931   : > { %v1851_v55 = vmul.f32 %v1850_v54, %v5785_v62 }
 0x933   : > { %v1852_v56 = vadd.f32 1e-05, %v1851_v55 }
 0x935   : > { %4804 = vrsqrt.f32 %v1852_v56  ;;  %vm1859_vm11 = vweird.f32 %v1852_v56 }
 0x93b   : > { %v4805_v57 = vpop.eup %4804 }
 0x93c   : > { %v1854_v58 = vmul.f32 %v4805_v57, %v1852_v56  ;;  %vm1860_vm10 = vweird.f32 %v4805_v57 }
 0x93d   : > { %vm1861_vm12 = vmor %vm1859_vm11, %vm1860_vm10 }
 0x93e   : > { %v1855_v59 = vmul.f32 %v4805_v57, %v1854_v58 }
 0x940   : > { %v1856_v60 = vmul.f32 0.5, %v1855_v59 }
 0x942   : > { %v1857_v61 = vsub.f32 1.5, %v1856_v60 }
 0x944   : > { %v1858_v16 = vmul.f32 %v4805_v57, %v1857_v61 }
 0x946   : > { %v1862_v1 = vsel %vm1861_vm12, %v4805_v57, %v1858_v16 }
 0x947   : > { %v1863_v2 = vmul.f32 %v1862_v1, %v5802_v49 }
 0x949   : > { %v1865_v5 = vmul.f32 %v1864_v63, %v1863_v2 }
 0x94b   : > { %v5810_v6 = vadd.f32 %v1866_v4, %v1865_v5 }
 0x94d   : > { %v1903_v7 = vpack.c.bf16 %v5810_v6, %v5810_v6 }
 0x94f   : > { %2047 = vmatmul.bf16.vlgmr.msrb.gmra.mxu2 %v1903_v7  ;;  %2060 = vmatmul.bf16.vlgmr.msrb.gmra.mxu3 %v1903_v7 }
 0x950   : > { %2073 = vmatmul.bf16.vlgmr.msrb.gmra.mxu0 %v1903_v7 }
 0x9cd   : > { %v2074_v10 = vpop.f32.mrf.mxu0 }
 0x9ce   : > { %v5814_v11 = vadd.f32 %v2074_v10, %v1907_v9 }
 0x9d0   : > { %2135 = vmatpush.msra.mxu2 %v5814_v11 }
 0x9d2   : > { %v2048_v49 = vpop.f32.mrf.mxu2  ;;  %v2061_v3 = vpop.f32.mrf.mxu3 }
 0x9d3   : > { %v2049_v14 = vadd.f32 %v2048_v49, %v1905_v12  ;;  %v2062_v15 = vadd.f32 %v2061_v3, %v1906_v13 }
 0x9d5   : > { %v2076_v17 = vpop.f32.mrf.mxu0  ;;  %2216 = vrot.lane.b32.xlu2 %v2062_v15, %s5409_s5  ;;  %2143 = vrot.lane.b32.xlu0 %v2062_v15, %s5408_s7 }
 0x9d6   : > { %3990 = vmatpush.xpose.msk.msra.mxu1 %vm1152_vm2, %v2062_v15  ;;  %2141 = vrot.lane.b32.xlu1 %v2049_v14, %s5408_s7 }
 0x9d9   : > { %3991 = vmatmul.msk.f32.vlgmr.msra.gmra.mxu1 %vm1152_vm2, %v2049_v14 }
 0x9da   : > { %v2050_v18 = vpop.f32.mrf.mxu2  ;;  %v2063_v19 = vpop.f32.mrf.mxu3 }
 0x9db   : > { %v4484_v19 = vld [vmem:[#allocation14 + $0x78] sm:$0xff] }
 0x9dd   : > { %2288 = vrot.lane.b32.xlu0 %v2062_v15, %s5407_s23 }
 0x9de   : > { %2214 = vrot.lane.b32.xlu1 %v2049_v14, %s5409_s5 }
 0x9e5   : > { %2286 = vrot.lane.b32.xlu0 %v2049_v14, %s5407_s23 }
 0xa2f   : > { %v2217_v20 = vpop.permute.xlu2 %2216 }
 0xa30   : > { %3996 = vmatpush.xpose.msk.msrb.mxu1 %vm1152_vm2, %v2217_v20  ;;  %v4483_v20 = vld [vmem:[#allocation14 + $0x70] sm:$0xff] }
 0xa34   : > { %2430 = vmatpush.bf16.msra.mxu1 %v4484_v19  ;;  %v4037_v19 = vld [vmem:[#allocation17 + $0x80] sm:$0xf] }
 0xa38   : > { %2431 = vmatpush.bf16.msra.mxu1 %v4483_v20  ;;  %v4486_v20 = vld [vmem:[#allocation17 + $0x84] sm:$0xf0] }
 0xa47   : > { %v2144_v0 = vpop.permute.xlu0 %2143 }
 0xa48   : > { %v2142_v21 = vpop.permute.xlu1 %2141  ;;  %3993 = vmatpush.xpose.msk.msra.mxu3 %vm1152_vm2, %v2144_v0  ;;  %v4482_v0 = vld [vmem:[#allocation14 + $0x68] sm:$0xff] }
 0xa49   : > { %2432 = vmatpush.bf16.msra.mxu1 %v4482_v0 }
 0xa4b   : > { %3994 = vmatmul.msk.f32.vlgmr.msra.gmra.mxu3 %vm1152_vm2, %v2142_v21  ;;  %v4481_v21 = vld [vmem:[#allocation14 + $0x60] sm:$0xff] }
 0xa4d   : > { %2433 = vmatpush.bf16.msra.mxu1 %v4481_v21  ;;  %v4485_v21 = vld [vmem:[#allocation17 + $0x84] sm:$0xf] }
 0xa4f   : > { %v2289_v22 = vpop.permute.xlu0 %2288 }
 0xa50   : > { %v2215_v23 = vpop.permute.xlu1 %2214  ;;  %3999 = vmatpush.xpose.msk.msrb.mxu3 %vm1152_vm2, %v2289_v22  ;;  %v4480_v22 = vld [vmem:[#allocation14 + $0x58] sm:$0xff] }
 0xa51   : > { %3997 = vmatmul.msk.f32.vlgmr.msrb.gmra.mxu1 %vm1152_vm2, %v2215_v23  ;;  %v4479_v23 = vld [vmem:[#allocation14 + $0x50] sm:$0xff] }
 0xa52   : > { %2434 = vmatpush.bf16.msra.mxu1 %v4480_v22  ;;  %v4039_v22 = vld [vmem:[#allocation17 + $0x88] sm:$0xf0] }
 0xa56   : > { %v2101_v24 = vpop.f32.mrf.mxu1  ;;  %2435 = vmatpush.bf16.msra.mxu1 %v4479_v23  ;;  %v4038_v23 = vor.u32 %v4486_v20, %v4037_v19 }
 0xa57   : > { %v2104_v25 = vmul.f32 0.17677669, %v2101_v24  ;;  %v2287_v26 = vpop.permute.xlu0 %2286  ;;  %v4478_v24 = vld [vmem:[#allocation14 + $0x48] sm:$0xff] }
 0xa58   : > { %4000 = vmatmul.msk.f32.vlgmr.msrb.gmra.mxu3 %vm1152_vm2, %v2287_v26 }
 0xa59   : > { %v2105_v28 = vadd.f32 %v2104_v25, %v5749_v36  ;;  %v4477_v25 = vld [vmem:[#allocation14 + $0x40] sm:$0xff] }
 0xa5a   : > { %2436 = vmatpush.bf16.msra.mxu1 %v4478_v24  ;;  %v4042_v24 = vor.u32 %v4485_v21, %v4039_v22 }
 0xa5b   : > { %v2106_v27 = vsel %vm920_vm1, %v2105_v28, -inf }
 0xa5c   : > { %2107 = vmax.xlane.f32.xlu2 %v2106_v27 }
 0xa5e   : > { %2437 = vmatpush.bf16.msra.mxu1 %v4477_v25  ;;  %v4508_v25 = vld [vmem:[#allocation20 + $0xb8] sm:$0xff] }
 0xace   : > { %v2239_v29 = vpop.f32.mrf.mxu1  ;;  %v2166_v30 = vpop.f32.mrf.mxu3 }
 0xacf   : > { %v2242_v31 = vmul.f32 0.17677669, %v2239_v29  ;;  %v2169_v32 = vmul.f32 0.17677669, %v2166_v30  ;;  %v2108_v33 = vpop.xlane.xlu2 %2107 }
 0xad0   : > { %v2109_v34 = vsub.f32 %v2105_v28, %v2108_v33 }
 0xad1   : > { %v2243_v35 = vadd.f32 %v2242_v31, %v5749_v36  ;;  %v2170_v37 = vadd.f32 %v2169_v32, %v5749_v36  ;;  %v4782_v31 = vld [vmem:[#allocation16 + $0x1] ss:$0 sm:$0xff] }
 0xad2   : > { %v2110_v38 = vmul.f32 1.442695, %v2109_v34 }
 0xad3   : > { %v2244_v39 = vsel %vm920_vm1, %v2243_v35, -inf  ;;  %v2171_v40 = vsel %vm920_vm1, %v2170_v37, -inf }
 0xad4   : > { %4806 = vpow2.f32 %v2110_v38  ;;  %2245 = vmax.xlane.f32.xlu0 %v2244_v39  ;;  %2172 = vmax.xlane.f32.xlu1 %v2171_v40  ;;  %v4500_v38 = vld [vmem:[#allocation17 + $0xf4] sm:$0xf0]  ;;  %v4499_v39 = vld [vmem:[#allocation17 + $0xf4] sm:$0xf] }
 0xada   : > { %v4807_v41 = vpop.eup %4806 }
 0xadb   : > { %v2311_v42 = vpop.f32.mrf.mxu3  ;;  %v2112_v43 = vsel %vm920_vm1, %v4807_v41, 0.0 }
 0xadc   : > { %v2314_v44 = vmul.f32 0.17677669, %v2311_v42  ;;  %2113 = vadd.xlane.f32.xlu1 %v2112_v43 }
 0xade   : > { %v2315_v45 = vadd.f32 %v2314_v44, %v5749_v36 }
 0xae0   : > { %v2316_v46 = vsel %vm920_vm1, %v2315_v45, -inf }
 0xae1   : > { %2317 = vmax.xlane.f32.xlu2 %v2316_v46 }
 0xb47   : > { %v2246_v47 = vpop.xlane.xlu0 %2245  ;;  %v2173_v48 = vpop.xlane.xlu1 %2172 }
 0xb48   : > { %v2247_v50 = vsub.f32 %v2243_v35, %v2246_v47  ;;  %v2174_v51 = vsub.f32 %v2170_v37, %v2173_v48  ;;  %v4093_v37 = vld [vmem:[#allocation17 + $0xf0] sm:$0xf]  ;;  %v4498_v47 = vld [vmem:[#allocation17 + $0xe4] sm:$0xf0]  ;;  %v4497_v48 = vld [vmem:[#allocation17 + $0xe4] sm:$0xf] }
 0xb49   : > { %v4094_v40 = vor.u32 %v4500_v38, %v4093_v37 }
 0xb4a   : > { %v2248_v52 = vmul.f32 1.442695, %v2247_v50  ;;  %v2175_v53 = vmul.f32 1.442695, %v2174_v51  ;;  %v4087_v51 = vld [vmem:[#allocation17 + $0xe8] sm:$0xf0] }
 0xb4c   : > { %4808 = vpow2.f32 %v2248_v52  ;;  %v4090_v52 = vor.u32 %v4497_v48, %v4087_v51 }
 0xb4d   : > { %4810 = vpow2.f32 %v2175_v53  ;;  %v4077_v53 = vld [vmem:[#allocation17 + $0xd0] sm:$0xf] }
 0xb4f   : > { %v2114_v54 = vpop.xlane.xlu1 %2113 }
 0xb50   : > { %4812 = vrcp.f32 %v2114_v54  ;;  %v4496_v54 = vld [vmem:[#allocation17 + $0xd4] sm:$0xf0] }
 0xb52   : > { %v4809_v55 = vpop.eup %4808 }
 0xb53   : > { %v4811_v56 = vpop.eup %4810  ;;  %v2250_v57 = vsel %vm920_vm1, %v4809_v55, 0.0 }
 0xb54   : > { %2251 = vadd.xlane.f32.xlu2 %v2250_v57  ;;  %v2177_v36 = vsel %vm920_vm1, %v4811_v56, 0.0  ;;  %v2318_v58 = vpop.xlane.xlu2 %2317  ;;  %v4079_v57 = vld [vmem:[#allocation17 + $0xd8] sm:$0xf0] }
 0xb55   : > { %2178 = vadd.xlane.f32.xlu0 %v2177_v36  ;;  %v2319_v59 = vsub.f32 %v2315_v45, %v2318_v58  ;;  %v4069_v58 = vld [vmem:[#allocation17 + $0xc0] sm:$0xf] }
 0xb56   : > { %v4813_v60 = vpop.eup %4812 }
 0xb57   : > { %v2116_v61 = vmul.f32 %v4813_v60, %v4807_v41  ;;  %v2320_v16 = vmul.f32 1.442695, %v2319_v59  ;;  %v4095_v41 = vld [vmem:[#allocation17 + $0xf8] sm:$0xf0]  ;;  %v4494_v59 = vld [vmem:[#allocation17 + $0xc4] sm:$0xf0] }
 0xb58   : > { %v4098_v42 = vor.u32 %v4499_v39, %v4095_v41  ;;  %v4493_v60 = vld [vmem:[#allocation17 + $0xc4] sm:$0xf]  ;;  %v4504_v39 = vld [vmem:[#allocation20 + $0x98] sm:$0xff] }
 0xb59   : > { %4814 = vpow2.f32 %v2320_v16  ;;  %3992 = vmatmul.msk.f32.vlgmr.msra.gmra.mxu2 %vm920_vm1, %v2116_v61  ;;  %v4070_v61 = vor.u32 %v4494_v59, %v4069_v58  ;;  %v4071_v16 = vld [vmem:[#allocation17 + $0xc8] sm:$0xf0]  ;;  %v4509_v58 = vld [vmem:[#allocation20 + $0xc0] sm:$0xff]  ;;  %v2488_v59 = vld [vmem:[#allocation19 + $0x2] sm:$0x3] }
 0xb5a   : > { %2588 = vmatpush.bf16.msra.mxu3 %v4098_v42 }
 0xb5e   : > { %2589 = vmatpush.bf16.msra.mxu3 %v4090_v52 }
 0xb5f   : > { %v4815_v63 = vpop.eup %4814 }
 0xb60   : > { %v2322_v1 = vsel %vm920_vm1, %v4815_v63, 0.0 }
 0xb61   : > { %2323 = vadd.xlane.f32.xlu1 %v2322_v1  ;;  %v4061_v1 = vld [vmem:[#allocation17 + $0xb0] sm:$0xf] }
 0xb69   : > { %2183 = vrot.lane.b32.xlu0 %v5814_v11, %s5408_s7 }
 0xb6c   : > { %2255 = vrot.lane.b32.xlu2 %v5814_v11, %s5409_s5 }
 0xb7a   : > { %2327 = vrot.lane.b32.xlu1 %v5814_v11, %s5407_s23 }
 0xbc7   : > { %v2252_v2 = vpop.xlane.xlu2 %2251 }
 0xbc8   : > { %4816 = vrcp.f32 %v2252_v2  ;;  %v2179_v7 = vpop.xlane.xlu0 %2178  ;;  %v4492_v2 = vld [vmem:[#allocation17 + $0xb4] sm:$0xf0] }
 0xbc9   : > { %4818 = vrcp.f32 %v2179_v7  ;;  %v4063_v7 = vld [vmem:[#allocation17 + $0xb8] sm:$0xf0] }
 0xbce   : > { %v4817_v4 = vpop.eup %4816 }
 0xbcf   : > { %v2254_v5 = vmul.f32 %v4817_v4, %v4809_v55  ;;  %v2256_v8 = vpop.permute.xlu2 %2255  ;;  %v4819_v9 = vpop.eup %4818  ;;  %v4495_v55 = vld [vmem:[#allocation17 + $0xd4] sm:$0xf] }
 0xbd0   : > { %2276 = vmatpush.msrb.mxu2 %v2256_v8  ;;  %v2181_v10 = vmul.f32 %v4819_v9, %v4811_v56  ;;  %v4078_v56 = vor.u32 %v4496_v54, %v4077_v53  ;;  %v4082_v36 = vor.u32 %v4495_v55, %v4079_v57  ;;  %v4491_v4 = vld [vmem:[#allocation17 + $0xb4] sm:$0xf]  ;;  %v4053_v9 = vld [vmem:[#allocation17 + $0xa0] sm:$0xf]  ;;  %v4510_v57 = vld [vmem:[#allocation20 + $0xc8] sm:$0xff] }
 0xbd1   : > { %3998 = vmatmul.msk.f32.vlgmr.msrb.gmra.mxu2 %vm920_vm1, %v2254_v5  ;;  %v4062_v5 = vor.u32 %v4492_v2, %v4061_v1  ;;  %v4066_v8 = vor.u32 %v4491_v4, %v4063_v7 }
 0xbd2   : > { %2575 = vmatpush.bf16.msra.mxu2 %v4094_v40  ;;  %2590 = vmatpush.bf16.msra.mxu3 %v4082_v36  ;;  %v4512_v40 = vld [vmem:[#allocation20 + $0xd8] sm:$0xff]  ;;  %v4501_v36 = vld [vmem:[#allocation20 + $0x80] sm:$0xff] }
 0xbd4   : > { %v2324_v11 = vpop.xlane.xlu1 %2323 }
 0xbd5   : > { %4820 = vrcp.f32 %v2324_v11  ;;  %v4055_v11 = vld [vmem:[#allocation17 + $0xa8] sm:$0xf0] }
 0xbdb   : > { %v2184_v12 = vpop.permute.xlu0 %2183  ;;  %v4821_v49 = vpop.eup %4820 }
 0xbdc   : > { %2204 = vmatpush.msra.mxu0 %v2184_v12  ;;  %v2137_v13 = vpop.f32.mrf.mxu2  ;;  %v2326_v3 = vmul.f32 %v4821_v49, %v4815_v63  ;;  %v4074_v63 = vor.u32 %v4493_v60, %v4071_v16  ;;  %v4489_v12 = vld [vmem:[#allocation17 + $0xa4] sm:$0xf]  ;;  %v2491_v60 = vperm.slane %v2488_v59, 0 }
 0xbdd   : > { %2140 = vst.msk [vmem:[#allocation2] sm:$0xff] %vm1152_vm2, %v2137_v13  ;;  %3995 = vmatmul.msk.f32.vlgmr.msra.gmra.mxu0 %vm920_vm1, %v2181_v10  ;;  %v4490_v10 = vld [vmem:[#allocation17 + $0xa4] sm:$0xf0]  ;;  %v4058_v49 = vor.u32 %v4489_v12, %v4055_v11 }
 0xbde   : > { %2591 = vmatpush.bf16.msra.mxu3 %v4074_v63  ;;  %v4054_v13 = vor.u32 %v4490_v10, %v4053_v9  ;;  %v4783_v10 = vld [vmem:[#allocation22 + $0x1] ss:$0 sm:$0xff] }
 0xbe2   : > { %2592 = vmatpush.bf16.msra.mxu3 %v4066_v8 }
 0xbe6   : > { %2593 = vmatpush.bf16.msra.mxu3 %v4058_v49 }
 0xbec   : > { %v2328_v14 = vpop.permute.xlu1 %2327 }
 0xbed   : > { %2348 = vmatpush.msrb.mxu0 %v2328_v14  ;;  %v4488_v14 = vld [vmem:[#allocation17 + $0x94] sm:$0xf0] }
 0xbee   : > { %4001 = vmatmul.msk.f32.vlgmr.msrb.gmra.mxu0 %vm920_vm1, %v2326_v3  ;;  %v4045_v3 = vld [vmem:[#allocation17 + $0x90] sm:$0xf] }
 0xbef   : > { %2739 = vmatpush.bf16.msra.mxu0 %v4508_v25 }
 0xc54   : > { %v2278_v15 = vpop.f32.mrf.mxu2 }
 0xc55   : > { %2282 = vrot.lane.b32.xlu2 %v2278_v15, %s5409_s5  ;;  %v4487_v15 = vld [vmem:[#allocation17 + $0x94] sm:$0xf] }
 0xc5a   : > { %v2206_v17 = vpop.f32.mrf.mxu0 }
 0xc5b   : > { %2210 = vrot.lane.b32.xlu0 %v2206_v17, %s5407_s23  ;;  %v4046_v17 = vor.u32 %v4488_v14, %v4045_v3  ;;  %s5979_s23 = sld [smem:[#allocation48_spill]] }
 0xc6b   : > { %v2350_v18 = vpop.f32.mrf.mxu0 }
 0xc6c   : > { %2354 = vrot.lane.b32.xlu0 %v2350_v18, %s5408_s7  ;;  %v4047_v18 = vld [vmem:[#allocation17 + $0x98] sm:$0xf0] }
 0xc6d   : > { %v4050_v0 = vor.u32 %v4487_v15, %v4047_v18 }
 0xc6f   : > { %2594 = vmatpush.bf16.msra.mxu3 %v4050_v0 }
 0xc73   : > { %2595 = vmatpush.bf16.msra.mxu3 %v4042_v24 }
 0xcaf   : > { %v2283_v28 = vpop.permute.xlu2 %2282 }
 0xccd   : > { %v2211_v26 = vpop.permute.xlu0 %2210 }
 0xcce   : > { %2213 = vst.msk [vmem:[#allocation2] sm:$0xff] %vm1288_vm3, %v2211_v26  ;;  %v4516_v26 = vld [vmem:[#allocation20 + $0xf8] sm:$0xff]  ;;  %vm2791_vm3 = vcmask 1047559  }
 0xccf   : > { %2285 = vst.msk [vmem:[#allocation2] sm:$0xff] %vm1361_vm4, %v2283_v28  ;;  %2752 = vmatpush.bf16.msrb.mxu1 %v4516_v26 }
 0xcde   : > { %v2355_v27 = vpop.permute.xlu0 %2354 }
 0xcdf   : > { %2357 = vst.msk [vmem:[#allocation2] sm:$0xff] %vm1434_vm5, %v2355_v27 }
 0xce6   : > { %v2358_v29 = vld [vmem:[#allocation2] sm:$0xff] }
 0xce7   : > { %v2378_v30 = vpack.c.bf16 %v2358_v29, %v2358_v29  ;;  %v4507_v29 = vld [vmem:[#allocation20 + $0xb0] sm:$0xff] }
 0xce8   : > { %2740 = vmatpush.bf16.msra.mxu0 %v4507_v29 }
 0xce9   : > { %2438 = vmatmul.bf16.vlgmr.msra.gmra.mxu1 %v2378_v30  ;;  %v4515_v30 = vld [vmem:[#allocation20 + $0xf0] sm:$0xff] }
 0xcea   : > { %2753 = vmatpush.bf16.msrb.mxu1 %v4515_v30 }
 0xd66   : > { %v2439_v32 = vpop.f32.mrf.mxu1 }
 0xd67   : > { %v2440_v33 = vadd.f32 %v4782_v31, %v2439_v32  ;;  %v4506_v32 = vld [vmem:[#allocation20 + $0xa8] sm:$0xff] }
 0xd68   : > { %2741 = vmatpush.bf16.msra.mxu0 %v4506_v32 }
 0xd69   : > { %v2445_v34 = vadd.f32 %v2440_v33, %v5810_v6  ;;  %v4085_v6 = vld [vmem:[#allocation17 + $0xe0] sm:$0xf]  ;;  %v4514_v33 = vld [vmem:[#allocation20 + $0xe8] sm:$0xff] }
 0xd6a   : > { %v4086_v50 = vor.u32 %v4498_v47, %v4085_v6  ;;  %2754 = vmatpush.bf16.msrb.mxu1 %v4514_v33  ;;  %v5870_v6 = vld [vmem:[%s5976_s22 + $0x4] sm:$0xf] }
 0xd6b   : > { %2446 = vadd.xlane.f32.xlu1 %v2445_v34  ;;  %v2466_v48 = vperm.slane %v5870_v6, 0  ;;  %v2468_v52 = vperm.slane %v5870_v6, 1  ;;  %v2786_v29 = vperm.slane %v5870_v6, 2  ;;  %v2788_v32 = vperm.slane %v5870_v6, 3  ;;  %v4520_v6 = vld [vmem:[#allocation23 + $0x18] sm:$0xff] }
 0xd6c   : > { %2576 = vmatpush.bf16.msra.mxu2 %v4086_v50 }
 0xd6e   : > { %v2441_v35 = vpop.f32.mrf.mxu1 }
 0xd6f   : > { %v4513_v35 = vld [vmem:[#allocation20 + $0xe0] sm:$0xff] }
 0xd70   : > { %2577 = vmatpush.bf16.msra.mxu2 %v4078_v56  ;;  %2755 = vmatpush.bf16.msrb.mxu1 %v4513_v35  ;;  %v4502_v56 = vld [vmem:[#allocation20 + $0x88] sm:$0xff] }
 0xd74   : > { %2578 = vmatpush.bf16.msra.mxu2 %v4070_v61  ;;  %2756 = vmatpush.bf16.msrb.mxu1 %v4512_v40  ;;  %v2492_v61 = vperm.slane %v2488_v59, 1 }
 0xd78   : > { %2579 = vmatpush.bf16.msra.mxu2 %v4062_v5 }
 0xd7c   : > { %2580 = vmatpush.bf16.msra.mxu2 %v4054_v13 }
 0xd80   : > { %2581 = vmatpush.bf16.msra.mxu2 %v4046_v17 }
 0xd84   : > { %2582 = vmatpush.bf16.msra.mxu2 %v4038_v23 }
 0xdde   : > { %v2447_v43 = vpop.xlane.xlu1 %2446 }
 0xddf   : > { %v2448_v44 = vmul.f32 %v2447_v43, %v5785_v62  ;;  %v4503_v43 = vld [vmem:[#allocation20 + $0x90] sm:$0xff] }
 0xde1   : > { %v5862_v45 = vsub.f32 %v2445_v34, %v2448_v44  ;;  %v4505_v34 = vld [vmem:[#allocation20 + $0xa0] sm:$0xff]  ;;  %v4511_v44 = vld [vmem:[#allocation20 + $0xd0] sm:$0xff] }
 0xde2   : > { %2742 = vmatpush.bf16.msra.mxu0 %v4505_v34  ;;  %2757 = vmatpush.bf16.msrb.mxu1 %v4511_v44  ;;  %v4522_v44 = vld [vmem:[#allocation23 + $0x28] sm:$0xff] }
 0xde3   : > { %v2450_v46 = vmul.f32 %v5862_v45, %v5862_v45 }
 0xde5   : > { %2451 = vadd.xlane.f32.xlu2 %v2450_v46 }
 0xde6   : > { %2743 = vmatpush.bf16.msra.mxu0 %v4504_v39  ;;  %2758 = vmatpush.bf16.msrb.mxu1 %v4510_v57  ;;  %v4546_v57 = vld [vmem:[#allocation25 + $0xac] sm:$0xf] }
 0xdea   : > { %2744 = vmatpush.bf16.msra.mxu0 %v4503_v43  ;;  %2759 = vmatpush.bf16.msrb.mxu1 %v4509_v58  ;;  %v4523_v43 = vld [vmem:[#allocation23 + $0x30] sm:$0xff] }
 0xdeb   : > { %v4289_v58 = vld [vmem:[#allocation25 + $0xb0] sm:$0xf] }
 0xdee   : > { %2745 = vmatpush.bf16.msra.mxu0 %v4502_v56 }
 0xdf2   : > { %2746 = vmatpush.bf16.msra.mxu0 %v4501_v36  ;;  %v4283_v36 = vld [vmem:[#allocation25 + $0xb4] sm:$0xf0] }
 0xdf3   : > { %v4286_v59 = vor.u32 %v4546_v57, %v4283_v36 }
 0xdf6   : > { %3090 = vmatpush.bf16.msrb.mxu0 %v4286_v59 }
 0xe58   : > { %v2452_v28 = vpop.xlane.xlu2 %2451 }
 0xe59   : > { %v2453_v27 = vmul.f32 %v2452_v28, %v5785_v62 }
 0xe5b   : > { %v2454_v31 = vadd.f32 1e-05, %v2453_v27 }
 0xe5d   : > { %4822 = vrsqrt.f32 %v2454_v31  ;;  %vm2461_vm14 = vweird.f32 %v2454_v31 }
 0xe63   : > { %v4823_v37 = vpop.eup %4822 }
 0xe64   : > { %v2456_v38 = vmul.f32 %v4823_v37, %v2454_v31  ;;  %vm2462_vm13 = vweird.f32 %v4823_v37 }
 0xe65   : > { %vm2463_vm15 = vmor %vm2461_vm14, %vm2462_vm13 }
 0xe66   : > { %v2457_v41 = vmul.f32 %v4823_v37, %v2456_v38 }
 0xe68   : > { %v2458_v42 = vmul.f32 0.5, %v2457_v41 }
 0xe6a   : > { %v2459_v46 = vsub.f32 1.5, %v2458_v42  ;;  %v4524_v42 = vld [vmem:[#allocation23 + $0x38] sm:$0xff] }
 0xe6b   : > { %2892 = vmatpush.bf16.msrb.mxu2 %v4524_v42 }
 0xe6c   : > { %v2460_v47 = vmul.f32 %v4823_v37, %v2459_v46  ;;  %v4521_v46 = vld [vmem:[#allocation23 + $0x20] sm:$0xff] }
 0xe6e   : > { %v2464_v50 = vsel %vm2463_vm15, %v4823_v37, %v2460_v47  ;;  %v4519_v47 = vld [vmem:[#allocation23 + $0x10] sm:$0xff] }
 0xe6f   : > { %v2465_v51 = vmul.f32 %v2464_v50, %v5862_v45  ;;  %2893 = vmatpush.bf16.msrb.mxu2 %v4523_v43  ;;  %v4517_v50 = vld [vmem:[#allocation23] sm:$0xff] }
 0xe71   : > { %v2467_v53 = vmul.f32 %v2466_v48, %v2465_v51  ;;  %v4518_v48 = vld [vmem:[#allocation23 + $0x8] sm:$0xff] }
 0xe73   : > { %v2469_v54 = vadd.f32 %v2468_v52, %v2467_v53  ;;  %2894 = vmatpush.bf16.msrb.mxu2 %v4522_v44  ;;  %v4531_v44 = vld [vmem:[#allocation25 + $0x34] sm:$0xf] }
 0xe75   : > { %v2489_v55 = vpack.c.bf16 %v2469_v54, %v2469_v54 }
 0xe77   : > { %2583 = vmatmul.bf16.vlgmr.msra.gmra.mxu2 %v2489_v55  ;;  %2596 = vmatmul.bf16.vlgmr.msra.gmra.mxu3 %v2489_v55  ;;  %v4547_v55 = vld [vmem:[#allocation25 + $0xb0] sm:$0xf0] }
 0xe78   : > { %2895 = vmatpush.bf16.msrb.mxu2 %v4521_v46  ;;  %v4223_v46 = vld [vmem:[#allocation25 + $0x3c] sm:$0xf0] }
 0xe7c   : > { %2896 = vmatpush.bf16.msrb.mxu2 %v4520_v6 }
 0xe80   : > { %2897 = vmatpush.bf16.msrb.mxu2 %v4519_v47  ;;  %v4229_v47 = vld [vmem:[#allocation25 + $0x38] sm:$0xf] }
 0xe84   : > { %2898 = vmatpush.bf16.msrb.mxu2 %v4518_v48  ;;  %v4533_v48 = vld [vmem:[#allocation25 + $0x40] sm:$0xf0] }
 0xe88   : > { %2899 = vmatpush.bf16.msrb.mxu2 %v4517_v50 }
 0xefa   : > { %v2584_v16 = vpop.f32.mrf.mxu2  ;;  %v2597_v45 = vpop.f32.mrf.mxu3 }
 0xefb   : > { %v2585_v63 = vadd.f32 %v2584_v16, %v2491_v60  ;;  %v2598_v1 = vadd.f32 %v2597_v45, %v2492_v61  ;;  %v4548_v60 = vld [vmem:[#allocation25 + $0xb8] sm:$0xf0]  ;;  %v4269_v61 = vld [vmem:[#allocation25 + $0x90] sm:$0xf] }
 0xefc   : > { %v4544_v16 = vld [vmem:[#allocation25 + $0x98] sm:$0xf0]  ;;  %v4290_v45 = vor.u32 %v4548_v60, %v4289_v58  ;;  %v4209_v60 = vld [vmem:[#allocation25 + $0x18] sm:$0xf] }
 0xefd   : > { %v2601_v2 = vmax.f32 %v2585_v63, 0.0  ;;  %v2602_v4 = vmax.f32 %v2598_v1, 0.0  ;;  %v4270_v63 = vor.u32 %v4544_v16, %v4269_v61  ;;  %v4543_v1 = vld [vmem:[#allocation25 + $0x94] sm:$0xf]  ;;  %v4529_v61 = vld [vmem:[#allocation25 + $0x20] sm:$0xf0] }
 0xefe   : > { %3103 = vmatpush.bf16.msra.mxu1 %v4290_v45  ;;  %v4528_v16 = vld [vmem:[#allocation25 + $0x1c] sm:$0xf]  ;;  %v4210_v45 = vor.u32 %v4529_v61, %v4209_v60 }
 0xeff   : > { %v2638_v5 = vpack.c.bf16 %v2601_v2, %v2601_v2  ;;  %v2639_v7 = vpack.c.bf16 %v2602_v4, %v2602_v4  ;;  %v4277_v2 = vld [vmem:[#allocation25 + $0x98] sm:$0xf] }
 0xf01   : > { %2747 = vmatmul.bf16.vlgmr.msra.gmra.mxu0 %v2638_v5  ;;  %2760 = vmatmul.bf16.vlgmr.msrb.gmra.mxu1 %v2639_v7  ;;  %v4545_v5 = vld [vmem:[#allocation25 + $0xa0] sm:$0xf0]  ;;  %v4257_v7 = vld [vmem:[#allocation25 + $0x78] sm:$0xf] }
 0xf02   : > { %v2586_v8 = vpop.f32.mrf.mxu2  ;;  %v2599_v9 = vpop.f32.mrf.mxu3 }
 0xf03   : > { %v4541_v8 = vld [vmem:[#allocation25 + $0x80] sm:$0xf0]  ;;  %v4278_v9 = vor.u32 %v4545_v5, %v4277_v2  ;;  %v4526_v5 = vld [vmem:[#allocation25 + $0x8] sm:$0xf0] }
 0xf05   : > { %3104 = vmatpush.bf16.msra.mxu1 %v4278_v9  ;;  %v4199_v9 = vld [vmem:[#allocation25 + $0xc] sm:$0xf0] }
 0xf7e   : > { %v2748_v12 = vpop.f32.mrf.mxu0  ;;  %v2761_v13 = vpop.f32.mrf.mxu1 }
 0xf7f   : > { %v2749_v11 = vadd.f32 %v4783_v10, %v2748_v12  ;;  %v4540_v10 = vld [vmem:[#allocation25 + $0x7c] sm:$0xf]  ;;  %v4259_v12 = vld [vmem:[#allocation25 + $0x84] sm:$0xf0] }
 0xf81   : > { %v2762_v49 = vadd.f32 %v2761_v13, %v2749_v11  ;;  %v4265_v13 = vld [vmem:[#allocation25 + $0x80] sm:$0xf]  ;;  %v4542_v11 = vld [vmem:[#allocation25 + $0x88] sm:$0xf0] }
 0xf83   : > { %v2765_v3 = vadd.f32 %v2762_v49, %v2469_v54  ;;  %v4281_v54 = vld [vmem:[#allocation25 + $0xa8] sm:$0xf]  ;;  %v4258_v49 = vor.u32 %v4541_v8, %v4257_v7  ;;  %v4525_v7 = vld [vmem:[#allocation25 + $0x4] sm:$0xf] }
 0xf84   : > { %v4282_v56 = vor.u32 %v4547_v55, %v4281_v54  ;;  %v4226_v55 = vor.u32 %v4531_v44, %v4223_v46  ;;  %v4549_v44 = vld [vmem:[#allocation26] sm:$0xff] }
 0xf85   : > { %2766 = vadd.xlane.f32.xlu0 %v2765_v3  ;;  %v2940_v46 = vld [vmem:[%s5979_s23] sm:$0x7] }
 0xf86   : > { %v2750_v14 = vpop.f32.mrf.mxu0  ;;  %v2763_v15 = vpop.f32.mrf.mxu1  ;;  %3077 = vmatpush.bf16.msrb.mxu3 %v4282_v56  ;;  %v4230_v56 = vor.u32 %v4533_v48, %v4229_v47  ;;  %v3073_v47 = vperm.slane %v2940_v46, 2 }
 0xf87   : > { %v4262_v14 = vor.u32 %v4540_v10, %v4259_v12  ;;  %v4245_v15 = vld [vmem:[#allocation25 + $0x60] sm:$0xf]  ;;  %v4205_v10 = vld [vmem:[#allocation25 + $0x8] sm:$0xf]  ;;  %v4527_v12 = vld [vmem:[#allocation25 + $0x10] sm:$0xf0] }
 0xf8a   : > { %3078 = vmatpush.bf16.msrb.mxu3 %v4270_v63  ;;  %v4211_v63 = vld [vmem:[#allocation25 + $0x24] sm:$0xf0] }
 0xf8e   : > { %3079 = vmatpush.bf16.msrb.mxu3 %v4258_v49  ;;  %v4564_v49 = vld [vmem:[#allocation26 + $0x78] sm:$0xff] }
 0xff8   : > { %v2767_v17 = vpop.xlane.xlu0 %2766 }
 0xff9   : > { %v2768_v18 = vmul.f32 %v2767_v17, %v5785_v62  ;;  %v4538_v17 = vld [vmem:[#allocation25 + $0x68] sm:$0xf0] }
 0xffb   : > { %v2769_v19 = vsub.f32 %v2765_v3, %v2768_v18 }
 0xffd   : > { %v2770_v20 = vmul.f32 %v2769_v19, %v2769_v19 }
 0xfff   : > { %2771 = vadd.xlane.f32.xlu1 %v2770_v20  ;;  %v4537_v20 = vld [vmem:[#allocation25 + $0x64] sm:$0xf] }
0x1072   : > { %v2772_v0 = vpop.xlane.xlu1 %2771 }
0x1073   : > { %v2773_v21 = vmul.f32 %v2772_v0, %v5785_v62  ;;  %v4247_v0 = vld [vmem:[#allocation25 + $0x6c] sm:$0xf0] }
0x1075   : > { %v2774_v22 = vadd.f32 1e-05, %v2773_v21  ;;  %v4253_v21 = vld [vmem:[#allocation25 + $0x68] sm:$0xf] }
0x1077   : > { %4824 = vrsqrt.f32 %v2774_v22  ;;  %vm2781_vm1 = vweird.f32 %v2774_v22 }
0x107d   : > { %v4825_v23 = vpop.eup %4824 }
0x107e   : > { %v2776_v24 = vmul.f32 %v4825_v23, %v2774_v22  ;;  %vm2782_vm0 = vweird.f32 %v4825_v23  ;;  %v4539_v22 = vld [vmem:[#allocation25 + $0x70] sm:$0xf0] }
0x107f   : > { %vm2783_vm2 = vmor %vm2781_vm1, %vm2782_vm0 }
0x1080   : > { %v2777_v25 = vmul.f32 %v4825_v23, %v2776_v24  ;;  %v4246_v24 = vor.u32 %v4538_v17, %v4245_v15  ;;  %v4563_v15 = vld [vmem:[#allocation26 + $0x70] sm:$0xff] }
0x1081   : > { %v4571_v17 = vld [vmem:[#allocation26 + $0xb0] sm:$0xff] }
0x1082   : > { %v2778_v26 = vmul.f32 0.5, %v2777_v25  ;;  %v4250_v25 = vor.u32 %v4537_v20, %v4247_v0  ;;  %3080 = vmatpush.bf16.msrb.mxu3 %v4246_v24  ;;  %v4570_v20 = vld [vmem:[#allocation26 + $0xa8] sm:$0xff]  ;;  %v4560_v24 = vld [vmem:[#allocation26 + $0x58] sm:$0xff] }
0x1083   : > { %v4554_v0 = vld [vmem:[#allocation26 + $0x28] sm:$0xff] }
0x1084   : > { %v2779_v28 = vsub.f32 1.5, %v2778_v26  ;;  %v4233_v26 = vld [vmem:[#allocation25 + $0x48] sm:$0xf] }
0x1086   : > { %v2780_v27 = vmul.f32 %v4825_v23, %v2779_v28  ;;  %v4535_v28 = vld [vmem:[#allocation25 + $0x50] sm:$0xf0] }
0x1088   : > { %v2784_v30 = vsel %vm2783_vm2, %v4825_v23, %v2780_v27 }
0x1089   : > { %v2785_v31 = vmul.f32 %v2784_v30, %v2769_v19  ;;  %v4266_v19 = vor.u32 %v4542_v11, %v4265_v13  ;;  %v4534_v30 = vld [vmem:[#allocation25 + $0x4c] sm:$0xf]  ;;  %v4202_v13 = vor.u32 %v4525_v7, %v4199_v9  ;;  %v4206_v11 = vor.u32 %v4527_v12, %v4205_v10 }
0x108b   : > { %v2787_v33 = vmul.f32 %v2786_v29, %v2785_v31  ;;  %3105 = vmatpush.bf16.msra.mxu1 %v4266_v19  ;;  %v4254_v29 = vor.u32 %v4539_v22, %v4253_v21  ;;  %v4235_v31 = vld [vmem:[#allocation25 + $0x54] sm:$0xf0]  ;;  %v4562_v19 = vld [vmem:[#allocation26 + $0x68] sm:$0xff]  ;;  %v4561_v21 = vld [vmem:[#allocation26 + $0x60] sm:$0xff] }
0x108c   : > { %v4569_v22 = vld [vmem:[#allocation26 + $0xa0] sm:$0xff] }
0x108d   : > { %v2789_v34 = vadd.f32 %v2788_v32, %v2787_v33  ;;  %v4241_v32 = vld [vmem:[#allocation25 + $0x50] sm:$0xf]  ;;  %v4536_v33 = vld [vmem:[#allocation25 + $0x58] sm:$0xf0] }
0x108e   : > { %v4242_v43 = vor.u32 %v4536_v33, %v4241_v32 }
0x108f   : > { %v2792_v35 = vsel %vm2791_vm3, %v2789_v34, 0.0  ;;  %3106 = vmatpush.bf16.msra.mxu1 %v4254_v29  ;;  %v2837_v29 = vld [vmem:[%s5978_s18] sm:$0x1] }
0x1090   : > { %2793 = vadd.xlane.f32.xlu2 %v2792_v35  ;;  %v2790_v35 = vld [vmem:[%s5977_s24] sm:$0x3] }
0x1091   : > { %v2815_v6 = vrot.slane %v2790_v35, 1  ;;  %v2818_v54 = vrot.slane %v2790_v35, 2 }
0x1093   : > { %3107 = vmatpush.bf16.msra.mxu1 %v4242_v43  ;;  %v4550_v43 = vld [vmem:[#allocation26 + $0x8] sm:$0xff] }
0x1097   : > { %3108 = vmatpush.bf16.msra.mxu1 %v4230_v56 }
0x1103   : > { %v2794_v37 = vpop.xlane.xlu2 %2793 }
0x1104   : > { %v2795_v38 = vmul.f32 %v2794_v37, %v5785_v62  ;;  %v4234_v37 = vor.u32 %v4535_v28, %v4233_v26  ;;  %v4552_v26 = vld [vmem:[#allocation26 + $0x18] sm:$0xff]  ;;  %v4559_v28 = vld [vmem:[#allocation26 + $0x50] sm:$0xff] }
0x1106   : > { %v5880_v39 = vsub.f32 %v2789_v34, %v2795_v38  ;;  %v4238_v38 = vor.u32 %v4534_v30, %v4235_v31  ;;  %3081 = vmatpush.bf16.msrb.mxu3 %v4234_v37  ;;  %v4558_v37 = vld [vmem:[#allocation26 + $0x48] sm:$0xff] }
0x1108   : > { %v2797_v40 = vmul.f32 %v5880_v39, %v5880_v39 }
0x110a   : > { %v2798_v41 = vsel %vm2791_vm3, %v2797_v40, 0.0  ;;  %v4221_v40 = vld [vmem:[#allocation25 + $0x30] sm:$0xf] }
0x110b   : > { %2799 = vadd.xlane.f32.xlu0 %v2798_v41  ;;  %v4532_v41 = vld [vmem:[#allocation25 + $0x38] sm:$0xf0] }
0x117e   : > { %v2800_v51 = vpop.xlane.xlu0 %2799 }
0x117f   : > { %v2801_v52 = vmul.f32 %v2800_v51, %v5785_v62  ;;  %v4271_v62 = vld [vmem:[#allocation25 + $0x9c] sm:$0xf0]  ;;  %v4222_v51 = vor.u32 %v4532_v41, %v4221_v40  ;;  %v4551_v40 = vld [vmem:[#allocation26 + $0x10] sm:$0xff] }
0x1180   : > { %v4274_v4 = vor.u32 %v4543_v1, %v4271_v62  ;;  %v4530_v1 = vld [vmem:[#allocation25 + $0x28] sm:$0xf0]  ;;  %v4214_v62 = vor.u32 %v4528_v16, %v4211_v63  ;;  %v4557_v41 = vld [vmem:[#allocation26 + $0x40] sm:$0xff] }
0x1181   : > { %v5885_v53 = vadd.f32 1e-05, %v2801_v52  ;;  %3082 = vmatpush.bf16.msrb.mxu3 %v4222_v51 }
0x1182   : > { %3091 = vmatpush.bf16.msrb.mxu0 %v4274_v4  ;;  %v4197_v4 = vld [vmem:[#allocation25] sm:$0xf] }
0x1183   : > { %4826 = vrsqrt.f32 %v5885_v53  ;;  %vm2809_vm5 = vweird.f32 %v5885_v53  ;;  %v4198_v8 = vor.u32 %v4526_v5, %v4197_v4  ;;  %v3173_v5 = vld [vmem:[%s5980_s2] sm:$0x1] }
0x1185   : > { %3083 = vmatpush.bf16.msrb.mxu3 %v4210_v45 }
0x1186   : > { %3092 = vmatpush.bf16.msrb.mxu0 %v4262_v14  ;;  %v4556_v14 = vld [vmem:[#allocation26 + $0x38] sm:$0xff] }
0x1187   : > { %3321 = vmatpush.bf16.msra.mxu2 %v4556_v14 }
0x1189   : > { %v4827_v3 = vpop.eup %4826  ;;  %3084 = vmatpush.bf16.msrb.mxu3 %v4198_v8 }
0x118a   : > { %v2804_v18 = vmul.f32 %v4827_v3, %v5885_v53  ;;  %vm2810_vm4 = vweird.f32 %v4827_v3  ;;  %3093 = vmatpush.bf16.msrb.mxu0 %v4250_v25  ;;  %v4568_v25 = vld [vmem:[#allocation26 + $0x98] sm:$0xff] }
0x118b   : > { %vm2811_vm6 = vmor %vm2809_vm5, %vm2810_vm4 }
0x118c   : > { %v2805_v23 = vmul.f32 %v4827_v3, %v2804_v18  ;;  %v4555_v18 = vld [vmem:[#allocation26 + $0x30] sm:$0xff] }
0x118d   : > { %3334 = vmatpush.bf16.msra.mxu3 %v4564_v49  ;;  %3322 = vmatpush.bf16.msra.mxu2 %v4555_v18 }
0x118e   : > { %v2806_v27 = vmul.f32 0.5, %v2805_v23  ;;  %3094 = vmatpush.bf16.msrb.mxu0 %v4238_v38  ;;  %v4553_v23 = vld [vmem:[#allocation26 + $0x20] sm:$0xff]  ;;  %v4566_v38 = vld [vmem:[#allocation26 + $0x88] sm:$0xff] }
0x1190   : > { %v2807_v34 = vsub.f32 1.5, %v2806_v27  ;;  %v4567_v27 = vld [vmem:[#allocation26 + $0x90] sm:$0xff] }
0x1191   : > { %3335 = vmatpush.bf16.msra.mxu3 %v4563_v15  ;;  %3323 = vmatpush.bf16.msra.mxu2 %v4554_v0 }
0x1192   : > { %v2808_v42 = vmul.f32 %v4827_v3, %v2807_v34  ;;  %3095 = vmatpush.bf16.msrb.mxu0 %v4226_v55  ;;  %v3071_v55 = vperm.slane %v2940_v46, 0 }
0x1194   : > { %v2812_v50 = vsel %vm2811_vm6, %v4827_v3, %v2808_v42  ;;  %v4572_v3 = vld [vmem:[#allocation26 + $0xb8] sm:$0xff]  ;;  %v4565_v42 = vld [vmem:[#allocation26 + $0x80] sm:$0xff] }
0x1195   : > { %v2813_v52 = vmul.f32 %v2812_v50, %v5880_v39  ;;  %v4217_v39 = vld [vmem:[#allocation25 + $0x20] sm:$0xf]  ;;  %3336 = vmatpush.bf16.msra.mxu3 %v4562_v19  ;;  %3324 = vmatpush.bf16.msra.mxu2 %v4553_v23  ;;  %v3375_v19 = vlaneseq }
0x1196   : > { %v4218_v2 = vor.u32 %v4530_v1, %v4217_v39  ;;  %3096 = vmatpush.bf16.msrb.mxu0 %v4214_v62 }
0x1197   : > { %v2817_v57 = vmul.f32 %v2815_v6, %v2813_v52  ;;  %v3072_v6 = vperm.slane %v2940_v46, 1  ;;  %v3376_v23 = vand.u32 127, %v3375_v19 }
0x1198   : > { %3109 = vmatpush.bf16.msra.mxu1 %v4218_v2 }
0x1199   : > { %v2820_v53 = vadd.f32 %v2818_v54, %v2817_v57  ;;  %3337 = vmatpush.bf16.msra.mxu3 %v4561_v21  ;;  %3325 = vmatpush.bf16.msra.mxu2 %v4552_v26  ;;  %vm3380_vm12 = vcmp.eq.s32.totalorder %v3376_v23, 2  ;;  %vm3378_vm13 = vcmp.eq.s32.totalorder %v3376_v23, 1  ;;  %vm3377_vm14 = vcmp.eq.s32.totalorder %v3376_v23, 0 }
0x119a   : > { %3097 = vmatpush.bf16.msrb.mxu0 %v4202_v13 }
0x119b   : > { %v2838_v36 = vpack.c.bf16 %v2820_v53, %v2820_v53 }
0x119c   : > { %3110 = vmatpush.bf16.msra.mxu1 %v4206_v11 }
0x119d   : > { %v2840_v58 = vshrl.u32 %v2838_v36, 16  ;;  %3338 = vmatpush.bf16.msra.mxu3 %v4560_v24  ;;  %3326 = vmatpush.bf16.msra.mxu2 %v4551_v40 }
0x119e   : > { %3347 = vmatpush.bf16.msra.mxu0 %v4572_v3 }
0x119f   : > { %v2842_v59 = vrot.slane %v2840_v58, 3 }
0x11a1   : > { %2900 = vmatmul.bf16.vlgmr.msrb.gmra.mxu2 %v2842_v59  ;;  %3339 = vmatpush.bf16.msra.mxu3 %v4559_v28 }
0x11a2   : > { %3348 = vmatpush.bf16.msra.mxu0 %v4571_v17  ;;  %3327 = vmatpush.bf16.msra.mxu2 %v4550_v43 }
0x11a5   : > { %3340 = vmatpush.bf16.msra.mxu3 %v4558_v37 }
0x11a6   : > { %3349 = vmatpush.bf16.msra.mxu0 %v4570_v20  ;;  %3328 = vmatpush.bf16.msra.mxu2 %v4549_v44 }
0x11a9   : > { %3341 = vmatpush.bf16.msra.mxu3 %v4557_v41 }
0x11aa   : > { %3350 = vmatpush.bf16.msra.mxu0 %v4569_v22 }
0x11ae   : > { %3351 = vmatpush.bf16.msra.mxu0 %v4568_v25 }
0x11b2   : > { %3352 = vmatpush.bf16.msra.mxu0 %v4567_v27 }
0x11b6   : > { %3353 = vmatpush.bf16.msra.mxu0 %v4566_v38 }
0x11ba   : > { %3354 = vmatpush.bf16.msra.mxu0 %v4565_v42 }
0x1224   : > { %v2901_v30 = vpop.f32.mrf.mxu2 }
0x1225   : > { %v2902_v31 = vadd.f32 %v2901_v30, %v2837_v29 }
0x1227   : > { %vm2905_vm7 = vcmp.gt.f32.partialorder %v2902_v31, 0.0  ;;  %v2906_v32 = vmul.f32 0.1, %v2902_v31 }
0x1229   : > { %v2907_v33 = vsel %vm2905_vm7, %v2902_v31, %v2906_v32 }
0x122a   : > { %v2941_v34 = vpack.c.bf16 %v2907_v33, %v2907_v33 }
0x122c   : > { %v2903_v35 = vpop.f32.mrf.mxu2  ;;  %3085 = vmatmul.bf16.vlgmr.msrb.gmra.mxu3 %v2941_v34  ;;  %3098 = vmatmul.bf16.vlgmr.msrb.gmra.mxu0 %v2941_v34 }
0x122d   : > { %3111 = vmatmul.bf16.vlgmr.msra.gmra.mxu1 %v2941_v34 }
0x12a9   : > { %v3099_v48 = vpop.f32.mrf.mxu0 }
0x12aa   : > { %v3100_v50 = vadd.f32 %v3099_v48, %v3072_v6  ;;  %v3112_v51 = vpop.f32.mrf.mxu1 }
0x12ab   : > { %v3113_v52 = vadd.f32 %v3112_v51, %v3073_v47 }
0x12ac   : > { %vm3117_vm8 = vcmp.gt.f32.partialorder %v3100_v50, 0.0  ;;  %v3120_v54 = vmul.f32 0.1, %v3100_v50 }
0x12ad   : > { %vm3118_vm9 = vcmp.gt.f32.partialorder %v3113_v52, 0.0  ;;  %v3121_v56 = vmul.f32 0.1, %v3113_v52 }
0x12ae   : > { %v3123_v57 = vsel %vm3117_vm8, %v3100_v50, %v3120_v54 }
0x12af   : > { %v3175_v53 = vpack.c.bf16 %v3123_v57, %v3123_v57  ;;  %v3124_v36 = vsel %vm3118_vm9, %v3113_v52, %v3121_v56  ;;  %v3086_v58 = vpop.f32.mrf.mxu3 }
0x12b0   : > { %v3176_v59 = vpack.c.bf16 %v3124_v36, %v3124_v36  ;;  %v3087_v60 = vadd.f32 %v3086_v58, %v3071_v55 }
0x12b1   : > { %v3101_v61 = vpop.f32.mrf.mxu0  ;;  %3342 = vmatmul.bf16.vlgmr.msra.gmra.mxu3 %v3175_v53 }
0x12b2   : > { %vm3116_vm10 = vcmp.gt.f32.partialorder %v3087_v60, 0.0  ;;  %v3119_v16 = vmul.f32 0.1, %v3087_v60  ;;  %v3114_v45 = vpop.f32.mrf.mxu1  ;;  %3355 = vmatmul.bf16.vlgmr.msra.gmra.mxu0 %v3176_v59 }
0x12b4   : > { %v3122_v63 = vsel %vm3116_vm10, %v3087_v60, %v3119_v16 }
0x12b5   : > { %v3174_v39 = vpack.c.bf16 %v3122_v63, %v3122_v63 }
0x12b7   : > { %v3088_v1 = vpop.f32.mrf.mxu3  ;;  %3329 = vmatmul.bf16.vlgmr.msra.gmra.mxu2 %v3174_v39 }
0x132f   : > { %v3356_v62 = vpop.f32.mrf.mxu0 }
0x1334   : > { %v3343_v2 = vpop.f32.mrf.mxu3 }
0x1337   : > { %v3358_v4 = vpop.f32.mrf.mxu0 }
0x133a   : > { %v3330_v7 = vpop.f32.mrf.mxu2 }
0x133b   : > { %v3331_v8 = vadd.f32 %v3330_v7, %v3173_v5 }
0x133c   : > { %v3345_v9 = vpop.f32.mrf.mxu3 }
0x133d   : > { %v3344_v10 = vadd.f32 %v3343_v2, %v3331_v8 }
0x133f   : > { %v3357_v12 = vadd.f32 %v3356_v62, %v3344_v10 }
0x1341   : > { %v3361_v13 = vand.u32 2147483647, %v3357_v12  ;;  %v3360_v24 = vmax.f32 %v3357_v12, 0.0 }
0x1342   : > { %v3332_v11 = vpop.f32.mrf.mxu2 }
0x1343   : > { %v3362_v49 = vsub.f32 0.0, %v3361_v13 }
0x1345   : > { %v3363_v3 = vmul.f32 1.442695, %v3362_v49 }
0x1347   : > { %4828 = vpow2.f32 %v3363_v3 }
0x134d   : > { %v4829_v14 = vpop.eup %4828 }
0x134e   : > { %v3365_v15 = vadd.f32 1.0, %v4829_v14  ;;  %v3368_v17 = vmul.f32 -0.5, %v4829_v14  ;;  %v3371_v20 = vand.u32 2147483647, %v4829_v14 }
0x1350   : > { %4830 = vlog2.f32 %v3365_v15  ;;  %v3369_v18 = vadd.f32 1.0, %v3368_v17  ;;  %vm3372_vm11 = vcmp.lt.f32.partialorder %v3371_v20, 0.0004427343 }
0x1352   : > { %v3370_v22 = vmul.f32 %v4829_v14, %v3369_v18 }
0x1356   : > { %v4831_v0 = vpop.eup %4830 }
0x1357   : > { %v3367_v21 = vmul.f32 0.6931472, %v4831_v0 }
0x1359   : > { %v3373_v25 = vsel %vm3372_vm11, %v3370_v22, %v3367_v21 }
0x135a   : > { %v3374_v26 = vadd.f32 %v3373_v25, %v3360_v24 }
0x135c   : > { %v3379_v28 = vadd.f32 0.001, %v3374_v26  ;;  %v3381_v27 = vadd.f32 2.0, %v3374_v26 }
0x135e   : > { %v3382_v29 = vsel %vm3380_vm12, %v3381_v27, 0.0 }
0x135f   : > { %v3383_v30 = vsel %vm3378_vm13, %v3379_v28, %v3382_v29 }
0x1360   : > { %v3384_v31 = vsel %vm3377_vm14, %v3357_v12, %v3383_v30 }
0x1361   : > { %3385 = vst [vmem:[%s911_s21] sm:$0x1] %v3384_v31 }
0x1362 PF: > { %p39_p3 = scmp.ge.s32.totalorder %s5653_s14, 4   ;;  %s5982_s2 = smov %s5370_s25 }
0x1363   : > { %s5983_s25 = smov %s5374_s26  ;;  %s5984_s26 = smov %s5664_s20 }
0x1364   : > { %s5985_s27 = smov %s5653_s14  ;;  %41 = sbr.rel (!%p39_p3) target bundleno = 25 (0x19), region = 213 }
0x1369   :  { %3403 = vsyncpa [#allocation4], 1 }
0x136a   :  { %3405 = vsyncpa [#allocation4 + $0x1], 1 }
0x136b   :  { %3406 = vsyncpa [#allocation6], 1 }
0x136c   :  { %3407 = vsyncpa [#allocation9], 1 }
0x136d   :  { %3408 = vsyncpa [#allocation12], 1 }
0x136e   :  { %3409 = vsyncpa [#allocation15], 1 }
0x136f   :  { %3410 = vsyncpa [#allocation18], 1 }
0x1370   :  { %3411 = vsyncpa [#allocation21], 1 }
0x1371   :  { %3412 = vsyncpa [#allocation24], 1 }
0x1372   :  { %3413 = vsyncpa [#allocation27], 1 }

</bundles_post_ra>
